<compile_context>
chip_gen: v5e
topology: v5e:2x2
jax: 0.10.0
libtpu: 0.0.40
codegen_flags: <defaults>
</compile_context>

<pallas_src>
import jax
import jax.numpy as jnp
from jax.experimental import pallas as pl
from jax.experimental.pallas import tpu as pltpu


# ----------------------------------------------------------------------------
# Fused Pallas kernel: whole bottleneck for one image per grid step.
# ----------------------------------------------------------------------------
def _make_bottleneck_kernel(H, W, planes):
    HW = H * W

    def kernel(x_ref, w1_ref, b1_ref, w2_ref, b2_ref, w3_ref, b3_ref,
               ml_ref, mr_ref, o_ref, p_ref):
        # ---------- conv1 (1x1) + folded-bn1 + relu ----------
        x = x_ref[...]                                          # bf16 (HW, Cin)
        o1 = jnp.dot(x, w1_ref[...], preferred_element_type=jnp.float32)
        o1 = jnp.maximum(o1 + b1_ref[...], 0.0)                 # f32 (HW, planes)

        # Stage o1 into a VMEM buffer padded with one zero image-row (+1 pixel)
        # on each side so that every 3x3 tap becomes a contiguous flat window.
        p_ref[...] = jnp.zeros_like(p_ref)
        p_ref[pl.ds(W + 1, HW), :] = o1

        # ---------- conv2 (3x3, pad=1, stride=1) as 9 shifted matmuls ----------
        ml = ml_ref[...]                                        # bf16 (HW, 1)
        mr = mr_ref[...]                                        # bf16 (HW, 1)
        acc = jnp.zeros((HW, planes), jnp.float32)
        k = 0
        for sh in (-1, 0, 1):                                   # static unroll (9 taps)
            for sw in (-1, 0, 1):
                start = (W + 1) + sh * W + sw                   # static offset
                win = p_ref[pl.ds(start, HW), :].astype(jnp.bfloat16)
                if sw == -1:                                    # mask wrapped columns
                    win = win * ml
                elif sw == 1:
                    win = win * mr
                acc = acc + jnp.dot(win, w2_ref[k],
                                    preferred_element_type=jnp.float32)
                k += 1
        o2 = jnp.maximum(acc + b2_ref[...], 0.0).astype(jnp.bfloat16)

        # ---------- conv3 (1x1) + folded-bn3 + identity residual + relu ----------
        y = jnp.dot(o2, w3_ref[...], preferred_element_type=jnp.float32)
        y = y + b3_ref[...] + x.astype(jnp.float32)             # residual == x block
        o_ref[...] = jnp.maximum(y, 0.0)

    return kernel


def _fused_bottleneck_call(x2d_bf16, fp, N, H, W):
    HW = H * W
    Cin = x2d_bf16.shape[1]
    planes = fp["w1"].shape[1]
    C4 = fp["w3"].shape[1]

    flops = 2 * N * HW * (Cin * planes + 9 * planes * planes + planes * C4)
    operands = (x2d_bf16, fp["w1"], fp["b1"], fp["w2"], fp["b2"],
                fp["w3"], fp["b3"], fp["m_left"], fp["m_right"])
    bytes_accessed = sum(int(a.size) * a.dtype.itemsize for a in operands)
    bytes_accessed += N * HW * C4 * 4                            # f32 output

    grid_spec = pltpu.PrefetchScalarGridSpec(
        num_scalar_prefetch=0,
        grid=(N,),
        in_specs=[
            pl.BlockSpec((HW, Cin), lambda n: (n, 0)),           # x (also residual)
            pl.BlockSpec((Cin, planes), lambda n: (0, 0)),       # w1 (scale folded)
            pl.BlockSpec((1, planes), lambda n: (0, 0)),         # b1
            pl.BlockSpec((9, planes, planes), lambda n: (0, 0, 0)),  # w2 taps
            pl.BlockSpec((1, planes), lambda n: (0, 0)),         # b2
            pl.BlockSpec((planes, C4), lambda n: (0, 0)),        # w3
            pl.BlockSpec((1, C4), lambda n: (0, 0)),             # b3
            pl.BlockSpec((HW, 1), lambda n: (0, 0)),             # column mask (left)
            pl.BlockSpec((HW, 1), lambda n: (0, 0)),             # column mask (right)
        ],
        out_specs=pl.BlockSpec((HW, C4), lambda n: (n, 0)),
        scratch_shapes=[pltpu.VMEM((HW + 2 * W + 2, planes), jnp.float32)],
    )

    return pl.pallas_call(
        _make_bottleneck_kernel(H, W, planes),
        out_shape=jax.ShapeDtypeStruct((N * HW, C4), jnp.float32),
        grid_spec=grid_spec,
        compiler_params=pltpu.CompilerParams(
            dimension_semantics=("parallel",),
            vmem_limit_bytes=64 * 1024 * 1024),
        cost_estimate=pl.CostEstimate(
            flops=flops, transcendentals=0, bytes_accessed=bytes_accessed),
    )(*operands)


# ----------------------------------------------------------------------------
# Host-side parameter prep: BN folding (scale into weights), layout, bf16 cast.
# ----------------------------------------------------------------------------
def fold_bn(gamma, beta, mean, var, eps=1e-5):
    scale = gamma / jnp.sqrt(var + eps)
    bias = beta - mean * scale
    return scale, bias


def prepare_fused_params(params, eps=1e-5):
    planes = params["w1"].shape[0]
    s1, b1 = fold_bn(params["bn1"]["gamma"], params["bn1"]["beta"],
                     params["bn1"]["mean"], params["bn1"]["var"], eps)
    s2, b2 = fold_bn(params["bn2"]["gamma"], params["bn2"]["beta"],
                     params["bn2"]["mean"], params["bn2"]["var"], eps)
    s3, b3 = fold_bn(params["bn3"]["gamma"], params["bn3"]["beta"],
                     params["bn3"]["mean"], params["bn3"]["var"], eps)

    w1 = params["w1"][:, :, 0, 0]                                # (planes, Cin)
    w1f = (w1 * s1[:, None]).T.astype(jnp.bfloat16)              # (Cin, planes)

    w2 = params["w2"] * s2[:, None, None, None]                  # (Cout, Cin, 3, 3)
    w2f = jnp.transpose(w2, (2, 3, 1, 0)).reshape(9, planes, planes)
    w2f = w2f.astype(jnp.bfloat16)                               # (9, Cin, Cout)

    w3 = params["w3"][:, :, 0, 0]                                # (4p, planes)
    w3f = (w3 * s3[:, None]).T.astype(jnp.bfloat16)              # (planes, 4p)

    return dict(
        w1=w1f, b1=b1.reshape(1, -1).astype(jnp.float32),
        w2=w2f, b2=b2.reshape(1, -1).astype(jnp.float32),
        w3=w3f, b3=b3.reshape(1, -1).astype(jnp.float32),
    )


def init_params(key, inplanes, planes):
    ks = jax.random.split(key, 16)

    def bn_params(k0, k1, k2, k3, c):
        return dict(
            gamma=jax.random.uniform(k0, (c,), jnp.float32, 0.5, 1.5),
            beta=jax.random.normal(k1, (c,), jnp.float32) * 0.1,
            mean=jax.random.normal(k2, (c,), jnp.float32) * 0.1,
            var=jax.random.uniform(k3, (c,), jnp.float32, 0.5, 1.5),
        )

    return dict(
        # PyTorch conv weight layout (Cout, Cin, kh, kw)
        w1=jax.random.normal(ks[0], (planes, inplanes, 1, 1), jnp.float32) * 0.1,
        w2=jax.random.normal(ks[1], (planes, planes, 3, 3), jnp.float32) * 0.1,
        w3=jax.random.normal(ks[2], (planes * 4, planes, 1, 1), jnp.float32) * 0.1,
        bn1=bn_params(ks[3], ks[4], ks[5], ks[6], planes),
        bn2=bn_params(ks[7], ks[8], ks[9], ks[10], planes),
        bn3=bn_params(ks[11], ks[12], ks[13], ks[14], planes * 4),
    )


# ----------------------------------------------------------------------------
# Bottleneck forward (NCHW wrapper around the fused NHWC kernel)
# ----------------------------------------------------------------------------
def bottleneck_forward(x_nchw, params, stride=1):
    N, Cin, H, W = x_nchw.shape
    planes = params["w1"].shape[0]
    C4 = planes * 4
    assert Cin == C4 and stride == 1, \
        "identity residual requires inplanes==4*planes, stride==1"
    assert (H * W) % 8 == 0 or N == 1, "row block must be sublane friendly"

    fp = prepare_fused_params(params)
    # Column-validity masks for the +/-1 horizontal taps (static, VMEM-resident).
    wcol = jnp.arange(H * W, dtype=jnp.int32) % W
    fp["m_left"] = (wcol >= 1).astype(jnp.bfloat16).reshape(H * W, 1)
    fp["m_right"] = (wcol <= W - 2).astype(jnp.bfloat16).reshape(H * W, 1)

    # TODO(synk): NCHW<->NHWC transposes exist only to match the PyTorch
    #             interface; a full NHWC network would call the fused kernel
    #             directly on the flattened slab.
    x2d = jnp.transpose(x_nchw, (0, 2, 3, 1)).reshape(N * H * W, Cin)
    out2d = _fused_bottleneck_call(x2d.astype(jnp.bfloat16), fp, N, H, W)
    return jnp.transpose(out2d.reshape(N, H, W, C4), (0, 3, 1, 2))


# ----------------------------------------------------------------------------
# Pure-JAX reference (lax.conv) for validation
# ----------------------------------------------------------------------------
def bottleneck_reference(x_nchw, params, stride=1):
    def conv(x, w, s, pad):
        return jax.lax.conv_general_dilated(
            x, w, window_strides=(s, s), padding=pad,
            dimension_numbers=("NCHW", "OIHW", "NCHW"))

    def bn(x, p):
        scale = p["gamma"] / jnp.sqrt(p["var"] + 1e-5)
        bias = p["beta"] - p["mean"] * scale
        return x * scale[None, :, None, None] + bias[None, :, None, None]

    out = jax.nn.relu(bn(conv(x_nchw, params["w1"], 1, "VALID"), params["bn1"]))
    out = jax.nn.relu(bn(conv(out, params["w2"], stride, [(1, 1), (1, 1)]), params["bn2"]))
    out = bn(conv(out, params["w3"], 1, "VALID"), params["bn3"])
    return jax.nn.relu(out + x_nchw)


if __name__ == "__main__":
    N, planes, H, W = 2, 4, 16, 16
    inplanes = planes * 4          # identity residual path (downsample=None)
    stride = 1

    key = jax.random.PRNGKey(0)
    kx, kp = jax.random.split(key)
    x = jax.random.normal(kx, (N, inplanes, H, W), jnp.float32)
    params = init_params(kp, inplanes, planes)

    out = jax.block_until_ready(bottleneck_forward(x, params, stride=stride))
    ref = jax.block_until_ready(bottleneck_reference(x, params, stride=stride))

    assert out.shape == ref.shape == (N, planes * 4, H, W)
    err = float(jnp.max(jnp.abs(out - ref)))
    tol = 5e-2 * max(1.0, float(jnp.max(jnp.abs(ref))))   # loosened for bf16 MXU inputs
    assert err < tol, f"mismatch vs reference: {err} (tol {tol})"

    print("KERNEL_OK")
</pallas_src>

<mosaic_0001>
module attributes {stable_mosaic.version = 11 : i64} {
  func.func @kernel(%arg0: i32, %arg1: memref<256x16xbf16, #tpu.memory_space<vmem>>, %arg2: memref<16x4xbf16, #tpu.memory_space<vmem>>, %arg3: memref<1x4xf32, #tpu.memory_space<vmem>>, %arg4: memref<9x4x4xbf16, #tpu.memory_space<vmem>>, %arg5: memref<1x4xf32, #tpu.memory_space<vmem>>, %arg6: memref<4x16xbf16, #tpu.memory_space<vmem>>, %arg7: memref<1x16xf32, #tpu.memory_space<vmem>>, %arg8: memref<256x1xbf16, #tpu.memory_space<vmem>>, %arg9: memref<256x1xbf16, #tpu.memory_space<vmem>>, %arg10: memref<256x16xf32, #tpu.memory_space<vmem>>, %arg11: memref<290x4xf32, #tpu.memory_space<vmem>>) attributes {dimension_semantics = [#tpu.dimension_semantics<parallel>], iteration_bounds = array<i64: 2>, scalar_prefetch = 0 : i64, scratch_operands = 1 : i64, tpu.core_type = #tpu.core_type<tc>, window_params = [{transform_indices = @transform_0, window_bounds = array<i64: 256, 16>}, {pipeline_mode = #tpu.pipeline_mode<synchronous>, transform_indices = @transform_1, window_bounds = array<i64: 16, 4>}, {pipeline_mode = #tpu.pipeline_mode<synchronous>, transform_indices = @transform_2, window_bounds = array<i64: 1, 4>}, {pipeline_mode = #tpu.pipeline_mode<synchronous>, transform_indices = @transform_3, window_bounds = array<i64: 9, 4, 4>}, {pipeline_mode = #tpu.pipeline_mode<synchronous>, transform_indices = @transform_4, window_bounds = array<i64: 1, 4>}, {pipeline_mode = #tpu.pipeline_mode<synchronous>, transform_indices = @transform_5, window_bounds = array<i64: 4, 16>}, {pipeline_mode = #tpu.pipeline_mode<synchronous>, transform_indices = @transform_6, window_bounds = array<i64: 1, 16>}, {pipeline_mode = #tpu.pipeline_mode<synchronous>, transform_indices = @transform_7, window_bounds = array<i64: 256, 1>}, {pipeline_mode = #tpu.pipeline_mode<synchronous>, transform_indices = @transform_8, window_bounds = array<i64: 256, 1>}, {transform_indices = @transform_9, window_bounds = array<i64: 256, 16>}]} {
    %c0 = arith.constant 0 : index
    %c0_0 = arith.constant 0 : index
    %0 = vector.load %arg1[%c0, %c0_0] : memref<256x16xbf16, #tpu.memory_space<vmem>>, vector<256x16xbf16>
    %c0_1 = arith.constant 0 : index
    %c0_2 = arith.constant 0 : index
    %1 = vector.load %arg2[%c0_1, %c0_2] : memref<16x4xbf16, #tpu.memory_space<vmem>>, vector<16x4xbf16>
    %cst = arith.constant dense<0.000000e+00> : vector<256x4xf32>
    %2 = tpu.matmul %0, %1, %cst {dimension_numbers = #tpu.dot_dimension_numbers<[1], [0], [0], [1], [0, 0, 1, 1], [], []>} : vector<256x16xbf16>, vector<16x4xbf16>, vector<256x4xf32> -> vector<256x4xf32>
    %c0_3 = arith.constant 0 : index
    %c0_4 = arith.constant 0 : index
    %3 = vector.load %arg3[%c0_3, %c0_4] : memref<1x4xf32, #tpu.memory_space<vmem>>, vector<1x4xf32>
    %4 = vector.broadcast %3 : vector<1x4xf32> to vector<256x4xf32>
    %5 = arith.addf %2, %4 : vector<256x4xf32>
    %cst_5 = arith.constant 0.000000e+00 : f32
    %6 = vector.broadcast %cst_5 : f32 to vector<256x4xf32>
    %7 = arith.maximumf %5, %6 : vector<256x4xf32>
    %cst_6 = arith.constant 0.000000e+00 : f32
    %8 = vector.broadcast %cst_6 : f32 to vector<290x4xf32>
    %c0_7 = arith.constant 0 : index
    %c0_8 = arith.constant 0 : index
    %9 = vector.load %arg11[%c0_7, %c0_8] : memref<290x4xf32, #tpu.memory_space<vmem>>, vector<290x4xf32>
    tpu.vector_store %arg11[%c0_7, %c0_8], %8 {strides = array<i32>} : memref<290x4xf32, #tpu.memory_space<vmem>>, vector<290x4xf32>,
    %c17 = arith.constant 17 : index
    %c0_9 = arith.constant 0 : index
    %10 = vector.load %arg11[%c17, %c0_9] : memref<290x4xf32, #tpu.memory_space<vmem>>, vector<256x4xf32>
    tpu.vector_store %arg11[%c17, %c0_9], %7 {strides = array<i32>} : memref<290x4xf32, #tpu.memory_space<vmem>>, vector<256x4xf32>,
    %c0_10 = arith.constant 0 : index
    %c0_11 = arith.constant 0 : index
    %11 = vector.load %arg8[%c0_10, %c0_11] : memref<256x1xbf16, #tpu.memory_space<vmem>>, vector<256x1xbf16>
    %c0_12 = arith.constant 0 : index
    %c0_13 = arith.constant 0 : index
    %12 = vector.load %arg9[%c0_12, %c0_13] : memref<256x1xbf16, #tpu.memory_space<vmem>>, vector<256x1xbf16>
    %cst_14 = arith.constant 0.000000e+00 : f32
    %13 = vector.broadcast %cst_14 : f32 to vector<256x4xf32>
    %c0_15 = arith.constant 0 : index
    %c0_16 = arith.constant 0 : index
    %14 = vector.load %arg11[%c0_15, %c0_16] : memref<290x4xf32, #tpu.memory_space<vmem>>, vector<256x4xf32>
    %15 = arith.truncf %14 : vector<256x4xf32> to vector<256x4xbf16>
    %16 = vector.broadcast %11 : vector<256x1xbf16> to vector<256x4xbf16>
    %17 = arith.mulf %15, %16 : vector<256x4xbf16>
    %c0_17 = arith.constant 0 : index
    %c0_18 = arith.constant 0 : index
    %c0_19 = arith.constant 0 : index
    %18 = vector.load %arg4[%c0_17, %c0_18, %c0_19] : memref<9x4x4xbf16, #tpu.memory_space<vmem>>, vector<1x4x4xbf16>
    %19 = vector.shape_cast %18 : vector<1x4x4xbf16> to vector<4x4xbf16>
    %cst_20 = arith.constant dense<0.000000e+00> : vector<256x4xf32>
    %20 = tpu.matmul %17, %19, %cst_20 {dimension_numbers = #tpu.dot_dimension_numbers<[1], [0], [0], [1], [0, 0, 1, 1], [], []>} : vector<256x4xbf16>, vector<4x4xbf16>, vector<256x4xf32> -> vector<256x4xf32>
    %21 = arith.addf %13, %20 : vector<256x4xf32>
    %c1 = arith.constant 1 : index
    %c0_21 = arith.constant 0 : index
    %22 = vector.load %arg11[%c1, %c0_21] : memref<290x4xf32, #tpu.memory_space<vmem>>, vector<256x4xf32>
    %23 = arith.truncf %22 : vector<256x4xf32> to vector<256x4xbf16>
    %c1_22 = arith.constant 1 : index
    %c0_23 = arith.constant 0 : index
    %c0_24 = arith.constant 0 : index
    %24 = vector.load %arg4[%c1_22, %c0_23, %c0_24] : memref<9x4x4xbf16, #tpu.memory_space<vmem>>, vector<1x4x4xbf16>
    %25 = vector.shape_cast %24 : vector<1x4x4xbf16> to vector<4x4xbf16>
    %cst_25 = arith.constant dense<0.000000e+00> : vector<256x4xf32>
    %26 = tpu.matmul %23, %25, %cst_25 {dimension_numbers = #tpu.dot_dimension_numbers<[1], [0], [0], [1], [0, 0, 1, 1], [], []>} : vector<256x4xbf16>, vector<4x4xbf16>, vector<256x4xf32> -> vector<256x4xf32>
    %27 = arith.addf %21, %26 : vector<256x4xf32>
    %c2 = arith.constant 2 : index
    %c0_26 = arith.constant 0 : index
    %28 = vector.load %arg11[%c2, %c0_26] : memref<290x4xf32, #tpu.memory_space<vmem>>, vector<256x4xf32>
    %29 = arith.truncf %28 : vector<256x4xf32> to vector<256x4xbf16>
    %30 = vector.broadcast %12 : vector<256x1xbf16> to vector<256x4xbf16>
    %31 = arith.mulf %29, %30 : vector<256x4xbf16>
    %c2_27 = arith.constant 2 : index
    %c0_28 = arith.constant 0 : index
    %c0_29 = arith.constant 0 : index
    %32 = vector.load %arg4[%c2_27, %c0_28, %c0_29] : memref<9x4x4xbf16, #tpu.memory_space<vmem>>, vector<1x4x4xbf16>
    %33 = vector.shape_cast %32 : vector<1x4x4xbf16> to vector<4x4xbf16>
    %cst_30 = arith.constant dense<0.000000e+00> : vector<256x4xf32>
    %34 = tpu.matmul %31, %33, %cst_30 {dimension_numbers = #tpu.dot_dimension_numbers<[1], [0], [0], [1], [0, 0, 1, 1], [], []>} : vector<256x4xbf16>, vector<4x4xbf16>, vector<256x4xf32> -> vector<256x4xf32>
    %35 = arith.addf %27, %34 : vector<256x4xf32>
    %c16 = arith.constant 16 : index
    %c0_31 = arith.constant 0 : index
    %36 = vector.load %arg11[%c16, %c0_31] : memref<290x4xf32, #tpu.memory_space<vmem>>, vector<256x4xf32>
    %37 = arith.truncf %36 : vector<256x4xf32> to vector<256x4xbf16>
    %38 = vector.broadcast %11 : vector<256x1xbf16> to vector<256x4xbf16>
    %39 = arith.mulf %37, %38 : vector<256x4xbf16>
    %c3 = arith.constant 3 : index
    %c0_32 = arith.constant 0 : index
    %c0_33 = arith.constant 0 : index
    %40 = vector.load %arg4[%c3, %c0_32, %c0_33] : memref<9x4x4xbf16, #tpu.memory_space<vmem>>, vector<1x4x4xbf16>
    %41 = vector.shape_cast %40 : vector<1x4x4xbf16> to vector<4x4xbf16>
    %cst_34 = arith.constant dense<0.000000e+00> : vector<256x4xf32>
    %42 = tpu.matmul %39, %41, %cst_34 {dimension_numbers = #tpu.dot_dimension_numbers<[1], [0], [0], [1], [0, 0, 1, 1], [], []>} : vector<256x4xbf16>, vector<4x4xbf16>, vector<256x4xf32> -> vector<256x4xf32>
    %43 = arith.addf %35, %42 : vector<256x4xf32>
    %c17_35 = arith.constant 17 : index
    %c0_36 = arith.constant 0 : index
    %44 = vector.load %arg11[%c17_35, %c0_36] : memref<290x4xf32, #tpu.memory_space<vmem>>, vector<256x4xf32>
    %45 = arith.truncf %44 : vector<256x4xf32> to vector<256x4xbf16>
    %c4 = arith.constant 4 : index
    %c0_37 = arith.constant 0 : index
    %c0_38 = arith.constant 0 : index
    %46 = vector.load %arg4[%c4, %c0_37, %c0_38] : memref<9x4x4xbf16, #tpu.memory_space<vmem>>, vector<1x4x4xbf16>
    %47 = vector.shape_cast %46 : vector<1x4x4xbf16> to vector<4x4xbf16>
    %cst_39 = arith.constant dense<0.000000e+00> : vector<256x4xf32>
    %48 = tpu.matmul %45, %47, %cst_39 {dimension_numbers = #tpu.dot_dimension_numbers<[1], [0], [0], [1], [0, 0, 1, 1], [], []>} : vector<256x4xbf16>, vector<4x4xbf16>, vector<256x4xf32> -> vector<256x4xf32>
    %49 = arith.addf %43, %48 : vector<256x4xf32>
    %c18 = arith.constant 18 : index
    %c0_40 = arith.constant 0 : index
    %50 = vector.load %arg11[%c18, %c0_40] : memref<290x4xf32, #tpu.memory_space<vmem>>, vector<256x4xf32>
    %51 = arith.truncf %50 : vector<256x4xf32> to vector<256x4xbf16>
    %52 = vector.broadcast %12 : vector<256x1xbf16> to vector<256x4xbf16>
    %53 = arith.mulf %51, %52 : vector<256x4xbf16>
    %c5 = arith.constant 5 : index
    %c0_41 = arith.constant 0 : index
    %c0_42 = arith.constant 0 : index
    %54 = vector.load %arg4[%c5, %c0_41, %c0_42] : memref<9x4x4xbf16, #tpu.memory_space<vmem>>, vector<1x4x4xbf16>
    %55 = vector.shape_cast %54 : vector<1x4x4xbf16> to vector<4x4xbf16>
    %cst_43 = arith.constant dense<0.000000e+00> : vector<256x4xf32>
    %56 = tpu.matmul %53, %55, %cst_43 {dimension_numbers = #tpu.dot_dimension_numbers<[1], [0], [0], [1], [0, 0, 1, 1], [], []>} : vector<256x4xbf16>, vector<4x4xbf16>, vector<256x4xf32> -> vector<256x4xf32>
    %57 = arith.addf %49, %56 : vector<256x4xf32>
    %c32 = arith.constant 32 : index
    %c0_44 = arith.constant 0 : index
    %58 = vector.load %arg11[%c32, %c0_44] : memref<290x4xf32, #tpu.memory_space<vmem>>, vector<256x4xf32>
    %59 = arith.truncf %58 : vector<256x4xf32> to vector<256x4xbf16>
    %60 = vector.broadcast %11 : vector<256x1xbf16> to vector<256x4xbf16>
    %61 = arith.mulf %59, %60 : vector<256x4xbf16>
    %c6 = arith.constant 6 : index
    %c0_45 = arith.constant 0 : index
    %c0_46 = arith.constant 0 : index
    %62 = vector.load %arg4[%c6, %c0_45, %c0_46] : memref<9x4x4xbf16, #tpu.memory_space<vmem>>, vector<1x4x4xbf16>
    %63 = vector.shape_cast %62 : vector<1x4x4xbf16> to vector<4x4xbf16>
    %cst_47 = arith.constant dense<0.000000e+00> : vector<256x4xf32>
    %64 = tpu.matmul %61, %63, %cst_47 {dimension_numbers = #tpu.dot_dimension_numbers<[1], [0], [0], [1], [0, 0, 1, 1], [], []>} : vector<256x4xbf16>, vector<4x4xbf16>, vector<256x4xf32> -> vector<256x4xf32>
    %65 = arith.addf %57, %64 : vector<256x4xf32>
    %c33 = arith.constant 33 : index
    %c0_48 = arith.constant 0 : index
    %66 = vector.load %arg11[%c33, %c0_48] : memref<290x4xf32, #tpu.memory_space<vmem>>, vector<256x4xf32>
    %67 = arith.truncf %66 : vector<256x4xf32> to vector<256x4xbf16>
    %c7 = arith.constant 7 : index
    %c0_49 = arith.constant 0 : index
    %c0_50 = arith.constant 0 : index
    %68 = vector.load %arg4[%c7, %c0_49, %c0_50] : memref<9x4x4xbf16, #tpu.memory_space<vmem>>, vector<1x4x4xbf16>
    %69 = vector.shape_cast %68 : vector<1x4x4xbf16> to vector<4x4xbf16>
    %cst_51 = arith.constant dense<0.000000e+00> : vector<256x4xf32>
    %70 = tpu.matmul %67, %69, %cst_51 {dimension_numbers = #tpu.dot_dimension_numbers<[1], [0], [0], [1], [0, 0, 1, 1], [], []>} : vector<256x4xbf16>, vector<4x4xbf16>, vector<256x4xf32> -> vector<256x4xf32>
    %71 = arith.addf %65, %70 : vector<256x4xf32>
    %c34 = arith.constant 34 : index
    %c0_52 = arith.constant 0 : index
    %72 = vector.load %arg11[%c34, %c0_52] : memref<290x4xf32, #tpu.memory_space<vmem>>, vector<256x4xf32>
    %73 = arith.truncf %72 : vector<256x4xf32> to vector<256x4xbf16>
    %74 = vector.broadcast %12 : vector<256x1xbf16> to vector<256x4xbf16>
    %75 = arith.mulf %73, %74 : vector<256x4xbf16>
    %c8 = arith.constant 8 : index
    %c0_53 = arith.constant 0 : index
    %c0_54 = arith.constant 0 : index
    %76 = vector.load %arg4[%c8, %c0_53, %c0_54] : memref<9x4x4xbf16, #tpu.memory_space<vmem>>, vector<1x4x4xbf16>
    %77 = vector.shape_cast %76 : vector<1x4x4xbf16> to vector<4x4xbf16>
    %cst_55 = arith.constant dense<0.000000e+00> : vector<256x4xf32>
    %78 = tpu.matmul %75, %77, %cst_55 {dimension_numbers = #tpu.dot_dimension_numbers<[1], [0], [0], [1], [0, 0, 1, 1], [], []>} : vector<256x4xbf16>, vector<4x4xbf16>, vector<256x4xf32> -> vector<256x4xf32>
    %79 = arith.addf %71, %78 : vector<256x4xf32>
    %c0_56 = arith.constant 0 : index
    %c0_57 = arith.constant 0 : index
    %80 = vector.load %arg5[%c0_56, %c0_57] : memref<1x4xf32, #tpu.memory_space<vmem>>, vector<1x4xf32>
    %81 = vector.broadcast %80 : vector<1x4xf32> to vector<256x4xf32>
    %82 = arith.addf %79, %81 : vector<256x4xf32>
    %cst_58 = arith.constant 0.000000e+00 : f32
    %83 = vector.broadcast %cst_58 : f32 to vector<256x4xf32>
    %84 = arith.maximumf %82, %83 : vector<256x4xf32>
    %85 = arith.truncf %84 : vector<256x4xf32> to vector<256x4xbf16>
    %c0_59 = arith.constant 0 : index
    %c0_60 = arith.constant 0 : index
    %86 = vector.load %arg6[%c0_59, %c0_60] : memref<4x16xbf16, #tpu.memory_space<vmem>>, vector<4x16xbf16>
    %cst_61 = arith.constant dense<0.000000e+00> : vector<256x16xf32>
    %87 = tpu.matmul %85, %86, %cst_61 {dimension_numbers = #tpu.dot_dimension_numbers<[1], [0], [0], [1], [0, 0, 1, 1], [], []>} : vector<256x4xbf16>, vector<4x16xbf16>, vector<256x16xf32> -> vector<256x16xf32>
    %c0_62 = arith.constant 0 : index
    %c0_63 = arith.constant 0 : index
    %88 = vector.load %arg7[%c0_62, %c0_63] : memref<1x16xf32, #tpu.memory_space<vmem>>, vector<1x16xf32>
    %89 = vector.broadcast %88 : vector<1x16xf32> to vector<256x16xf32>
    %90 = arith.addf %87, %89 : vector<256x16xf32>
    %91 = arith.extf %0 : vector<256x16xbf16> to vector<256x16xf32>
    %92 = arith.addf %90, %91 : vector<256x16xf32>
    %cst_64 = arith.constant 0.000000e+00 : f32
    %93 = vector.broadcast %cst_64 : f32 to vector<256x16xf32>
    %94 = arith.maximumf %92, %93 : vector<256x16xf32>
    %c0_65 = arith.constant 0 : index
    %c0_66 = arith.constant 0 : index
    %95 = vector.load %arg10[%c0_65, %c0_66] : memref<256x16xf32, #tpu.memory_space<vmem>>, vector<256x16xf32>
    tpu.vector_store %arg10[%c0_65, %c0_66], %94 {strides = array<i32>} : memref<256x16xf32, #tpu.memory_space<vmem>>, vector<256x16xf32>,
    return
  }
  func.func @transform_0(%arg0: i32) -> (i32, i32) {
    %c0_i32 = arith.constant 0 : i32
    %c0_i32_0 = arith.constant 0 : i32
    return %arg0, %c0_i32 : i32, i32
  }
  func.func @transform_1(%arg0: i32) -> (i32, i32) {
    %c0_i32 = arith.constant 0 : i32
    %c0_i32_0 = arith.constant 0 : i32
    %c0_i32_1 = arith.constant 0 : i32
    return %c0_i32, %c0_i32_0 : i32, i32
  }
  func.func @transform_2(%arg0: i32) -> (i32, i32) {
    %c0_i32 = arith.constant 0 : i32
    %c0_i32_0 = arith.constant 0 : i32
    %c0_i32_1 = arith.constant 0 : i32
    return %c0_i32, %c0_i32_0 : i32, i32
  }
  func.func @transform_3(%arg0: i32) -> (i32, i32, i32) {
    %c0_i32 = arith.constant 0 : i32
    %c0_i32_0 = arith.constant 0 : i32
    %c0_i32_1 = arith.constant 0 : i32
    %c0_i32_2 = arith.constant 0 : i32
    return %c0_i32, %c0_i32_0, %c0_i32_1 : i32, i32, i32
  }
  func.func @transform_4(%arg0: i32) -> (i32, i32) {
    %c0_i32 = arith.constant 0 : i32
    %c0_i32_0 = arith.constant 0 : i32
    %c0_i32_1 = arith.constant 0 : i32
    return %c0_i32, %c0_i32_0 : i32, i32
  }
  func.func @transform_5(%arg0: i32) -> (i32, i32) {
    %c0_i32 = arith.constant 0 : i32
    %c0_i32_0 = arith.constant 0 : i32
    %c0_i32_1 = arith.constant 0 : i32
    return %c0_i32, %c0_i32_0 : i32, i32
  }
  func.func @transform_6(%arg0: i32) -> (i32, i32) {
    %c0_i32 = arith.constant 0 : i32
    %c0_i32_0 = arith.constant 0 : i32
    %c0_i32_1 = arith.constant 0 : i32
    return %c0_i32, %c0_i32_0 : i32, i32
  }
  func.func @transform_7(%arg0: i32) -> (i32, i32) {
    %c0_i32 = arith.constant 0 : i32
    %c0_i32_0 = arith.constant 0 : i32
    %c0_i32_1 = arith.constant 0 : i32
    return %c0_i32, %c0_i32_0 : i32, i32
  }
  func.func @transform_8(%arg0: i32) -> (i32, i32) {
    %c0_i32 = arith.constant 0 : i32
    %c0_i32_0 = arith.constant 0 : i32
    %c0_i32_1 = arith.constant 0 : i32
    return %c0_i32, %c0_i32_0 : i32, i32
  }
  func.func @transform_9(%arg0: i32) -> (i32, i32) {
    %c0_i32 = arith.constant 0 : i32
    %c0_i32_0 = arith.constant 0 : i32
    return %arg0, %c0_i32 : i32, i32
  }
}

</mosaic_0001>

<bundles_post_ra>
// kernel: tpu_custom_call.1
= control target key start
LH: loop header
LB: loop body
LE: loop exit
PB: predicated region body
PF: predicated region fallthrough
CT: control target
= control target key end

     0   :  { %s4691_s30 = smov 0   ;;  %s7217_s0 = inlined_call_operand.vmem [shape: bf16[512,16], index: 0, kind: input, shape index: {}]   ;;  %s7218_s1 = inlined_call_operand.vmem [shape: bf16[16,4], index: 1, kind: input, shape index: {}]   ;;  %s7219_s2 = inlined_call_operand.vmem [shape: f32[1,4], index: 2, kind: input, shape index: {}]   ;;  %s7220_s3 = inlined_call_operand.vmem [shape: bf16[9,4,4], index: 3, kind: input, shape index: {}]   ;;  %s7221_s4 = inlined_call_operand.vmem [shape: f32[1,4], index: 4, kind: input, shape index: {}]   ;;  %s7222_s5 = inlined_call_operand.vmem [shape: bf16[4,16], index: 5, kind: input, shape index: {}]   ;;  %s7223_s6 = inlined_call_operand.vmem [shape: f32[1,16], index: 6, kind: input, shape index: {}]   ;;  %s7224_s7 = inlined_call_operand.vmem [shape: bf16[256,1], index: 7, kind: input, shape index: {}]   ;;  %s7225_s8 = inlined_call_operand.vmem [shape: bf16[256,1], index: 8, kind: input, shape index: {}]   ;;  %s7226_s9 = inlined_call_operand.vmem [shape: f32[512,16], index: 9, kind: output, shape index: {}]  }
   0x1 LB: > { %s4329_s10 = sadd.s32 4294967295, %s4636_s30   ;;  %p4333_p0 = scmp.ge.s32.totalorder %s4636_s30, 1  ;;  %s4636_s30 = sphi %s4691_s30, %s19_s30  }
   0x2   : > { %p288_p1 = scmp.lt.s32.totalorder %s4636_s30, 3 }
   0x4   : > { %p289_p2 = pnand %p4333_p0, %p288_p1 }
   0x6   : > { %292 = sbr.rel (%p289_p2) target bundleno = 1268 (0x4f4), region = 56 }
   0xb   : > { %v728_v0 = vld [vmem:[%s7224_s7 + $0x68] sm:$0xf]  ;;  %v726_v1 = vld [vmem:[%s7224_s7 + $0x60] sm:$0xf]  ;;  %v4638_v3 = vmov 0   ;;  %s4334_s17 = sshll.u32 %s4329_s10, 5 }
   0xc   : > { %v4608_v2 = vld [vmem:[%s7218_s1] sm:$0xff]  ;;  %4624 = vset.pattern.permute.xlu1 %v4638_v3  ;;  %4623 = vset.pattern.permute.xlu0 %v4638_v3  ;;  %p325_p3 = scmp.lt.s32.totalorder %s4334_s17, 63  ;;  %v729_v5 = vld [vmem:[%s7224_s7 + $0x6c] sm:$0xf]  ;;  %vm461_vm0 = vcmask 130048   ;;  %vm631_vm1 = vcmask 31744  }
   0xd   : > { %1066 = vperm.xlu1 %4624, %v728_v0   ;;  %1048 = vperm.xlu0 %4623, %v726_v1   ;;  %v702_v4 = vld [vmem:[%s7224_s7] sm:$0xf]  ;;  %v727_v6 = vld [vmem:[%s7224_s7 + $0x64] sm:$0xf]  ;;  %v731_v9 = vld [vmem:[%s7224_s7 + $0x74] sm:$0xf] }
   0xe   : > { %517 = vmatpush.bf16.msra.mxu0 %v4608_v2  ;;  %4625 = vset.pattern.permute.xlu2 %v4638_v3  ;;  %s7818_s17 = smov (!%p325_p3, %s4334_s17), 63  ;;  %v703_v8 = vld [vmem:[%s7224_s7 + $0x4] sm:$0xf]  ;;  %v730_v10 = vld [vmem:[%s7224_s7 + $0x70] sm:$0xf]  ;;  %v7227_v42 = vmov 0.0  }
   0xf   : > { %832 = vperm.xlu2 %4625, %v702_v4   ;;  %4609 = vmatpush.bf16.msra.mxu3 %v4608_v2  ;;  %s4335_s20 = sshll.u32 %s7818_s17, 2  ;;  %v704_v11 = vld [vmem:[%s7224_s7 + $0x8] sm:$0xf]  ;;  %v732_v12 = vld [vmem:[%s7224_s7 + $0x78] sm:$0xf]  ;;  %632 = vst.msk [vmem:[#allocation2] sm:$0xff] %vm631_vm1, %v7227_v42 }
  0x10   : > { %s4723_s27 = scalar_lea.vmem %s7217_s0, %s4335_s20  ;;  %v705_v13 = vld [vmem:[%s7224_s7 + $0xc] sm:$0xf]  ;;  %v733_v15 = vld [vmem:[%s7224_s7 + $0x7c] sm:$0xf]  ;;  %v707_v16 = vld [vmem:[%s7224_s7 + $0x14] sm:$0xf] }
  0x11   : > { %v4592_v7 = vld [vmem:[%s4723_s27] sm:$0xff]  ;;  %v4593_v14 = vld [vmem:[%s4723_s27 + $0x8] sm:$0xff]  ;;  %v706_v17 = vld [vmem:[%s7224_s7 + $0x10] sm:$0xf]  ;;  %633 = vst.msk [vmem:[#allocation2 + $0x8] sm:$0xff] %vm631_vm1, %v7227_v42  ;;  %vm1329_vm2 = vcmask 1041408  }
  0x12   : > { %4406 = vmatmul.msk.bf16.vlgmr.msra.gmra.mxu0 %vm461_vm0, %v4592_v7  ;;  %v734_v18 = vld [vmem:[%s7225_s8] sm:$0xf]  ;;  %v708_v19 = vld [vmem:[%s7224_s7 + $0x18] sm:$0xf]  ;;  %v735_v20 = vld [vmem:[%s7225_s8 + $0x4] sm:$0xf] }
  0x13   : > { %v4594_v21 = vld [vmem:[%s4723_s27 + $0x10] sm:$0xff]  ;;  %v709_v22 = vld [vmem:[%s7224_s7 + $0x1c] sm:$0xf]  ;;  %v737_v23 = vld [vmem:[%s7225_s8 + $0xc] sm:$0xf]  ;;  %634 = vst.msk [vmem:[#allocation2 + $0x10] sm:$0xff] %vm631_vm1, %v7227_v42 }
  0x14   : > { %v736_v24 = vld [vmem:[%s7225_s8 + $0x8] sm:$0xf]  ;;  %v710_v25 = vld [vmem:[%s7224_s7 + $0x20] sm:$0xf]  ;;  %v738_v26 = vld [vmem:[%s7225_s8 + $0x10] sm:$0xf] }
  0x15   : > { %1075 = vperm.xlu1 %4624, %v729_v5   ;;  %1057 = vperm.xlu0 %4623, %v727_v6   ;;  %v4595_v27 = vld [vmem:[%s4723_s27 + $0x18] sm:$0xff]  ;;  %v711_v28 = vld [vmem:[%s7224_s7 + $0x24] sm:$0xf]  ;;  %v739_v29 = vld [vmem:[%s7225_s8 + $0x14] sm:$0xf]  ;;  %635 = vst.msk [vmem:[#allocation2 + $0x18] sm:$0xff] %vm631_vm1, %v7227_v42 }
  0x16   : > { %v712_v30 = vld [vmem:[%s7224_s7 + $0x28] sm:$0xf]  ;;  %v713_v31 = vld [vmem:[%s7224_s7 + $0x2c] sm:$0xf]  ;;  %v740_v32 = vld [vmem:[%s7225_s8 + $0x18] sm:$0xf] }
  0x17   : > { %841 = vperm.xlu2 %4625, %v703_v8   ;;  %v4596_v33 = vld [vmem:[%s4723_s27 + $0x20] sm:$0xff]  ;;  %v741_v34 = vld [vmem:[%s7225_s8 + $0x1c] sm:$0xf]  ;;  %v714_v35 = vld [vmem:[%s7224_s7 + $0x30] sm:$0xf]  ;;  %636 = vst.msk [vmem:[#allocation2 + $0x20] sm:$0xff] %vm631_vm1, %v7227_v42 }
  0x18   : > { %v742_v36 = vld [vmem:[%s7225_s8 + $0x20] sm:$0xf]  ;;  %v743_v37 = vld [vmem:[%s7225_s8 + $0x24] sm:$0xf]  ;;  %v4597_v38 = vld [vmem:[%s4723_s27 + $0x28] sm:$0xff]  ;;  %637 = vst.msk [vmem:[#allocation2 + $0x28] sm:$0xff] %vm631_vm1, %v7227_v42 }
  0x19   : > { %v744_v39 = vld [vmem:[%s7225_s8 + $0x28] sm:$0xf]  ;;  %v717_v40 = vld [vmem:[%s7224_s7 + $0x3c] sm:$0xf]  ;;  %v715_v41 = vld [vmem:[%s7224_s7 + $0x34] sm:$0xf] }
  0x1a   : > { %v4640_v43 = vmov 839922192   ;;  %v718_v46 = vld [vmem:[%s7224_s7 + $0x40] sm:$0xf]  ;;  %v719_v47 = vld [vmem:[%s7224_s7 + $0x44] sm:$0xf] }
  0x1b   : > { %v836_v44 = vunpack.c.l.s4 %v4640_v43  ;;  %v716_v48 = vld [vmem:[%s7224_s7 + $0x38] sm:$0xf]  ;;  %638 = vst.msk [vmem:[#allocation2 + $0x30] sm:$0xff] %vm631_vm1, %v7227_v42  ;;  %v766_v50 = vld [vmem:[#allocation2] sm:$0xff]  ;;  %v767_v51 = vld [vmem:[#allocation2 + $0x8] sm:$0xff]  ;;  %vm668_vm3 = vcmask 25600  }
  0x1c   : > { %639 = vst.msk [vmem:[#allocation2 + $0x38] sm:$0xff] %vm631_vm1, %v7227_v42  ;;  %v4598_v54 = vld [vmem:[%s4723_s27 + $0x30] sm:$0xff]  ;;  %v798_v55 = vpack.c.bf16 %v766_v50, %v766_v50  ;;  %v799_v57 = vpack.c.bf16 %v767_v51, %v767_v51  ;;  %v720_v59 = vld [vmem:[%s7224_s7 + $0x48] sm:$0xf]  ;;  %v745_v61 = vld [vmem:[%s7225_s8 + $0x2c] sm:$0xf] }
  0x1d   : > { %1093 = vperm.xlu1 %4624, %v731_v9   ;;  %1084 = vperm.xlu0 %4623, %v730_v10   ;;  %v4845_v49 = vunpack.c.0.s8 %v836_v44  ;;  %640 = vst.msk [vmem:[#allocation2 + $0x40] sm:$0xff] %vm631_vm1, %v7227_v42  ;;  %v747_v56 = vld [vmem:[%s7225_s8 + $0x34] sm:$0xf]  ;;  %v4422_v62 = vld [vmem:[%s7220_s3 + $0x2] sm:$0x3]  ;;  %v1232_v4 = vld [vmem:[#allocation2 + $0x9] sm:$0xff] }
  0x1e   : > { %641 = vst.msk [vmem:[#allocation2 + $0x48] sm:$0xff] %vm631_vm1, %v7227_v42  ;;  %v1118_v63 = vunpack.c.l.bf16 %v798_v55  ;;  %v1119_v0 = vunpack.c.l.bf16 %v799_v57  ;;  %v1331_v2 = vsel %vm1329_vm2, %v4422_v62, 0  ;;  %v1231_v3 = vld [vmem:[#allocation2 + $0x1] sm:$0xff]  ;;  %v748_v8 = vld [vmem:[%s7225_s8 + $0x38] sm:$0xf]  ;;  %s4337_s10 = sshll.u32 %s7818_s17, 3 }
  0x1f   : > { %850 = vperm.xlu2 %4625, %v704_v11   ;;  %642 = vst.msk [vmem:[#allocation2 + $0x50] sm:$0xff] %vm631_vm1, %v7227_v42  ;;  %1340 = vmatpush.bf16.msra.mxu1 %v1331_v2  ;;  %v1263_v5 = vpack.c.bf16 %v1232_v4, %v1231_v3  ;;  %v1230_v9 = vld [vmem:[%s7220_s3] sm:$0x3]  ;;  %v749_v11 = vld [vmem:[%s7225_s8 + $0x3c] sm:$0xf]  ;;  %s7036_s13 = scalar_lea.vmem %s7226_s9, %s4337_s10 }
  0x20   : > { %643 = vst.msk [vmem:[#allocation2 + $0x58] sm:$0xff] %vm631_vm1, %v7227_v42  ;;  %4610 = vmatpush.bf16.msrb.mxu3 %v1331_v2  ;;  %v1471_v10 = vsel %vm1329_vm2, %v1230_v9, 0 }
  0x21   : > { %644 = vst.msk [vmem:[#allocation2 + $0x60] sm:$0xff] %vm631_vm1, %v7227_v42  ;;  %1480 = vmatpush.bf16.msra.mxu2 %v1471_v10 }
  0x22   : > { %4407 = vmatmul.msk.bf16.gmra.mxu0 %vm461_vm0, %v4593_v14  ;;  %645 = vst.msk [vmem:[#allocation2 + $0x68] sm:$0xff] %vm631_vm1, %v7227_v42  ;;  %4423 = vmatmul.msk.bf16.vlgmr.msra.gmra.mxu1 %vm631_vm1, %v1263_v5 }
  0x23   : > { %646 = vst.msk [vmem:[#allocation2 + $0x70] sm:$0xff] %vm631_vm1, %v7227_v42 }
  0x24   : > { %647 = vst.msk [vmem:[#allocation2 + $0x78] sm:$0xff] %vm631_vm1, %v7227_v42 }
  0x25   : > { %1102 = vperm.xlu1 %4624, %v732_v12   ;;  %859 = vperm.xlu0 %4623, %v705_v13   ;;  %648 = vst.msk [vmem:[#allocation2 + $0x80] sm:$0xff] %vm631_vm1, %v7227_v42  ;;  %v746_v12 = vld [vmem:[%s7225_s8 + $0x30] sm:$0xf] }
  0x26   : > { %649 = vst.msk [vmem:[#allocation2 + $0x88] sm:$0xff] %vm631_vm1, %v7227_v42 }
  0x27   : > { %1111 = vperm.xlu2 %4625, %v733_v15   ;;  %650 = vst.msk [vmem:[#allocation2 + $0x90] sm:$0xff] %vm631_vm1, %v7227_v42 }
  0x28   : > { %651 = vst.msk [vmem:[#allocation2 + $0x98] sm:$0xff] %vm631_vm1, %v7227_v42 }
  0x29   : > { %652 = vst.msk [vmem:[#allocation2 + $0xa0] sm:$0xff] %vm631_vm1, %v7227_v42 }
  0x2a   : > { %653 = vst.msk [vmem:[#allocation2 + $0xa8] sm:$0xff] %vm631_vm1, %v7227_v42 }
  0x2b   : > { %654 = vst.msk [vmem:[#allocation2 + $0xb0] sm:$0xff] %vm631_vm1, %v7227_v42 }
  0x2c   : > { %655 = vst.msk [vmem:[#allocation2 + $0xb8] sm:$0xff] %vm631_vm1, %v7227_v42 }
  0x2d   : > { %877 = vperm.xlu1 %4624, %v707_v16   ;;  %868 = vperm.xlu0 %4623, %v706_v17   ;;  %656 = vst.msk [vmem:[#allocation2 + $0xc0] sm:$0xff] %vm631_vm1, %v7227_v42  ;;  %v4599_v16 = vld [vmem:[%s4723_s27 + $0x38] sm:$0xff]  ;;  %v750_v17 = vld [vmem:[%s7225_s8 + $0x40] sm:$0xf] }
  0x2e   : > { %657 = vst.msk [vmem:[#allocation2 + $0xc8] sm:$0xff] %vm631_vm1, %v7227_v42 }
  0x2f   : > { %1628 = vperm.xlu2 %4625, %v734_v18   ;;  %658 = vst.msk [vmem:[#allocation2 + $0xd0] sm:$0xff] %vm631_vm1, %v7227_v42 }
  0x30   : > { %659 = vst.msk [vmem:[#allocation2 + $0xd8] sm:$0xff] %vm631_vm1, %v7227_v42 }
  0x31   : > { %660 = vst.msk [vmem:[#allocation2 + $0xe0] sm:$0xff] %vm631_vm1, %v7227_v42 }
  0x32   : > { %4408 = vmatmul.msk.bf16.gmra.mxu0 %vm461_vm0, %v4594_v21  ;;  %661 = vst.msk [vmem:[#allocation2 + $0xe8] sm:$0xff] %vm631_vm1, %v7227_v42  ;;  %v723_v21 = vld [vmem:[%s7224_s7 + $0x54] sm:$0xf] }
  0x33   : > { %662 = vst.msk [vmem:[#allocation2 + $0xf0] sm:$0xff] %vm631_vm1, %v7227_v42 }
  0x34   : > { %663 = vst.msk [vmem:[#allocation2 + $0xf8] sm:$0xff] %vm631_vm1, %v7227_v42 }
  0x35   : > { %886 = vperm.xlu1 %4624, %v708_v19   ;;  %1637 = vperm.xlu0 %4623, %v735_v20   ;;  %664 = vst.msk [vmem:[#allocation2 + $0x100] sm:$0xff] %vm631_vm1, %v7227_v42 }
  0x36   : > { %665 = vst.msk [vmem:[#allocation2 + $0x108] sm:$0xff] %vm631_vm1, %v7227_v42 }
  0x37   : > { %895 = vperm.xlu2 %4625, %v709_v22   ;;  %666 = vst.msk [vmem:[#allocation2 + $0x110] sm:$0xff] %vm631_vm1, %v7227_v42 }
  0x38   : > { %667 = vst.msk [vmem:[#allocation2 + $0x118] sm:$0xff] %vm631_vm1, %v7227_v42 }
  0x3d   : > { %1655 = vperm.xlu1 %4624, %v737_v23   ;;  %1646 = vperm.xlu0 %4623, %v736_v24   ;;  %v4970_v24 = vld [vmem:[%s7219_s2] ss:$0 sm:$0xff] }
  0x3f   : > { %904 = vperm.xlu2 %4625, %v710_v25  }
  0x42   : > { %4409 = vmatmul.msk.bf16.gmra.mxu0 %vm461_vm0, %v4595_v27 }
  0x45   : > { %1664 = vperm.xlu1 %4624, %v738_v26   ;;  %913 = vperm.xlu0 %4623, %v711_v28   ;;  %v4600_v26 = vld [vmem:[%s4723_s27 + $0x40] sm:$0xff] }
  0x47   : > { %1673 = vperm.xlu2 %4625, %v739_v29   ;;  %v724_v29 = vld [vmem:[%s7224_s7 + $0x58] sm:$0xf] }
  0x4d   : > { %922 = vperm.xlu0 %4623, %v712_v30   ;;  %931 = vperm.xlu1 %4624, %v713_v31   ;;  %v721_v30 = vld [vmem:[%s7224_s7 + $0x4c] sm:$0xf] }
  0x4f   : > { %1682 = vperm.xlu2 %4625, %v740_v32  }
  0x52   : > { %4410 = vmatmul.msk.bf16.gmra.mxu0 %vm461_vm0, %v4596_v33 }
  0x55   : > { %1691 = vperm.xlu0 %4623, %v741_v34   ;;  %940 = vperm.xlu1 %4624, %v714_v35   ;;  %v4604_v34 = vld [vmem:[%s4723_s27 + $0x60] sm:$0xff] }
  0x56   : > { %4418 = vmatmul.msk.bf16.vlgmr.msra.gmra.mxu3 %vm461_vm0, %v4604_v34  ;;  %v752_v34 = vld [vmem:[%s7225_s8 + $0x48] sm:$0xf] }
  0x57   : > { %949 = vperm.xlu2 %4625, %v715_v41   ;;  %4611 = vmatpush.bf16.msra.mxu3 %v1471_v10  ;;  %v4605_v10 = vld [vmem:[%s4723_s27 + $0x68] sm:$0xff] }
  0x5d   : > { %1700 = vperm.xlu0 %4623, %v742_v36   ;;  %1709 = vperm.xlu1 %4624, %v743_v37  }
  0x5f   : > { %958 = vperm.xlu2 %4625, %v716_v48  }
  0x62   : > { %4411 = vmatmul.msk.bf16.gmra.mxu0 %vm461_vm0, %v4597_v38  ;;  %v725_v38 = vld [vmem:[%s7224_s7 + $0x5c] sm:$0xf] }
  0x65   : > { %1718 = vperm.xlu1 %4624, %v744_v39   ;;  %967 = vperm.xlu0 %4623, %v717_v40   ;;  %v753_v39 = vld [vmem:[%s7225_s8 + $0x4c] sm:$0xf]  ;;  %v722_v40 = vld [vmem:[%s7224_s7 + $0x50] sm:$0xf] }
  0x66   : > { %4419 = vmatmul.msk.bf16.gmra.mxu3 %vm461_vm0, %v4605_v10 }
  0x67   : > { %1727 = vperm.xlu2 %4625, %v745_v61  }
  0x69   : > { %v833_v45 = vpop.permute.xlu2 %832 }
  0x6a   : > { %v838_v52 = vperm.slane %v833_v45, %v4845_v49  ;;  %v1562_v45 = vld [vmem:[#allocation2 + $0x2] sm:$0xff] }
  0x6b   : > { %v1594_v48 = vpack.c.bf16 %v1562_v45, %v1562_v45 }
  0x6c   : > { %v4872_v60 = vunpack.c.l.bf16 %v838_v52 }
  0x6d   : > { %976 = vperm.xlu0 %4623, %v718_v46   ;;  %985 = vperm.xlu1 %4624, %v719_v47   ;;  %v4601_v47 = vld [vmem:[%s4723_s27 + $0x48] sm:$0xff]  ;;  %v1914_v62 = vunpack.c.l.bf16 %v1594_v48 }
  0x6e   : > { %7344 = vst [vmem:[#allocation3_spill] sm:$0xff] %v4872_v60  ;;  %v1182_v6 = vmul.f32 %v4872_v60, %v1118_v63 }
  0x6f   : > { %1736 = vperm.xlu2 %4625, %v746_v12  }
  0x71   : > { %v842_v53 = vpop.permute.xlu2 %841 }
  0x72   : > { %v847_v58 = vperm.slane %v842_v53, %v4845_v49  ;;  %4412 = vmatmul.msk.bf16.gmra.mxu0 %vm461_vm0, %v4598_v54 }
  0x74   : > { %v4885_v1 = vunpack.c.l.bf16 %v847_v58  ;;  %v754_v58 = vld [vmem:[%s7225_s8 + $0x50] sm:$0xf] }
  0x75   : > { %1745 = vperm.xlu0 %4623, %v747_v56   ;;  %994 = vperm.xlu1 %4624, %v720_v59   ;;  %v751_v59 = vld [vmem:[%s7225_s8 + $0x44] sm:$0xf] }
  0x76   : > { %7345 = vst [vmem:[#allocation4_spill] sm:$0xff] %v4885_v1  ;;  %v1183_v7 = vmul.f32 %v4885_v1, %v1119_v0 }
  0x77   : > { %1003 = vperm.xlu2 %4625, %v721_v30  }
  0x78   : > { %v1214_v13 = vpack.c.bf16 %v1183_v7, %v1182_v6 }
  0x79   : > { %v4946_v18 = vpop.permute.xlu2 %850 }
  0x7a   : > { %4439 = vmatmul.msk.bf16.vlgmr.msra.gmra.mxu2 %vm631_vm1, %v1214_v13  ;;  %v856_v56 = vperm.slane %v4946_v18, %v4845_v49 }
  0x7c   : > { %v5027_v12 = vunpack.c.l.bf16 %v856_v56  ;;  %v4472_v56 = vld [vmem:[%s7220_s3 + $0x6] sm:$0x3] }
  0x7d   : > { %1754 = vperm.xlu0 %4623, %v748_v8   ;;  %1763 = vperm.xlu1 %4624, %v749_v11  }
  0x7f   : > { %v4920_v14 = vpop.permute.xlu1 %1066  ;;  %v4922_v15 = vpop.permute.xlu0 %1048  ;;  %1012 = vperm.xlu2 %4625, %v722_v40  }
  0x80   : > { %7346 = vst [vmem:[#allocation5_spill] sm:$0xff] %v4920_v14 }
  0x81   : > { %v4972_v25 = vpop.permute.xlu2 %1111 }
  0x82   : > { %4413 = vmatmul.msk.bf16.gmra.mxu0 %vm461_vm0, %v4599_v16  ;;  %7350 = vst [vmem:[#allocation9_spill] sm:$0xff] %v4972_v25 }
  0x85   : > { %1772 = vperm.xlu1 %4624, %v750_v17   ;;  %1021 = vperm.xlu0 %4623, %v723_v21  }
  0x87   : > { %v4950_v19 = vpop.permute.xlu1 %1075  ;;  %v4952_v20 = vpop.permute.xlu0 %1057  ;;  %1781 = vperm.xlu2 %4625, %v751_v59   ;;  %v2395_v59 = vsel %vm1329_vm2, %v4472_v56, 0 }
  0x88   : > { %7347 = vst [vmem:[#allocation6_spill] sm:$0xff] %v4950_v19  ;;  %2404 = vmatpush.bf16.msrb.mxu0 %v2395_v59 }
  0x89   : > { %v1629_v35 = vpop.permute.xlu2 %1628 }
  0x8a   : > { %v1634_v53 = vperm.slane %v1629_v35, %v4845_v49 }
  0x8c   : > { %v5021_v6 = vunpack.c.l.bf16 %v1634_v53  ;;  %v4602_v53 = vld [vmem:[%s4723_s27 + $0x50] sm:$0xff] }
  0x8d   : > { %1030 = vperm.xlu0 %4623, %v724_v29   ;;  %1039 = vperm.xlu1 %4624, %v725_v38  }
  0x8e   : > { %v5032_v17 = vmul.f32 %v5021_v6, %v1914_v62 }
  0x8f   : > { %v4963_v22 = vpop.permute.xlu1 %1093  ;;  %v4965_v23 = vpop.permute.xlu0 %1084  ;;  %1790 = vperm.xlu2 %4625, %v752_v34   ;;  %v4606_v34 = vld [vmem:[%s4723_s27 + $0x70] sm:$0xff] }
  0x90   : > { %7348 = vst [vmem:[#allocation7_spill] sm:$0xff] %v4963_v22  ;;  %v519_v27 = vpop.f32.mrf.mxu0  ;;  %4420 = vmatmul.msk.bf16.gmra.mxu3 %vm461_vm0, %v4606_v34  ;;  %v4603_v34 = vld [vmem:[%s4723_s27 + $0x58] sm:$0xff] }
  0x91   : > { %7349 = vst [vmem:[#allocation8_spill] sm:$0xff] %v4965_v23  ;;  %v520_v28 = vadd.f32 %v4970_v24, %v519_v27  ;;  %v5006_v54 = vpop.permute.xlu2 %895 }
  0x92   : > { %4414 = vmatmul.msk.bf16.gmra.mxu0 %vm461_vm0, %v4600_v26  ;;  %7352 = vst [vmem:[#allocation11_spill] sm:$0xff] %v5032_v17 }
  0x93   : > { %v599_v31 = vmax.f32 %v520_v28, 0.0 }
  0x95   : > { %670 = vst.msk [vmem:[#allocation2 + $0x11] sm:$0xff] %vm631_vm1, %v599_v31  ;;  %1799 = vperm.xlu0 %4623, %v753_v39   ;;  %1808 = vperm.xlu1 %4624, %v754_v58  }
  0x97   : > { %v4983_v32 = vpop.permute.xlu1 %1102  ;;  %v860_v33 = vpop.permute.xlu0 %859 }
  0x98   : > { %7351 = vst [vmem:[#allocation10_spill] sm:$0xff] %v4983_v32  ;;  %v521_v36 = vpop.f32.mrf.mxu0  ;;  %v865_v57 = vperm.slane %v860_v33, %v4845_v49 }
  0x99   : > { %v522_v37 = vadd.f32 %v4970_v24, %v521_v36 }
  0x9a   : > { %v5029_v13 = vunpack.c.l.bf16 %v865_v57 }
  0x9b   : > { %v600_v41 = vmax.f32 %v522_v37, 0.0  ;;  %v5053_v37 = vpop.permute.xlu2 %904 }
  0x9c   : > { %v768_v46 = vld [vmem:[#allocation2 + $0x10] sm:$0xff] }
  0x9d   : > { %671 = vst.msk [vmem:[#allocation2 + $0x19] sm:$0xff] %vm631_vm1, %v600_v41  ;;  %v1563_v51 = vld [vmem:[#allocation2 + $0xa] sm:$0xff]  ;;  %v800_v55 = vpack.c.bf16 %v768_v46, %v768_v46 }
  0x9e   : > { %v1595_v63 = vpack.c.bf16 %v1563_v51, %v1563_v51  ;;  %v1233_v3 = vld [vmem:[#allocation2 + $0x11] sm:$0xff] }
  0x9f   : > { %v4998_v43 = vpop.permute.xlu1 %877  ;;  %v5000_v44 = vpop.permute.xlu0 %868  ;;  %v5025_v11 = vunpack.c.l.bf16 %v800_v55 }
  0xa0   : > { %v524_v50 = vpop.f32.mrf.mxu0  ;;  %v1915_v18 = vunpack.c.l.bf16 %v1595_v63 }
  0xa1   : > { %v525_v52 = vadd.f32 %v4970_v24, %v524_v50  ;;  %v1184_v31 = vmul.f32 %v5027_v12, %v5025_v11 }
  0xa2   : > { %4415 = vmatmul.msk.bf16.gmra.mxu0 %vm461_vm0, %v4601_v47 }
  0xa3   : > { %v601_v61 = vmax.f32 %v525_v52, 0.0 }
  0xa4   : > { %v1234_v4 = vld [vmem:[#allocation2 + $0x19] sm:$0xff] }
  0xa5   : > { %v769_v5 = vld [vmem:[#allocation2 + $0x18] sm:$0xff]  ;;  %672 = vst.msk [vmem:[#allocation2 + $0x21] sm:$0xff] %vm631_vm1, %v601_v61  ;;  %v1264_v9 = vpack.c.bf16 %v1234_v4, %v1233_v3  ;;  %v883_v3 = vperm.slane %v4998_v43, %v4845_v49  ;;  %v874_v4 = vperm.slane %v5000_v44, %v4845_v49 }
  0xa6   : > { %v2740_v7 = vld [vmem:[#allocation2 + $0x12] sm:$0xff]  ;;  %v801_v16 = vpack.c.bf16 %v769_v5, %v769_v5 }
  0xa7   : > { %v5018_v0 = vpop.permute.xlu1 %886  ;;  %v1638_v2 = vpop.permute.xlu0 %1637  ;;  %4424 = vmatmul.msk.bf16.gmra.mxu1 %vm631_vm1, %v1264_v9  ;;  %v2772_v26 = vpack.c.bf16 %v2740_v7, %v2740_v7  ;;  %v756_v7 = vld [vmem:[%s7225_s8 + $0x58] sm:$0xf] }
  0xa8   : > { %v1643_v8 = vperm.slane %v1638_v2, %v4845_v49  ;;  %v526_v27 = vpop.f32.mrf.mxu0  ;;  %v5038_v28 = vunpack.c.l.bf16 %v801_v16  ;;  %1826 = vperm.xlu0 %4623, %v756_v7  }
  0xa9   : > { %v527_v30 = vadd.f32 %v4970_v24, %v526_v27  ;;  %v2804_v38 = vunpack.c.l.bf16 %v2772_v26 }
  0xaa   : > { %v5034_v21 = vunpack.c.l.bf16 %v1643_v8  ;;  %v1185_v33 = vmul.f32 %v5029_v13, %v5038_v28 }
  0xab   : > { %v602_v36 = vmax.f32 %v527_v30, 0.0  ;;  %v5068_v57 = vmul.f32 %v2804_v38, %v5021_v6 }
  0xac   : > { %v5041_v29 = vmul.f32 %v5034_v21, %v1915_v18  ;;  %v2741_v39 = vld [vmem:[#allocation2 + $0x1a] sm:$0xff]  ;;  %v1215_v45 = vpack.c.bf16 %v1185_v33, %v1184_v31 }
  0xad   : > { %v2773_v46 = vpack.c.bf16 %v2741_v39, %v2741_v39  ;;  %673 = vst.msk [vmem:[#allocation2 + $0x29] sm:$0xff] %vm631_vm1, %v602_v36  ;;  %v770_v55 = vld [vmem:[#allocation2 + $0x20] sm:$0xff]  ;;  %v5098_v36 = vunpack.c.l.bf16 %v883_v3  ;;  %v1674_v39 = vpop.permute.xlu2 %1673 }
  0xae   : > { %7353 = vst [vmem:[#allocation12_spill] sm:$0xff] %v5041_v29  ;;  %4440 = vmatmul.msk.bf16.gmra.mxu2 %vm631_vm1, %v1215_v45  ;;  %v802_v5 = vpack.c.bf16 %v770_v55, %v770_v55  ;;  %v1235_v10 = vld [vmem:[#allocation2 + $0x21] sm:$0xff]  ;;  %v1679_v56 = vperm.slane %v1674_v39, %v4845_v49 }
  0xaf   : > { %v1656_v40 = vpop.permute.xlu1 %1655  ;;  %v1647_v41 = vpop.permute.xlu0 %1646  ;;  %v2805_v50 = vunpack.c.l.bf16 %v2773_v46 }
  0xb0   : > { %v1661_v47 = vperm.slane %v1656_v40, %v4845_v49  ;;  %v1652_v48 = vperm.slane %v1647_v41, %v4845_v49  ;;  %v529_v58 = vpop.f32.mrf.mxu0  ;;  %v5102_v41 = vunpack.c.l.bf16 %v802_v5 }
  0xb1   : > { %v5072_v61 = vmul.f32 %v2805_v50, %v5034_v21  ;;  %v530_v2 = vadd.f32 %v4970_v24, %v529_v58 }
  0xb2   : > { %v5059_v51 = vunpack.c.l.bf16 %v1661_v47  ;;  %v5061_v52 = vunpack.c.l.bf16 %v1652_v48  ;;  %4416 = vmatmul.msk.bf16.gmra.mxu0 %vm461_vm0, %v4602_v53 }
  0xb3   : > { %v603_v9 = vmax.f32 %v530_v2, 0.0  ;;  %v757_v2 = vld [vmem:[%s7225_s8 + $0x5c] sm:$0xf] }
  0xb4   : > { %v5075_v62 = vmul.f32 %v2805_v50, %v5059_v51  ;;  %v5078_v63 = vmul.f32 %v2804_v38, %v5061_v52  ;;  %v2742_v16 = vld [vmem:[#allocation2 + $0x22] sm:$0xff]  ;;  %v5100_v38 = vunpack.c.l.bf16 %v874_v4  ;;  %1835 = vperm.xlu1 %4624, %v757_v2  }
  0xb5   : > { %v1236_v44 = vld [vmem:[#allocation2 + $0x29] sm:$0xff]  ;;  %v2774_v30 = vpack.c.bf16 %v2742_v16, %v2742_v16  ;;  %674 = vst.msk [vmem:[#allocation2 + $0x31] sm:$0xff] %vm631_vm1, %v603_v9  ;;  %v5125_v16 = vunpack.c.l.bf16 %v1679_v56 }
  0xb6   : > { %7354 = vst [vmem:[#allocation13_spill] sm:$0xff] %v5075_v62  ;;  %v771_v27 = vld [vmem:[#allocation2 + $0x28] sm:$0xff]  ;;  %v1265_v33 = vpack.c.bf16 %v1236_v44, %v1235_v10  ;;  %v1186_v58 = vmul.f32 %v5100_v38, %v5102_v41 }
  0xb7   : > { %7355 = vst [vmem:[#allocation14_spill] sm:$0xff] %v5078_v63  ;;  %v1665_v18 = vpop.permute.xlu1 %1664  ;;  %v5093_v26 = vpop.permute.xlu0 %913  ;;  %v803_v40 = vpack.c.bf16 %v771_v27, %v771_v27  ;;  %v2806_v45 = vunpack.c.l.bf16 %v2774_v30  ;;  %v3598_v47 = vld [vmem:[#allocation2 + $0x22] sm:$0xff] }
  0xb8   : > { %v1670_v31 = vperm.slane %v1665_v18, %v4845_v49  ;;  %4425 = vmatmul.msk.bf16.gmra.mxu1 %vm631_vm1, %v1265_v33  ;;  %v531_v48 = vpop.f32.mrf.mxu0  ;;  %v3630_v3 = vpack.c.bf16 %v3598_v47, %v3598_v47 }
  0xb9   : > { %v5108_v50 = vunpack.c.l.bf16 %v803_v40  ;;  %v532_v55 = vadd.f32 %v4970_v24, %v531_v48  ;;  %v901_v48 = vperm.slane %v5006_v54, %v4845_v49  ;;  %v5140_v2 = vmul.f32 %v2806_v45, %v5061_v52 }
  0xba   : > { %v5104_v46 = vunpack.c.l.bf16 %v1670_v31  ;;  %v3662_v30 = vunpack.c.l.bf16 %v3630_v3  ;;  %v892_v31 = vperm.slane %v5018_v0, %v4845_v49  ;;  %v759_v0 = vld [vmem:[%s7225_s8 + $0x64] sm:$0xf]  ;;  %v755_v3 = vld [vmem:[%s7225_s8 + $0x54] sm:$0xf] }
  0xbb   : > { %v1187_v59 = vmul.f32 %v5098_v36, %v5108_v50  ;;  %v604_v4 = vmax.f32 %v532_v55, 0.0  ;;  %1853 = vperm.xlu0 %4623, %v759_v0   ;;  %1817 = vperm.xlu2 %4625, %v755_v3  }
  0xbc   : > { %v5111_v53 = vmul.f32 %v2806_v45, %v5104_v46  ;;  %v1567_v5 = vld [vmem:[#allocation2 + $0x2a] sm:$0xff] }
  0xbd   : > { %v1216_v7 = vpack.c.bf16 %v1187_v59, %v1186_v58  ;;  %675 = vst.msk [vmem:[#allocation2 + $0x39] sm:$0xff] %vm631_vm1, %v604_v4  ;;  %v1599_v10 = vpack.c.bf16 %v1567_v5, %v1567_v5  ;;  %v772_v18 = vld [vmem:[#allocation2 + $0x30] sm:$0xff]  ;;  %v5152_v4 = vmul.f32 %v3662_v30, %v5021_v6 }
  0xbe   : > { %7356 = vst [vmem:[#allocation15_spill] sm:$0xff] %v5111_v53  ;;  %v2743_v44 = vld [vmem:[#allocation2 + $0x2a] sm:$0xff]  ;;  %v804_v40 = vpack.c.bf16 %v772_v18, %v772_v18  ;;  %v1683_v18 = vpop.permute.xlu2 %1682 }
  0xbf   : > { %v5122_v9 = vpop.permute.xlu0 %922  ;;  %4441 = vmatmul.msk.bf16.gmra.mxu2 %vm631_vm1, %v1216_v7  ;;  %v2775_v27 = vpack.c.bf16 %v2743_v44, %v2743_v44  ;;  %v1919_v33 = vunpack.c.l.bf16 %v1599_v10  ;;  %v5137_v58 = vpop.permute.xlu1 %931  ;;  %v3060_v59 = vld [vmem:[#allocation2 + $0x30] sm:$0xff]  ;;  %7358 = vst [vmem:[#allocation17_spill] sm:$0xff] %v5152_v4  ;;  %v5157_v7 = vunpack.c.l.bf16 %v892_v31  ;;  %v5168_v31 = vunpack.c.l.bf16 %v901_v48 }
  0xc0   : > { %v534_v39 = vpop.f32.mrf.mxu0  ;;  %v1237_v44 = vld [vmem:[#allocation2 + $0x31] sm:$0xff]  ;;  %v3092_v30 = vpack.c.bf16 %v3060_v59, %v3060_v59  ;;  %v1688_v3 = vperm.slane %v1683_v18, %v4845_v49 }
  0xc1   : > { %v2807_v47 = vunpack.c.l.bf16 %v2775_v27  ;;  %v5134_v55 = vmul.f32 %v5125_v16, %v1919_v33  ;;  %v535_v56 = vadd.f32 %v4970_v24, %v534_v39  ;;  %v5162_v39 = vunpack.c.l.bf16 %v804_v40 }
  0xc2   : > { %4417 = vmatmul.msk.bf16.gmra.mxu0 %vm461_vm0, %v4603_v34  ;;  %v5199_v4 = vunpack.c.l.bf16 %v1688_v3 }
  0xc3   : > { %7357 = vst [vmem:[#allocation16_spill] sm:$0xff] %v5134_v55  ;;  %v5149_v54 = vmul.f32 %v2807_v47, %v5059_v51  ;;  %v5155_v5 = vmul.f32 %v2807_v47, %v5034_v21  ;;  %v605_v45 = vmax.f32 %v535_v56, 0.0  ;;  %v4607_v56 = vld [vmem:[%s4723_s27 + $0x78] sm:$0xff] }
  0xc4   : > { %v1238_v27 = vld [vmem:[#allocation2 + $0x39] sm:$0xff]  ;;  %4421 = vmatmul.msk.bf16.gmra.mxu3 %vm461_vm0, %v4607_v56 }
  0xc5   : > { %7359 = vst [vmem:[#allocation18_spill] sm:$0xff] %v5155_v5  ;;  %v773_v33 = vld [vmem:[#allocation2 + $0x38] sm:$0xff]  ;;  %v1266_v34 = vpack.c.bf16 %v1238_v27, %v1237_v44 }
  0xc6   : > { %676 = vst.msk [vmem:[#allocation2 + $0x41] sm:$0xff] %vm631_vm1, %v605_v45  ;;  %v805_v47 = vpack.c.bf16 %v773_v33, %v773_v33  ;;  %v2744_v0 = vld [vmem:[#allocation2 + $0x32] sm:$0xff]  ;;  %v1188_v45 = vmul.f32 %v5157_v7, %v5162_v39  ;;  %v3124_v33 = vunpack.c.l.bf16 %v3092_v30 }
  0xc7   : > { %v1568_v10 = vld [vmem:[#allocation2 + $0x32] sm:$0xff]  ;;  %v1692_v43 = vpop.permute.xlu0 %1691  ;;  %v2776_v40 = vpack.c.bf16 %v2744_v0, %v2744_v0 }
  0xc8   : > { %4426 = vmatmul.msk.bf16.gmra.mxu1 %vm631_vm1, %v1266_v34  ;;  %v5174_v35 = vunpack.c.l.bf16 %v805_v47  ;;  %v3061_v59 = vld [vmem:[#allocation2 + $0x38] sm:$0xff]  ;;  %v536_v48 = vpop.f32.mrf.mxu0  ;;  %v1600_v21 = vpack.c.bf16 %v1568_v10, %v1568_v10  ;;  %v1697_v0 = vperm.slane %v1692_v43, %v4845_v49  ;;  %v760_v34 = vld [vmem:[%s7225_s8 + $0x68] sm:$0xf]  ;;  %v2297_v43 = vmul.f32 %v4885_v1, %v5038_v28 }
  0xc9   : > { %v2808_v44 = vunpack.c.l.bf16 %v2776_v40  ;;  %v3093_v27 = vpack.c.bf16 %v3061_v59, %v3061_v59  ;;  %v537_v6 = vadd.f32 %v4970_v24, %v536_v48  ;;  %v5189_v59 = vpop.permute.xlu1 %940  ;;  %1862 = vperm.xlu1 %4624, %v760_v34   ;;  %v5194_v30 = vmul.f32 %v3124_v33, %v5027_v12 }
  0xca   : > { %v1189_v18 = vmul.f32 %v5168_v31, %v5174_v35  ;;  %v1920_v42 = vunpack.c.l.bf16 %v1600_v21  ;;  %v2296_v28 = vmul.f32 %v4872_v60, %v5025_v11  ;;  %v910_v21 = vperm.slane %v5053_v37, %v4845_v49 }
  0xcb   : > { %v5187_v47 = vmul.f32 %v2808_v44, %v5061_v52  ;;  %v3125_v56 = vunpack.c.l.bf16 %v3093_v27  ;;  %v606_v8 = vmax.f32 %v537_v6, 0.0  ;;  %7361 = vst [vmem:[#allocation20_spill] sm:$0xff] %v5194_v30  ;;  %v5202_v6 = vunpack.c.l.bf16 %v1697_v0 }
  0xcc   : > { %v1217_v40 = vpack.c.bf16 %v1189_v18, %v1188_v45  ;;  %v2328_v0 = vpack.c.bf16 %v2297_v43, %v2296_v28  ;;  %v5223_v37 = vmul.f32 %v2808_v44, %v5104_v46 }
  0xcd   : > { %7360 = vst [vmem:[#allocation19_spill] sm:$0xff] %v5187_v47  ;;  %v1569_v10 = vld [vmem:[#allocation2 + $0x3a] sm:$0xff]  ;;  %v5197_v48 = vmul.f32 %v3125_v56, %v5029_v13  ;;  %v5213_v56 = vpop.permute.xlu2 %949 }
  0xce   : > { %677 = vst.msk [vmem:[#allocation2 + $0x49] sm:$0xff] %vm631_vm1, %v606_v8  ;;  %v1601_v52 = vpack.c.bf16 %v1569_v10, %v1569_v10  ;;  %v2745_v45 = vld [vmem:[#allocation2 + $0x3a] sm:$0xff]  ;;  %v919_v8 = vperm.slane %v5093_v26, %v4845_v49  ;;  %v5216_v10 = vmul.f32 %v5199_v4, %v1920_v42 }
  0xcf   : > { %7362 = vst [vmem:[#allocation21_spill] sm:$0xff] %v5197_v48  ;;  %4442 = vmatmul.msk.bf16.gmra.mxu2 %vm631_vm1, %v1217_v40  ;;  %v774_v27 = vld [vmem:[#allocation2 + $0x40] sm:$0xff]  ;;  %v2777_v33 = vpack.c.bf16 %v2745_v45, %v2745_v45 }
  0xd0   : > { %v1921_v34 = vunpack.c.l.bf16 %v1601_v52  ;;  %v539_v3 = vpop.f32.mrf.mxu0  ;;  %7363 = vst [vmem:[#allocation22_spill] sm:$0xff] %v5216_v10  ;;  %v806_v52 = vpack.c.bf16 %v774_v27, %v774_v27  ;;  %v3062_v18 = vld [vmem:[#allocation2 + $0x40] sm:$0xff] }
  0xd1   : > { %v2809_v40 = vunpack.c.l.bf16 %v2777_v33  ;;  %v540_v45 = vadd.f32 %v4970_v24, %v539_v3  ;;  %7365 = vst [vmem:[#allocation24_spill] sm:$0xff] %v5223_v37  ;;  %v5234_v33 = vunpack.c.l.bf16 %v910_v21  ;;  %v1239_v27 = vld [vmem:[#allocation2 + $0x41] sm:$0xff] }
  0xd2   : > { %v5219_v11 = vmul.f32 %v5202_v6, %v1921_v34  ;;  %4473 = vmatmul.msk.bf16.vlgmr.msrb.gmra.mxu0 %vm631_vm1, %v2328_v0  ;;  %v1701_v34 = vpop.permute.xlu0 %1700  ;;  %v5243_v21 = vunpack.c.l.bf16 %v806_v52 }
  0xd3   : > { %v5226_v26 = vmul.f32 %v2809_v40, %v5125_v16  ;;  %v5229_v43 = vmul.f32 %v2809_v40, %v5059_v51  ;;  %v607_v28 = vmax.f32 %v540_v45, 0.0  ;;  %v3094_v51 = vpack.c.bf16 %v3062_v18, %v3062_v18  ;;  %v1710_v45 = vpop.permute.xlu1 %1709 }
  0xd4   : > { %7364 = vst [vmem:[#allocation23_spill] sm:$0xff] %v5219_v11  ;;  %v5240_v40 = vunpack.c.l.bf16 %v919_v8  ;;  %v1706_v10 = vperm.slane %v1701_v34, %v4845_v49  ;;  %v1715_v8 = vperm.slane %v1710_v45, %v4845_v49  ;;  %v1190_v52 = vmul.f32 %v5234_v33, %v5243_v21 }
  0xd5   : > { %7366 = vst [vmem:[#allocation25_spill] sm:$0xff] %v5229_v43  ;;  %v1240_v3 = vld [vmem:[#allocation2 + $0x49] sm:$0xff]  ;;  %v5255_v34 = vpop.permute.xlu2 %958  ;;  %v2299_v43 = vmul.f32 %v5029_v13, %v5108_v50  ;;  %v2298_v13 = vmul.f32 %v5027_v12, %v5102_v41 }
  0xd6   : > { %v775_v30 = vld [vmem:[#allocation2 + $0x48] sm:$0xff]  ;;  %678 = vst.msk [vmem:[#allocation2 + $0x51] sm:$0xff] %vm631_vm1, %v607_v28  ;;  %v1267_v0 = vpack.c.bf16 %v1240_v3, %v1239_v27  ;;  %v3126_v27 = vunpack.c.l.bf16 %v3094_v51  ;;  %v5277_v63 = vunpack.c.l.bf16 %v1706_v10  ;;  %v928_v10 = vperm.slane %v5122_v9, %v4845_v49 }
  0xd7   : > { %v807_v42 = vpack.c.bf16 %v775_v30, %v775_v30  ;;  %v2746_v60 = vld [vmem:[#allocation2 + $0x42] sm:$0xff]  ;;  %v761_v9 = vld [vmem:[%s7225_s8 + $0x6c] sm:$0xf] }
  0xd8   : > { %v1570_v1 = vld [vmem:[#allocation2 + $0x42] sm:$0xff]  ;;  %v2778_v5 = vpack.c.bf16 %v2746_v60, %v2746_v60  ;;  %4427 = vmatmul.msk.bf16.gmra.mxu1 %vm631_vm1, %v1267_v0  ;;  %v541_v18 = vpop.f32.mrf.mxu0  ;;  %v5272_v11 = vmul.f32 %v3126_v27, %v5100_v38 }
  0xd9   : > { %v5247_v44 = vunpack.c.l.bf16 %v807_v42  ;;  %v3063_v48 = vld [vmem:[#allocation2 + $0x48] sm:$0xff]  ;;  %v1602_v3 = vpack.c.bf16 %v1570_v1, %v1570_v1  ;;  %v542_v30 = vadd.f32 %v4970_v24, %v541_v18  ;;  %v763_v42 = vld [vmem:[%s7225_s8 + $0x74] sm:$0xf]  ;;  %v758_v1 = vld [vmem:[%s7225_s8 + $0x60] sm:$0xf] }
  0xda   : > { %v2810_v47 = vunpack.c.l.bf16 %v2778_v5  ;;  %v3095_v28 = vpack.c.bf16 %v3063_v48, %v3063_v48  ;;  %v762_v5 = vld [vmem:[%s7225_s8 + $0x70] sm:$0xf]  ;;  %1889 = vperm.xlu1 %4624, %v763_v42   ;;  %1844 = vperm.xlu2 %4625, %v758_v1   ;;  %7368 = vst [vmem:[#allocation27_spill] sm:$0xff] %v5272_v11  ;;  %v2329_v42 = vpack.c.bf16 %v2299_v43, %v2298_v13 }
  0xdb   : > { %v1191_v60 = vmul.f32 %v5240_v40, %v5247_v44  ;;  %v608_v0 = vmax.f32 %v542_v30, 0.0  ;;  %1880 = vperm.xlu0 %4623, %v762_v5   ;;  %v1922_v55 = vunpack.c.l.bf16 %v1602_v3  ;;  %v937_v3 = vperm.slane %v5137_v58, %v4845_v49 }
  0xdc   : > { %v5267_v48 = vmul.f32 %v2810_v47, %v5104_v46  ;;  %v3127_v51 = vunpack.c.l.bf16 %v3095_v28  ;;  %v5280_v28 = vunpack.c.l.bf16 %v1715_v8  ;;  %v5304_v58 = vmul.f32 %v2810_v47, %v5199_v4 }
  0xdd   : > { %v1218_v45 = vpack.c.bf16 %v1191_v60, %v1190_v52  ;;  %v1571_v18 = vld [vmem:[#allocation2 + $0x4a] sm:$0xff]  ;;  %679 = vst.msk [vmem:[#allocation2 + $0x59] sm:$0xff] %vm631_vm1, %v608_v0  ;;  %v5292_v1 = vmul.f32 %v5277_v63, %v1922_v55 }
  0xde   : > { %7367 = vst [vmem:[#allocation26_spill] sm:$0xff] %v5267_v48  ;;  %v5275_v53 = vmul.f32 %v3127_v51, %v5098_v36  ;;  %v1603_v46 = vpack.c.bf16 %v1571_v18, %v1571_v18  ;;  %v2747_v30 = vld [vmem:[#allocation2 + $0x4a] sm:$0xff]  ;;  %v5298_v51 = vpop.permute.xlu0 %967 }
  0xdf   : > { %4443 = vmatmul.msk.bf16.gmra.mxu2 %vm631_vm1, %v1218_v45  ;;  %v776_v50 = vld [vmem:[#allocation2 + $0x50] sm:$0xff]  ;;  %v2779_v27 = vpack.c.bf16 %v2747_v30, %v2747_v30  ;;  %7370 = vst [vmem:[#allocation29_spill] sm:$0xff] %v5292_v1  ;;  %v5315_v30 = vunpack.c.l.bf16 %v928_v10 }
  0xe0   : > { %7369 = vst [vmem:[#allocation28_spill] sm:$0xff] %v5275_v53  ;;  %v1923_v60 = vunpack.c.l.bf16 %v1603_v46  ;;  %v544_v8 = vpop.f32.mrf.mxu0  ;;  %v808_v0 = vpack.c.bf16 %v776_v50, %v776_v50  ;;  %v3064_v45 = vld [vmem:[#allocation2 + $0x50] sm:$0xff] }
  0xe1   : > { %v2811_v5 = vunpack.c.l.bf16 %v2779_v27  ;;  %v545_v41 = vadd.f32 %v4970_v24, %v544_v8  ;;  %7372 = vst [vmem:[#allocation31_spill] sm:$0xff] %v5304_v58  ;;  %v1241_v13 = vld [vmem:[#allocation2 + $0x51] sm:$0xff]  ;;  %v1728_v27 = vpop.permute.xlu2 %1727  ;;  %v3096_v8 = vpack.c.bf16 %v3064_v45, %v3064_v45 }
  0xe2   : > { %v5295_v12 = vmul.f32 %v5280_v28, %v1923_v60  ;;  %4474 = vmatmul.msk.bf16.gmra.mxu0 %vm631_vm1, %v2329_v42  ;;  %1871 = vperm.xlu2 %4625, %v761_v9   ;;  %v1719_v42 = vpop.permute.xlu1 %1718  ;;  %v5324_v52 = vunpack.c.l.bf16 %v808_v0  ;;  %v1733_v9 = vperm.slane %v1728_v27, %v4845_v49  ;;  %v765_v27 = vld [vmem:[%s7225_s8 + $0x7c] sm:$0xf] }
  0xe3   : > { %v5307_v43 = vmul.f32 %v2811_v5, %v5202_v6  ;;  %v5310_v55 = vmul.f32 %v2811_v5, %v5125_v16  ;;  %v609_v18 = vmax.f32 %v545_v41, 0.0  ;;  %v5321_v5 = vunpack.c.l.bf16 %v937_v3  ;;  %1907 = vperm.xlu0 %4623, %v765_v27  }
  0xe4   : > { %7371 = vst [vmem:[#allocation30_spill] sm:$0xff] %v5295_v12  ;;  %v1242_v50 = vld [vmem:[#allocation2 + $0x59] sm:$0xff]  ;;  %v1724_v3 = vperm.slane %v1719_v42, %v4845_v49 }
  0xe5   : > { %7373 = vst [vmem:[#allocation32_spill] sm:$0xff] %v5307_v43  ;;  %v777_v60 = vld [vmem:[#allocation2 + $0x58] sm:$0xff]  ;;  %v1268_v41 = vpack.c.bf16 %v1242_v50, %v1241_v13  ;;  %v1192_v50 = vmul.f32 %v5315_v30, %v5324_v52 }
  0xe6   : > { %7374 = vst [vmem:[#allocation33_spill] sm:$0xff] %v5310_v55  ;;  %v809_v10 = vpack.c.bf16 %v777_v60, %v777_v60  ;;  %v2748_v46 = vld [vmem:[#allocation2 + $0x52] sm:$0xff]  ;;  %v3128_v55 = vunpack.c.l.bf16 %v3096_v8  ;;  %v5342_v8 = vpop.permute.xlu0 %976  ;;  %v5352_v12 = vunpack.c.l.bf16 %v1724_v3  ;;  %v946_v3 = vperm.slane %v5189_v59, %v4845_v49 }
  0xe7   : > { %680 = vst.msk [vmem:[#allocation2 + $0x61] sm:$0xff] %vm631_vm1, %v609_v18  ;;  %v1572_v11 = vld [vmem:[#allocation2 + $0x52] sm:$0xff]  ;;  %v2780_v53 = vpack.c.bf16 %v2748_v46, %v2748_v46 }
  0xe8   : > { %4428 = vmatmul.msk.bf16.gmra.mxu1 %vm631_vm1, %v1268_v41  ;;  %v5328_v47 = vunpack.c.l.bf16 %v809_v10  ;;  %v3065_v16 = vld [vmem:[#allocation2 + $0x58] sm:$0xff]  ;;  %v546_v45 = vpop.f32.mrf.mxu0  ;;  %v1604_v13 = vpack.c.bf16 %v1572_v11, %v1572_v11  ;;  %v2301_v41 = vmul.f32 %v5098_v36, %v5174_v35  ;;  %v5347_v10 = vmul.f32 %v3128_v55, %v5157_v7 }
  0xe9   : > { %v2812_v48 = vunpack.c.l.bf16 %v2780_v53  ;;  %v3097_v18 = vpack.c.bf16 %v3065_v16, %v3065_v16  ;;  %v547_v0 = vadd.f32 %v4970_v24, %v546_v45  ;;  %v2300_v35 = vmul.f32 %v5100_v38, %v5162_v39 }
  0xea   : > { %v1193_v46 = vmul.f32 %v5321_v5, %v5328_v47  ;;  %7376 = vst [vmem:[#allocation35_spill] sm:$0xff] %v5347_v10  ;;  %v1924_v1 = vunpack.c.l.bf16 %v1604_v13  ;;  %v955_v13 = vperm.slane %v5213_v56, %v4845_v49 }
  0xeb   : > { %v5340_v60 = vmul.f32 %v2812_v48, %v5199_v4  ;;  %v3129_v42 = vunpack.c.l.bf16 %v3097_v18  ;;  %v610_v53 = vmax.f32 %v547_v0, 0.0  ;;  %v5355_v18 = vunpack.c.l.bf16 %v1733_v9 }
  0xec   : > { %v1219_v16 = vpack.c.bf16 %v1193_v46, %v1192_v50  ;;  %v2330_v27 = vpack.c.bf16 %v2301_v41, %v2300_v35  ;;  %v5376_v59 = vmul.f32 %v2812_v48, %v5277_v63  ;;  %v5387_v35 = vunpack.c.l.bf16 %v955_v13 }
  0xed   : > { %7375 = vst [vmem:[#allocation34_spill] sm:$0xff] %v5340_v60  ;;  %v5350_v45 = vmul.f32 %v3129_v42, %v5168_v31 }
  0xee   : > { %v1573_v11 = vld [vmem:[#allocation2 + $0x5a] sm:$0xff]  ;;  %681 = vst.msk [vmem:[#allocation2 + $0x69] sm:$0xff] %vm631_vm1, %v610_v53  ;;  %v5367_v53 = vmul.f32 %v5352_v12, %v1924_v1 }
  0xef   : > { %7377 = vst [vmem:[#allocation36_spill] sm:$0xff] %v5350_v45  ;;  %v1605_v4 = vpack.c.bf16 %v1573_v11, %v1573_v11  ;;  %v2749_v0 = vld [vmem:[#allocation2 + $0x5a] sm:$0xff]  ;;  %4444 = vmatmul.msk.bf16.gmra.mxu2 %vm631_vm1, %v1219_v16  ;;  %v5373_v16 = vpop.permute.xlu1 %985 }
  0xf0   : > { %v778_v36 = vld [vmem:[#allocation2 + $0x60] sm:$0xff]  ;;  %v2781_v55 = vpack.c.bf16 %v2749_v0, %v2749_v0  ;;  %v549_v9 = vpop.f32.mrf.mxu0  ;;  %7378 = vst [vmem:[#allocation37_spill] sm:$0xff] %v5367_v53 }
  0xf1   : > { %v1925_v46 = vunpack.c.l.bf16 %v1605_v4  ;;  %v550_v39 = vadd.f32 %v4970_v24, %v549_v9  ;;  %v810_v11 = vpack.c.bf16 %v778_v36, %v778_v36  ;;  %v3066_v4 = vld [vmem:[#allocation2 + $0x60] sm:$0xff]  ;;  %7380 = vst [vmem:[#allocation39_spill] sm:$0xff] %v5376_v59 }
  0xf2   : > { %v2813_v42 = vunpack.c.l.bf16 %v2781_v55  ;;  %4475 = vmatmul.msk.bf16.gmra.mxu0 %vm631_vm1, %v2330_v27  ;;  %v1737_v55 = vpop.permute.xlu2 %1736  ;;  %v1243_v36 = vld [vmem:[#allocation2 + $0x61] sm:$0xff] }
  0xf3   : > { %v5370_v38 = vmul.f32 %v5355_v18, %v1925_v46  ;;  %v611_v1 = vmax.f32 %v550_v39, 0.0  ;;  %v1746_v39 = vpop.permute.xlu0 %1745  ;;  %v5396_v13 = vunpack.c.l.bf16 %v810_v11 }
  0xf4   : > { %v5379_v56 = vmul.f32 %v2813_v42, %v5280_v28  ;;  %v5382_v41 = vmul.f32 %v2813_v42, %v5202_v6  ;;  %v3098_v6 = vpack.c.bf16 %v3066_v4, %v3066_v4  ;;  %v5393_v42 = vunpack.c.l.bf16 %v946_v3 }
  0xf5   : > { %7379 = vst [vmem:[#allocation38_spill] sm:$0xff] %v5370_v38  ;;  %v1244_v46 = vld [vmem:[#allocation2 + $0x69] sm:$0xff]  ;;  %v1742_v38 = vperm.slane %v1737_v55, %v4845_v49  ;;  %v1751_v3 = vperm.slane %v1746_v39, %v4845_v49 }
  0xf6   : > { %7381 = vst [vmem:[#allocation40_spill] sm:$0xff] %v5379_v56  ;;  %v779_v9 = vld [vmem:[#allocation2 + $0x68] sm:$0xff]  ;;  %v1269_v27 = vpack.c.bf16 %v1244_v46, %v1243_v36  ;;  %v3130_v36 = vunpack.c.l.bf16 %v3098_v6 }
  0xf7   : > { %7382 = vst [vmem:[#allocation41_spill] sm:$0xff] %v5382_v41  ;;  %v811_v0 = vpack.c.bf16 %v779_v9, %v779_v9  ;;  %v2750_v10 = vld [vmem:[#allocation2 + $0x62] sm:$0xff]  ;;  %v1194_v9 = vmul.f32 %v5393_v42, %v5396_v13  ;;  %v5411_v62 = vpop.permute.xlu1 %994 }
  0xf8   : > { %682 = vst.msk [vmem:[#allocation2 + $0x71] sm:$0xff] %vm631_vm1, %v611_v1  ;;  %v1574_v45 = vld [vmem:[#allocation2 + $0x62] sm:$0xff]  ;;  %v2782_v53 = vpack.c.bf16 %v2750_v10, %v2750_v10  ;;  %4429 = vmatmul.msk.bf16.gmra.mxu1 %vm631_vm1, %v1269_v27  ;;  %v551_v4 = vpop.f32.mrf.mxu0 }
  0xf9   : > { %v5400_v48 = vunpack.c.l.bf16 %v811_v0  ;;  %v3067_v50 = vld [vmem:[#allocation2 + $0x68] sm:$0xff]  ;;  %v1606_v46 = vpack.c.bf16 %v1574_v45, %v1574_v45  ;;  %v552_v11 = vadd.f32 %v4970_v24, %v551_v4  ;;  %v2303_v45 = vmul.f32 %v5168_v31, %v5247_v44 }
  0xfa   : > { %v2814_v60 = vunpack.c.l.bf16 %v2782_v53  ;;  %v3099_v1 = vpack.c.bf16 %v3067_v50, %v3067_v50  ;;  %v5416_v50 = vmul.f32 %v3130_v36, %v5234_v33  ;;  %v5421_v4 = vunpack.c.l.bf16 %v1742_v38 }
  0xfb   : > { %v1195_v10 = vmul.f32 %v5387_v35, %v5400_v48  ;;  %v612_v27 = vmax.f32 %v552_v11, 0.0  ;;  %v1926_v39 = vunpack.c.l.bf16 %v1606_v46  ;;  %v2302_v31 = vmul.f32 %v5157_v7, %v5243_v21 }
  0xfc   : > { %v5409_v55 = vmul.f32 %v2814_v60, %v5277_v63  ;;  %v3131_v0 = vunpack.c.l.bf16 %v3099_v1  ;;  %7384 = vst [vmem:[#allocation43_spill] sm:$0xff] %v5416_v50  ;;  %v5424_v1 = vunpack.c.l.bf16 %v1751_v3  ;;  %v964_v38 = vperm.slane %v5255_v34, %v4845_v49  ;;  %v764_v34 = vld [vmem:[%s7225_s8 + $0x78] sm:$0xf]  ;;  %v1342_v50 = vpop.f32.mrf.mxu1 }
  0xfd   : > { %v1220_v41 = vpack.c.bf16 %v1195_v10, %v1194_v9  ;;  %683 = vst.msk [vmem:[#allocation2 + $0x79] sm:$0xff] %vm631_vm1, %v612_v27  ;;  %v973_v10 = vperm.slane %v5298_v51, %v4845_v49  ;;  %1898 = vperm.xlu2 %4625, %v764_v34  }
  0xfe   : > { %7383 = vst [vmem:[#allocation42_spill] sm:$0xff] %v5409_v55  ;;  %v5419_v6 = vmul.f32 %v3131_v0, %v5240_v40  ;;  %v2331_v0 = vpack.c.bf16 %v2303_v45, %v2302_v31 }
  0xff   : > { %v1575_v53 = vld [vmem:[#allocation2 + $0x6a] sm:$0xff]  ;;  %4445 = vmatmul.msk.bf16.gmra.mxu2 %vm631_vm1, %v1220_v41  ;;  %v5436_v41 = vmul.f32 %v5421_v4, %v1926_v39  ;;  %v5454_v39 = vunpack.c.l.bf16 %v964_v38 }
 0x100   : > { %7385 = vst [vmem:[#allocation44_spill] sm:$0xff] %v5419_v6  ;;  %v1607_v63 = vpack.c.bf16 %v1575_v53, %v1575_v53  ;;  %v2751_v11 = vld [vmem:[#allocation2 + $0x6a] sm:$0xff]  ;;  %v554_v3 = vpop.f32.mrf.mxu0  ;;  %v1482_v6 = vpop.f32.mrf.mxu2 }
 0x101   : > { %v780_v44 = vld [vmem:[#allocation2 + $0x70] sm:$0xff]  ;;  %v2783_v36 = vpack.c.bf16 %v2751_v11, %v2751_v11  ;;  %7386 = vst [vmem:[#allocation45_spill] sm:$0xff] %v5436_v41  ;;  %v555_v21 = vadd.f32 %v4970_v24, %v554_v3  ;;  %v4489_v41 = vld [vmem:[%s7220_s3 + $0x8] sm:$0x3] }
 0x102   : > { %v1927_v46 = vunpack.c.l.bf16 %v1607_v63  ;;  %v812_v53 = vpack.c.bf16 %v780_v44, %v780_v44  ;;  %v3068_v11 = vld [vmem:[#allocation2 + $0x70] sm:$0xff]  ;;  %v5446_v63 = vmul.f32 %v2814_v60, %v5352_v12  ;;  %4476 = vmatmul.msk.bf16.gmra.mxu0 %vm631_vm1, %v2331_v0  ;;  %v1755_v44 = vpop.permute.xlu0 %1754  ;;  %v2617_v38 = vsel %vm1329_vm2, %v4489_v41, 0 }
 0x103   : > { %v2815_v27 = vunpack.c.l.bf16 %v2783_v36  ;;  %v613_v31 = vmax.f32 %v555_v21, 0.0  ;;  %v1245_v60 = vld [vmem:[#allocation2 + $0x71] sm:$0xff]  ;;  %v1764_v21 = vpop.permute.xlu1 %1763  ;;  %2626 = vmatpush.bf16.msrb.mxu1 %v2617_v38  ;;  %v2305_v38 = vmul.f32 %v5240_v40, %v5328_v47  ;;  %v2304_v40 = vmul.f32 %v5234_v33, %v5324_v52 }
 0x104   : > { %v5439_v7 = vmul.f32 %v5424_v1, %v1927_v46  ;;  %7388 = vst [vmem:[#allocation47_spill] sm:$0xff] %v5446_v63  ;;  %v5459_v46 = vunpack.c.l.bf16 %v973_v10  ;;  %v1246_v3 = vld [vmem:[#allocation2 + $0x79] sm:$0xff]  ;;  %v5466_v36 = vunpack.c.l.bf16 %v812_v53  ;;  %v5468_v10 = vadd.f32 %v1482_v6, %v1342_v50 }
 0x105   : > { %v5449_v51 = vmul.f32 %v2815_v27, %v5355_v18  ;;  %v5452_v45 = vmul.f32 %v2815_v27, %v5280_v28  ;;  %v781_v9 = vld [vmem:[#allocation2 + $0x78] sm:$0xff]  ;;  %v3100_v27 = vpack.c.bf16 %v3068_v11, %v3068_v11  ;;  %684 = vst.msk [vmem:[#allocation2 + $0x81] sm:$0xff] %vm631_vm1, %v613_v31  ;;  %v1270_v0 = vpack.c.bf16 %v1246_v3, %v1245_v60  ;;  %v5473_v28 = vpop.permute.xlu2 %1003 }
 0x106   : > { %7387 = vst [vmem:[#allocation46_spill] sm:$0xff] %v5439_v7  ;;  %v813_v34 = vpack.c.bf16 %v781_v9, %v781_v9  ;;  %v2752_v7 = vld [vmem:[#allocation2 + $0x72] sm:$0xff]  ;;  %v1760_v31 = vperm.slane %v1755_v44, %v4845_v49  ;;  %v1769_v6 = vperm.slane %v1764_v21, %v4845_v49  ;;  %v1196_v41 = vmul.f32 %v5454_v39, %v5466_v36 }
 0x107   : > { %7389 = vst [vmem:[#allocation48_spill] sm:$0xff] %v5449_v51  ;;  %v1576_v17 = vld [vmem:[#allocation2 + $0x72] sm:$0xff]  ;;  %v2784_v11 = vpack.c.bf16 %v2752_v7, %v2752_v7  ;;  %v3132_v55 = vunpack.c.l.bf16 %v3100_v27 }
 0x108   : > { %7390 = vst [vmem:[#allocation49_spill] sm:$0xff] %v5452_v45  ;;  %4430 = vmatmul.msk.bf16.gmra.mxu1 %vm631_vm1, %v1270_v0  ;;  %v5478_v9 = vunpack.c.l.bf16 %v813_v34  ;;  %v3069_v53 = vld [vmem:[#allocation2 + $0x78] sm:$0xff]  ;;  %v556_v50 = vpop.f32.mrf.mxu0  ;;  %v1608_v45 = vpack.c.bf16 %v1576_v17, %v1576_v17 }
 0x109   : > { %7391 = vst [vmem:[#allocation50_spill] sm:$0xff] %v5468_v10  ;;  %v2816_v60 = vunpack.c.l.bf16 %v2784_v11  ;;  %v3101_v3 = vpack.c.bf16 %v3069_v53, %v3069_v53  ;;  %v557_v10 = vadd.f32 %v4970_v24, %v556_v50  ;;  %v5492_v17 = vmul.f32 %v3132_v55, %v5315_v30 }
 0x10a   : > { %v1197_v7 = vmul.f32 %v5459_v46, %v5478_v9  ;;  %v1928_v27 = vunpack.c.l.bf16 %v1608_v45  ;;  %v5497_v11 = vunpack.c.l.bf16 %v1760_v31  ;;  %v5500_v53 = vunpack.c.l.bf16 %v1769_v6  ;;  %v5507_v45 = vpop.permute.xlu0 %1021 }
 0x10b   : > { %v5487_v44 = vmul.f32 %v2816_v60, %v5352_v12  ;;  %v3133_v0 = vunpack.c.l.bf16 %v3101_v3  ;;  %v614_v34 = vmax.f32 %v557_v10, 0.0  ;;  %7393 = vst [vmem:[#allocation52_spill] sm:$0xff] %v5492_v17  ;;  %v982_v31 = vperm.slane %v5342_v8, %v4845_v49 }
 0x10c   : > { %v1221_v29 = vpack.c.bf16 %v1197_v7, %v1196_v41  ;;  %v1577_v21 = vld [vmem:[#allocation2 + $0x7a] sm:$0xff]  ;;  %v991_v6 = vperm.slane %v5373_v16, %v4845_v49  ;;  %v2332_v7 = vpack.c.bf16 %v2305_v38, %v2304_v40  ;;  %v5516_v33 = vmul.f32 %v5497_v11, %v1928_v27 }
 0x10d   : > { %7392 = vst [vmem:[#allocation51_spill] sm:$0xff] %v5487_v44  ;;  %v5495_v24 = vmul.f32 %v3133_v0, %v5321_v5  ;;  %v1609_v12 = vpack.c.bf16 %v1577_v21, %v1577_v21  ;;  %v2753_v10 = vld [vmem:[#allocation2 + $0x7a] sm:$0xff]  ;;  %v5528_v38 = vmul.f32 %v2816_v60, %v5421_v4  ;;  %v2307_v44 = vmul.f32 %v5321_v5, %v5400_v48 }
 0x10e   : > { %685 = vst.msk [vmem:[#allocation2 + $0x89] sm:$0xff] %vm631_vm1, %v614_v34  ;;  %v782_v47 = vld [vmem:[#allocation2 + $0x80] sm:$0xff]  ;;  %v2785_v55 = vpack.c.bf16 %v2753_v10, %v2753_v10  ;;  %v1009_v5 = vperm.slane %v5473_v28, %v4845_v49 }
 0x10f   : > { %7394 = vst [vmem:[#allocation53_spill] sm:$0xff] %v5495_v24  ;;  %4446 = vmatmul.msk.bf16.gmra.mxu2 %vm631_vm1, %v1221_v29  ;;  %v1929_v3 = vunpack.c.l.bf16 %v1609_v12  ;;  %v5513_v29 = vpop.permute.xlu2 %1012  ;;  %v5524_v34 = vld [vmem:[%s7219_s2] ss:$0 sm:$0xff]  ;;  %v814_v21 = vpack.c.bf16 %v782_v47, %v782_v47 }
 0x110   : > { %v559_v41 = vpop.f32.mrf.mxu0  ;;  %v2817_v0 = vunpack.c.l.bf16 %v2785_v55  ;;  %7395 = vst [vmem:[#allocation54_spill] sm:$0xff] %v5516_v33  ;;  %v3070_v16 = vld [vmem:[#allocation2 + $0x80] sm:$0xff]  ;;  %v5539_v55 = vunpack.c.l.bf16 %v982_v31 }
 0x111   : > { %v5519_v52 = vmul.f32 %v5500_v53, %v1929_v3  ;;  %v560_v8 = vadd.f32 %v5524_v34, %v559_v41  ;;  %7397 = vst [vmem:[#allocation56_spill] sm:$0xff] %v5528_v38  ;;  %v1247_v3 = vld [vmem:[#allocation2 + $0x81] sm:$0xff]  ;;  %v3102_v17 = vpack.c.bf16 %v3070_v16, %v3070_v16 }
 0x112   : > { %v5531_v12 = vmul.f32 %v2817_v0, %v5424_v1  ;;  %v5534_v27 = vmul.f32 %v2817_v0, %v5355_v18  ;;  %4477 = vmatmul.msk.bf16.gmra.mxu0 %vm631_vm1, %v2332_v7  ;;  %7400 = vst [vmem:[#allocation59_spill] sm:$0xff] %v5539_v55  ;;  %v5545_v18 = vunpack.c.l.bf16 %v991_v6 }
 0x113   : > { %7396 = vst [vmem:[#allocation55_spill] sm:$0xff] %v5519_v52  ;;  %v615_v10 = vmax.f32 %v560_v8, 0.0  ;;  %v5548_v8 = vunpack.c.l.bf16 %v814_v21  ;;  %v3134_v50 = vunpack.c.l.bf16 %v3102_v17  ;;  %v5567_v17 = vpop.permute.xlu1 %1772 }
 0x114   : > { %7398 = vst [vmem:[#allocation57_spill] sm:$0xff] %v5531_v12 }
 0x115   : > { %7399 = vst [vmem:[#allocation58_spill] sm:$0xff] %v5534_v27  ;;  %v1248_v47 = vld [vmem:[#allocation2 + $0x89] sm:$0xff]  ;;  %v1198_v16 = vmul.f32 %v5539_v55, %v5548_v8 }
 0x116   : > { %v783_v41 = vld [vmem:[#allocation2 + $0x88] sm:$0xff]  ;;  %7401 = vst [vmem:[#allocation60_spill] sm:$0xff] %v5545_v18  ;;  %v1271_v7 = vpack.c.bf16 %v1248_v47, %v1247_v3  ;;  %v579_v3 = vpop.f32.mrf.mxu3 }
 0x117   : > { %686 = vst.msk [vmem:[#allocation2 + $0x91] sm:$0xff] %vm631_vm1, %v615_v10  ;;  %v815_v0 = vpack.c.bf16 %v783_v41, %v783_v41  ;;  %v2754_v31 = vld [vmem:[#allocation2 + $0x82] sm:$0xff]  ;;  %v5558_v10 = vpop.permute.xlu0 %1030  ;;  %v5560_v47 = vpop.permute.xlu2 %1781 }
 0x118   : > { %v2786_v40 = vpack.c.bf16 %v2754_v31, %v2754_v31  ;;  %4431 = vmatmul.msk.bf16.gmra.mxu1 %vm631_vm1, %v1271_v7  ;;  %v3071_v33 = vld [vmem:[#allocation2 + $0x88] sm:$0xff]  ;;  %v561_v60 = vpop.f32.mrf.mxu0  ;;  %v5562_v41 = vpop.f32.mrf.mxu1 }
 0x119   : > { %v5551_v24 = vunpack.c.l.bf16 %v815_v0  ;;  %v3103_v38 = vpack.c.bf16 %v3071_v33, %v3071_v33  ;;  %v562_v6 = vadd.f32 %v5524_v34, %v561_v60  ;;  %7402 = vst [vmem:[#allocation61_spill] sm:$0xff] %v5562_v41  ;;  %v5570_v0 = vmul.f32 %v3134_v50, %v5393_v42 }
 0x11a   : > { %v2818_v52 = vunpack.c.l.bf16 %v2786_v40  ;;  %v580_v41 = vadd.f32 %v5524_v34, %v579_v3  ;;  %v1000_v50 = vperm.slane %v5411_v62, %v4845_v49 }
 0x11b   : > { %v1199_v21 = vmul.f32 %v5545_v18, %v5551_v24  ;;  %v3135_v33 = vunpack.c.l.bf16 %v3103_v38  ;;  %v616_v40 = vmax.f32 %v562_v6, 0.0  ;;  %7404 = vst [vmem:[#allocation63_spill] sm:$0xff] %v5570_v0 }
 0x11c   : > { %v5565_v7 = vmul.f32 %v2818_v52, %v5421_v4  ;;  %v5591_v0 = vmul.f32 %v2818_v52, %v5497_v11 }
 0x11d   : > { %v1222_v60 = vpack.c.bf16 %v1199_v21, %v1198_v16  ;;  %v5573_v31 = vmul.f32 %v3135_v33, %v5387_v35  ;;  %687 = vst.msk [vmem:[#allocation2 + $0x99] sm:$0xff] %vm631_vm1, %v616_v40  ;;  %v2306_v16 = vmul.f32 %v5315_v30, %v5396_v13  ;;  %v623_v21 = vmax.f32 %v580_v41, 0.0 }
 0x11e   : > { %7403 = vst [vmem:[#allocation62_spill] sm:$0xff] %v5565_v7  ;;  %v2755_v4 = vld [vmem:[#allocation2 + $0x8a] sm:$0xff]  ;;  %v5599_v13 = vunpack.c.l.bf16 %v1000_v50  ;;  %v5604_v41 = vunpack.c.l.bf16 %v1009_v5 }
 0x11f   : > { %7405 = vst [vmem:[#allocation64_spill] sm:$0xff] %v5573_v31  ;;  %4447 = vmatmul.msk.bf16.gmra.mxu2 %vm631_vm1, %v1222_v60  ;;  %v784_v38 = vld [vmem:[#allocation2 + $0x90] sm:$0xff]  ;;  %v2787_v27 = vpack.c.bf16 %v2755_v4, %v2755_v4  ;;  %v2333_v40 = vpack.c.bf16 %v2307_v44, %v2306_v16  ;;  %v581_v4 = vpop.f32.mrf.mxu3  ;;  %v5602_v44 = vpop.permute.xlu1 %1039 }
 0x120   : > { %v564_v48 = vpop.f32.mrf.mxu0  ;;  %v816_v60 = vpack.c.bf16 %v784_v38, %v784_v38  ;;  %694 = vst.msk [vmem:[#allocation2 + $0xd1] sm:$0xff] %vm631_vm1, %v623_v21  ;;  %v3072_v6 = vld [vmem:[#allocation2 + $0x90] sm:$0xff]  ;;  %v1791_v38 = vpop.permute.xlu2 %1790  ;;  %v582_v12 = vadd.f32 %v5524_v34, %v581_v4 }
 0x121   : > { %v2819_v3 = vunpack.c.l.bf16 %v2787_v27  ;;  %v565_v33 = vadd.f32 %v5524_v34, %v564_v48  ;;  %7406 = vst [vmem:[#allocation65_spill] sm:$0xff] %v5591_v0  ;;  %v1800_v27 = vpop.permute.xlu0 %1799  ;;  %v1249_v52 = vld [vmem:[#allocation2 + $0x91] sm:$0xff]  ;;  %v1796_v63 = vperm.slane %v1791_v38, %v4845_v49 }
 0x122   : > { %7409 = vst [vmem:[#allocation68_spill] sm:$0xff] %v5599_v13  ;;  %4478 = vmatmul.msk.bf16.gmra.mxu0 %vm631_vm1, %v2333_v40  ;;  %v5613_v5 = vunpack.c.l.bf16 %v816_v60 }
 0x123   : > { %v5594_v62 = vmul.f32 %v2819_v3, %v5500_v53  ;;  %v5597_v30 = vmul.f32 %v2819_v3, %v5424_v1  ;;  %v617_v28 = vmax.f32 %v565_v33, 0.0  ;;  %7410 = vst [vmem:[#allocation69_spill] sm:$0xff] %v5604_v41  ;;  %v3104_v3 = vpack.c.bf16 %v3072_v6, %v3072_v6  ;;  %v5618_v1 = vpop.f32.mrf.mxu2 }
 0x124   : > { %v5606_v16 = vpop.f32.mrf.mxu1  ;;  %v1250_v21 = vld [vmem:[#allocation2 + $0x99] sm:$0xff]  ;;  %7411 = vst [vmem:[#allocation70_spill] sm:$0xff] %v5618_v1  ;;  %v624_v6 = vmax.f32 %v582_v12, 0.0  ;;  %v1200_v38 = vmul.f32 %v5599_v13, %v5613_v5 }
 0x125   : > { %7407 = vst [vmem:[#allocation66_spill] sm:$0xff] %v5594_v62  ;;  %v785_v48 = vld [vmem:[#allocation2 + $0x98] sm:$0xff]  ;;  %v1272_v40 = vpack.c.bf16 %v1250_v21, %v1249_v52  ;;  %v3136_v21 = vunpack.c.l.bf16 %v3104_v3 }
 0x126   : > { %7408 = vst [vmem:[#allocation67_spill] sm:$0xff] %v5597_v30  ;;  %v1580_v33 = vld [vmem:[#allocation2 + $0x92] sm:$0xff]  ;;  %v817_v31 = vpack.c.bf16 %v785_v48, %v785_v48  ;;  %v2309_v30 = vmul.f32 %v5387_v35, %v5478_v9  ;;  %v2308_v35 = vmul.f32 %v5393_v42, %v5466_v36 }
 0x127   : > { %688 = vst.msk [vmem:[#allocation2 + $0xa1] sm:$0xff] %vm631_vm1, %v617_v28  ;;  %v2756_v25 = vld [vmem:[#allocation2 + $0x92] sm:$0xff]  ;;  %v1612_v28 = vpack.c.bf16 %v1580_v33, %v1580_v33  ;;  %v584_v12 = vpop.f32.mrf.mxu3 }
 0x128   : > { %v2788_v32 = vpack.c.bf16 %v2756_v25, %v2756_v25  ;;  %4432 = vmatmul.msk.bf16.gmra.mxu1 %vm631_vm1, %v1272_v40  ;;  %v5620_v0 = vunpack.c.l.bf16 %v817_v31  ;;  %v3073_v50 = vld [vmem:[#allocation2 + $0x98] sm:$0xff]  ;;  %v566_v7 = vpop.f32.mrf.mxu0  ;;  %v1805_v25 = vperm.slane %v1800_v27, %v4845_v49  ;;  %695 = vst.msk [vmem:[#allocation2 + $0xd9] sm:$0xff] %vm631_vm1, %v624_v6  ;;  %v5642_v6 = vmul.f32 %v3136_v21, %v5454_v39 }
 0x129   : > { %v3105_v60 = vpack.c.bf16 %v3073_v50, %v3073_v50  ;;  %v567_v4 = vadd.f32 %v5524_v34, %v566_v7  ;;  %v5635_v50 = vunpack.c.l.bf16 %v1796_v63  ;;  %v1827_v33 = vpop.permute.xlu0 %1826  ;;  %v1932_v27 = vunpack.c.l.bf16 %v1612_v28 }
 0x12a   : > { %v5622_v52 = vunpack.c.l.bf16 %v2788_v32  ;;  %v1201_v48 = vmul.f32 %v5604_v41, %v5620_v0  ;;  %7414 = vst [vmem:[#allocation73_spill] sm:$0xff] %v5642_v6  ;;  %v585_v28 = vadd.f32 %v5524_v34, %v584_v12  ;;  %v1832_v21 = vperm.slane %v1827_v33, %v4845_v49 }
 0x12b   : > { %v3137_v32 = vunpack.c.l.bf16 %v3105_v60  ;;  %v618_v3 = vmax.f32 %v567_v4, 0.0  ;;  %v5650_v60 = vpop.permute.xlu1 %1808  ;;  %v1027_v12 = vperm.slane %v5507_v45, %v4845_v49  ;;  %v2334_v42 = vpack.c.bf16 %v2309_v30, %v2308_v35 }
 0x12c   : > { %7412 = vst [vmem:[#allocation71_spill] sm:$0xff] %v5622_v52  ;;  %v5633_v31 = vmul.f32 %v5622_v52, %v5497_v11  ;;  %v1223_v7 = vpack.c.bf16 %v1201_v48, %v1200_v38  ;;  %v5637_v1 = vpop.f32.mrf.mxu1  ;;  %v5648_v11 = vunpack.c.l.bf16 %v1805_v25  ;;  %v1018_v25 = vperm.slane %v5513_v29, %v4845_v49 }
 0x12d   : > { %v5645_v62 = vmul.f32 %v3137_v32, %v5459_v46  ;;  %689 = vst.msk [vmem:[#allocation2 + $0xa9] sm:$0xff] %vm631_vm1, %v618_v3  ;;  %v625_v3 = vmax.f32 %v585_v28, 0.0 }
 0x12e   : > { %7413 = vst [vmem:[#allocation72_spill] sm:$0xff] %v5633_v31  ;;  %v1581_v40 = vld [vmem:[#allocation2 + $0x9a] sm:$0xff] }
 0x12f   : > { %7415 = vst [vmem:[#allocation74_spill] sm:$0xff] %v5645_v62  ;;  %v1613_v63 = vpack.c.bf16 %v1581_v40, %v1581_v40  ;;  %v2757_v4 = vld [vmem:[#allocation2 + $0x9a] sm:$0xff]  ;;  %4448 = vmatmul.msk.bf16.gmra.mxu2 %vm631_vm1, %v1223_v7  ;;  %v5664_v7 = vmul.f32 %v5635_v50, %v1932_v27  ;;  %v3620_v36 = vld [vmem:[#allocation2 + $0xd2] sm:$0xff]  ;;  %v5676_v27 = vunpack.c.l.bf16 %v1832_v21  ;;  %v586_v28 = vpop.f32.mrf.mxu3  ;;  %v5692_v21 = vunpack.c.l.bf16 %v1027_v12 }
 0x130   : > { %v786_v9 = vld [vmem:[#allocation2 + $0xa0] sm:$0xff]  ;;  %v2789_v38 = vpack.c.bf16 %v2757_v4, %v2757_v4  ;;  %v569_v40 = vpop.f32.mrf.mxu0  ;;  %696 = vst.msk [vmem:[#allocation2 + $0xe1] sm:$0xff] %vm631_vm1, %v625_v3 }
 0x131   : > { %v1933_v32 = vunpack.c.l.bf16 %v1613_v63  ;;  %7416 = vst [vmem:[#allocation75_spill] sm:$0xff] %v5664_v7  ;;  %v570_v4 = vadd.f32 %v5524_v34, %v569_v40  ;;  %v1487_v48 = vpop.f32.mrf.mxu2  ;;  %v818_v29 = vpack.c.bf16 %v786_v9, %v786_v9  ;;  %v3652_v63 = vpack.c.bf16 %v3620_v36, %v3620_v36  ;;  %v1251_v40 = vld [vmem:[#allocation2 + $0xa1] sm:$0xff] }
 0x132   : > { %v5666_v52 = vunpack.c.l.bf16 %v2789_v38  ;;  %v5674_v45 = vadd.f32 %v1487_v48, %v5606_v16  ;;  %7420 = vst [vmem:[#allocation79_spill] sm:$0xff] %v5676_v27  ;;  %4479 = vmatmul.msk.bf16.gmra.mxu0 %vm631_vm1, %v2334_v42  ;;  %v5683_v38 = vpop.permute.xlu2 %1817  ;;  %v587_v9 = vadd.f32 %v5524_v34, %v586_v28  ;;  %v5690_v48 = vunpack.c.l.bf16 %v1018_v25 }
 0x133   : > { %v5669_v33 = vmul.f32 %v5648_v11, %v1933_v32  ;;  %v619_v35 = vmax.f32 %v570_v4, 0.0  ;;  %v5685_v32 = vunpack.c.l.bf16 %v3652_v63  ;;  %v5697_v6 = vunpack.c.l.bf16 %v818_v29  ;;  %v1836_v25 = vpop.permute.xlu1 %1835 }
 0x134   : > { %7417 = vst [vmem:[#allocation76_spill] sm:$0xff] %v5666_v52  ;;  %v5680_v30 = vmul.f32 %v5666_v52, %v5500_v53  ;;  %v1252_v53 = vld [vmem:[#allocation2 + $0xa9] sm:$0xff]  ;;  %v626_v12 = vmax.f32 %v587_v9, 0.0 }
 0x135   : > { %7418 = vst [vmem:[#allocation77_spill] sm:$0xff] %v5669_v33  ;;  %v1352_v3 = vpop.f32.mrf.mxu1  ;;  %v787_v36 = vld [vmem:[#allocation2 + $0xa8] sm:$0xff]  ;;  %v1273_v4 = vpack.c.bf16 %v1252_v53, %v1251_v40  ;;  %v5701_v28 = vmul.f32 %v5685_v32, %v5676_v27  ;;  %v1202_v29 = vmul.f32 %v5690_v48, %v5697_v6 }
 0x136   : > { %7419 = vst [vmem:[#allocation78_spill] sm:$0xff] %v5674_v45  ;;  %v819_v63 = vpack.c.bf16 %v787_v36, %v787_v36  ;;  %v1841_v45 = vperm.slane %v1836_v25, %v4845_v49  ;;  %v4506_v9 = vld [vmem:[%s7220_s3 + $0xa] sm:$0x3]  ;;  %v2758_v51 = vld [vmem:[#allocation2 + $0xa2] sm:$0xff] }
 0x137   : > { %7421 = vst [vmem:[#allocation80_spill] sm:$0xff] %v5680_v30  ;;  %v3621_v36 = vld [vmem:[#allocation2 + $0xda] sm:$0xff]  ;;  %v589_v25 = vpop.f32.mrf.mxu3 }
 0x138   : > { %690 = vst.msk [vmem:[#allocation2 + $0xb1] sm:$0xff] %vm631_vm1, %v619_v35  ;;  %4433 = vmatmul.msk.bf16.gmra.mxu1 %vm631_vm1, %v1273_v4  ;;  %v5704_v16 = vunpack.c.l.bf16 %v819_v63  ;;  %v571_v62 = vpop.f32.mrf.mxu0  ;;  %v3653_v63 = vpack.c.bf16 %v3621_v36, %v3621_v36  ;;  %v590_v30 = vadd.f32 %v5524_v34, %v589_v25  ;;  %v5723_v33 = vunpack.c.l.bf16 %v1841_v45 }
 0x139   : > { %7422 = vst [vmem:[#allocation81_spill] sm:$0xff] %v5701_v28  ;;  %v572_v35 = vadd.f32 %v5524_v34, %v571_v62  ;;  %v1489_v40 = vpop.f32.mrf.mxu2  ;;  %v1036_v45 = vperm.slane %v5558_v10, %v4845_v49 }
 0x13a   : > { %697 = vst.msk [vmem:[#allocation2 + $0xe9] sm:$0xff] %vm631_vm1, %v626_v12  ;;  %v1203_v53 = vmul.f32 %v5692_v21, %v5704_v16  ;;  %v5717_v4 = vadd.f32 %v1489_v40, %v5637_v1  ;;  %v2935_v12 = vsel %vm1329_vm2, %v4506_v9, 0  ;;  %v1845_v31 = vpop.permute.xlu2 %1844  ;;  %v5725_v52 = vunpack.c.l.bf16 %v3653_v63  ;;  %v1582_v63 = vld [vmem:[#allocation2 + $0xa2] sm:$0xff] }
 0x13b   : > { %v620_v62 = vmax.f32 %v572_v35, 0.0  ;;  %2944 = vmatpush.bf16.msrb.mxu2 %v2935_v12  ;;  %7424 = vst [vmem:[#allocation83_spill] sm:$0xff] %v5723_v33  ;;  %v2311_v40 = vmul.f32 %v5459_v46, %v5551_v24  ;;  %v627_v36 = vmax.f32 %v590_v30, 0.0  ;;  %v1045_v9 = vperm.slane %v5602_v44, %v4845_v49 }
 0x13c   : > { %7423 = vst [vmem:[#allocation82_spill] sm:$0xff] %v5717_v4  ;;  %v1224_v42 = vpack.c.bf16 %v1203_v53, %v1202_v29  ;;  %v5733_v35 = vmul.f32 %v5725_v52, %v5723_v33  ;;  %v1850_v53 = vperm.slane %v1845_v31, %v4845_v49  ;;  %v2310_v46 = vmul.f32 %v5454_v39, %v5548_v8 }
 0x13d   : > { %v5721_v7 = vpop.f32.mrf.mxu1  ;;  %691 = vst.msk [vmem:[#allocation2 + $0xb9] sm:$0xff] %vm631_vm1, %v620_v62  ;;  %v1814_v31 = vperm.slane %v5650_v60, %v4845_v49  ;;  %v1614_v23 = vpack.c.bf16 %v1582_v63, %v1582_v63 }
 0x13e   : > { %7425 = vst [vmem:[#allocation84_spill] sm:$0xff] %v5733_v35  ;;  %v2335_v44 = vpack.c.bf16 %v2311_v40, %v2310_v46  ;;  %v5750_v8 = vunpack.c.l.bf16 %v1850_v53 }
 0x13f   : > { %v1583_v1 = vld [vmem:[#allocation2 + $0xaa] sm:$0xff]  ;;  %4449 = vmatmul.msk.bf16.gmra.mxu2 %vm631_vm1, %v1224_v42  ;;  %698 = vst.msk [vmem:[#allocation2 + $0xf1] sm:$0xff] %vm631_vm1, %v627_v36  ;;  %v1823_v42 = vperm.slane %v5683_v38, %v4845_v49  ;;  %v591_v36 = vpop.f32.mrf.mxu3  ;;  %v5754_v38 = vunpack.c.l.bf16 %v1036_v45  ;;  %v2790_v45 = vpack.c.bf16 %v2758_v51, %v2758_v51 }
 0x140   : > { %v788_v29 = vld [vmem:[#allocation2 + $0xb0] sm:$0xff]  ;;  %v1615_v30 = vpack.c.bf16 %v1583_v1, %v1583_v1  ;;  %v574_v25 = vpop.f32.mrf.mxu0  ;;  %7427 = vst [vmem:[#allocation86_spill] sm:$0xff] %v5750_v8  ;;  %v592_v60 = vadd.f32 %v5524_v34, %v591_v36  ;;  %v5775_v36 = vunpack.c.l.bf16 %v1814_v31 }
 0x141   : > { %v3622_v24 = vld [vmem:[#allocation2 + $0xe2] sm:$0xff]  ;;  %v575_v10 = vadd.f32 %v5524_v34, %v574_v25  ;;  %v820_v4 = vpack.c.bf16 %v788_v29, %v788_v29  ;;  %v5760_v29 = vunpack.c.l.bf16 %v1823_v42  ;;  %v5791_v31 = vunpack.c.l.bf16 %v2790_v45 }
 0x142   : > { %v3654_v12 = vpack.c.bf16 %v3622_v24, %v3622_v24  ;;  %v1492_v62 = vpop.f32.mrf.mxu2  ;;  %v5756_v24 = vunpack.c.l.bf16 %v1045_v9  ;;  %4480 = vmatmul.msk.bf16.gmra.mxu0 %vm631_vm1, %v2335_v44  ;;  %v1935_v40 = vunpack.c.l.bf16 %v1615_v30  ;;  %v5773_v30 = vpop.permute.xlu1 %1862  ;;  %v628_v42 = vmax.f32 %v592_v60, 0.0 }
 0x143   : > { %v5748_v39 = vadd.f32 %v1492_v62, %v1352_v3  ;;  %v621_v22 = vmax.f32 %v575_v10, 0.0  ;;  %v1253_v3 = vld [vmem:[#allocation2 + $0xb1] sm:$0xff]  ;;  %v5769_v10 = vunpack.c.l.bf16 %v820_v4  ;;  %v5771_v62 = vpop.permute.xlu0 %1853  ;;  %v1934_v44 = vunpack.c.l.bf16 %v1614_v23  ;;  %7431 = vst [vmem:[#allocation90_spill] sm:$0xff] %v5791_v31 }
 0x144   : > { %v5752_v1 = vunpack.c.l.bf16 %v3654_v12  ;;  %v1254_v53 = vld [vmem:[#allocation2 + $0xb9] sm:$0xff]  ;;  %699 = vst.msk [vmem:[#allocation2 + $0xf9] sm:$0xff] %vm631_vm1, %v628_v42  ;;  %v5784_v4 = vmul.f32 %v5760_v29, %v1935_v40 }
 0x145   : > { %7426 = vst [vmem:[#allocation85_spill] sm:$0xff] %v5748_v39  ;;  %v5762_v63 = vpop.f32.mrf.mxu1  ;;  %v789_v46 = vld [vmem:[#allocation2 + $0xb8] sm:$0xff]  ;;  %v1274_v9 = vpack.c.bf16 %v1254_v53, %v1253_v3  ;;  %v1778_v39 = vperm.slane %v5567_v17, %v4845_v49  ;;  %v1204_v23 = vmul.f32 %v5754_v38, %v5769_v10 }
 0x146   : > { %7428 = vst [vmem:[#allocation87_spill] sm:$0xff] %v5752_v1  ;;  %v5766_v25 = vmul.f32 %v5752_v1, %v5750_v8  ;;  %v821_v12 = vpack.c.bf16 %v789_v46, %v789_v46  ;;  %v5794_v46 = vmul.f32 %v5775_v36, %v1934_v44  ;;  %v1584_v45 = vld [vmem:[#allocation2 + $0xb2] sm:$0xff] }
 0x147   : > { %692 = vst.msk [vmem:[#allocation2 + $0xc1] sm:$0xff] %vm631_vm1, %v621_v22  ;;  %v2767_v22 = vld [vmem:[#allocation2 + $0xea] sm:$0xff]  ;;  %v5799_v42 = vunpack.c.l.bf16 %v1778_v39  ;;  %v2225_v39 = vld [vmem:[#allocation2 + $0xd8] sm:$0xff] }
 0x148   : > { %7429 = vst [vmem:[#allocation88_spill] sm:$0xff] %v5766_v25  ;;  %4434 = vmatmul.msk.bf16.gmra.mxu1 %vm631_vm1, %v1274_v9  ;;  %v5780_v51 = vunpack.c.l.bf16 %v821_v12  ;;  %v576_v3 = vpop.f32.mrf.mxu0  ;;  %v2799_v40 = vpack.c.bf16 %v2767_v22, %v2767_v22  ;;  %v594_v12 = vpop.f32.mrf.mxu3 }
 0x149   : > { %7430 = vst [vmem:[#allocation89_spill] sm:$0xff] %v5784_v4  ;;  %v577_v53 = vadd.f32 %v5524_v34, %v576_v3  ;;  %v595_v56 = vadd.f32 %v5524_v34, %v594_v12  ;;  %v2257_v4 = vpack.c.bf16 %v2225_v39, %v2225_v39 }
 0x14a   : > { %v1494_v60 = vpop.f32.mrf.mxu2  ;;  %v1205_v17 = vmul.f32 %v5756_v24, %v5780_v51  ;;  %7432 = vst [vmem:[#allocation91_spill] sm:$0xff] %v5794_v46 }
 0x14b   : > { %v5797_v9 = vadd.f32 %v1494_v60, %v5721_v7  ;;  %7434 = vst [vmem:[#allocation93_spill] sm:$0xff] %v5799_v42  ;;  %v622_v3 = vmax.f32 %v577_v53, 0.0  ;;  %v2313_v7 = vmul.f32 %v5545_v18, %v5620_v0  ;;  %v629_v60 = vmax.f32 %v595_v56, 0.0 }
 0x14c   : > { %v1225_v59 = vpack.c.bf16 %v1205_v17, %v1204_v23  ;;  %v1890_v22 = vpop.permute.xlu1 %1889  ;;  %v5811_v53 = vmul.f32 %v5791_v31, %v5799_v42  ;;  %v1063_v23 = vperm.slane %v4952_v20, %v4845_v49  ;;  %v5816_v17 = vunpack.c.l.bf16 %v2799_v40  ;;  %v2519_v20 = vld [vmem:[#allocation2 + $0x19] sm:$0xff] }
 0x14d   : > { %7433 = vst [vmem:[#allocation92_spill] sm:$0xff] %v5797_v9  ;;  %v5802_v19 = vpop.f32.mrf.mxu1  ;;  %v1881_v9 = vpop.permute.xlu0 %1880  ;;  %v1895_v12 = vperm.slane %v1890_v22, %v4845_v49  ;;  %v2312_v56 = vmul.f32 %v5539_v55, %v5613_v5  ;;  %v1859_v0 = vperm.slane %v5771_v62, %v4845_v49 }
 0x14e   : > { %693 = vst.msk [vmem:[#allocation2 + $0xc9] sm:$0xff] %vm631_vm1, %v622_v3  ;;  %v1585_v44 = vld [vmem:[#allocation2 + $0xba] sm:$0xff]  ;;  %v1886_v3 = vperm.slane %v1881_v9, %v4845_v49  ;;  %v1054_v9 = vperm.slane %v4922_v15, %v4845_v49  ;;  %v5833_v31 = vunpack.c.l.bf16 %v1063_v23  ;;  %v1872_v23 = vpop.permute.xlu2 %1871 }
 0x14f   : > { %7435 = vst [vmem:[#allocation94_spill] sm:$0xff] %v5811_v53  ;;  %4450 = vmatmul.msk.bf16.gmra.mxu2 %vm631_vm1, %v1225_v59  ;;  %v1617_v18 = vpack.c.bf16 %v1585_v44, %v1585_v44  ;;  %v5827_v59 = vunpack.c.l.bf16 %v1895_v12  ;;  %v2222_v22 = vld [vmem:[#allocation2 + $0xc0] sm:$0xff]  ;;  %v2336_v55 = vpack.c.bf16 %v2313_v7, %v2312_v56  ;;  %v2518_v44 = vld [vmem:[#allocation2 + $0x11] sm:$0xff] }
 0x150   : > { %7436 = vst [vmem:[#allocation95_spill] sm:$0xff] %v5816_v17  ;;  %v5825_v46 = vpop.f32.mrf.mxu0  ;;  %v5829_v40 = vunpack.c.l.bf16 %v1886_v3  ;;  %v596_v39 = vpop.f32.mrf.mxu3  ;;  %v1616_v3 = vpack.c.bf16 %v1584_v45, %v1584_v45  ;;  %v1255_v15 = vld [vmem:[#allocation2 + $0xc1] sm:$0xff]  ;;  %v2550_v7 = vpack.c.bf16 %v2519_v20, %v2518_v44  ;;  %v5854_v45 = vunpack.c.l.bf16 %v2257_v4 }
 0x151   : > { %700 = vst.msk [vmem:[#allocation2 + $0x101] sm:$0xff] %vm631_vm1, %v629_v60  ;;  %v5840_v60 = vmul.f32 %v5816_v17, %v5827_v59  ;;  %v597_v56 = vadd.f32 %v5524_v34, %v596_v39  ;;  %v2768_v39 = vld [vmem:[#allocation2 + $0xf2] sm:$0xff] }
 0x152   : > { %7437 = vst [vmem:[#allocation96_spill] sm:$0xff] %v5825_v46  ;;  %v1497_v5 = vpop.f32.mrf.mxu2  ;;  %v5844_v12 = vmul.f32 %v5752_v1, %v5829_v40  ;;  %4481 = vmatmul.msk.bf16.gmra.mxu0 %vm631_vm1, %v2336_v55  ;;  %v1868_v1 = vperm.slane %v5773_v30, %v4845_v49  ;;  %v1936_v43 = vunpack.c.l.bf16 %v1616_v3 }
 0x153   : > { %7438 = vst [vmem:[#allocation97_spill] sm:$0xff] %v5827_v59  ;;  %v5836_v62 = vadd.f32 %v1497_v5, %v5762_v63  ;;  %v2254_v63 = vpack.c.bf16 %v2222_v22, %v2222_v22  ;;  %v1937_v5 = vunpack.c.l.bf16 %v1617_v18  ;;  %v630_v44 = vmax.f32 %v597_v56, 0.0  ;;  %v2759_v56 = vld [vmem:[#allocation2 + $0xaa] sm:$0xff] }
 0x154   : > { %7439 = vst [vmem:[#allocation98_spill] sm:$0xff] %v5829_v40  ;;  %v5858_v18 = vunpack.c.l.bf16 %v1054_v9 }
 0x155   : > { %7440 = vst [vmem:[#allocation99_spill] sm:$0xff] %v5836_v62  ;;  %v2763_v46 = vld [vmem:[#allocation2 + $0xca] sm:$0xff]  ;;  %v5848_v62 = vunpack.c.l.bf16 %v1859_v0  ;;  %v1586_v17 = vld [vmem:[#allocation2 + $0xc2] sm:$0xff]  ;;  %v5850_v42 = vpop.f32.mrf.mxu1  ;;  %v1877_v0 = vperm.slane %v1872_v23, %v4845_v49  ;;  %v5869_v4 = vunpack.c.l.bf16 %v2254_v63 }
 0x156   : > { %7441 = vst [vmem:[#allocation100_spill] sm:$0xff] %v5840_v60  ;;  %v1256_v14 = vld [vmem:[#allocation2 + $0xc9] sm:$0xff]  ;;  %v2795_v55 = vpack.c.bf16 %v2763_v46, %v2763_v46  ;;  %v1618_v59 = vpack.c.bf16 %v1586_v17, %v1586_v17  ;;  %v5873_v17 = vunpack.c.l.bf16 %v1868_v1 }
 0x157   : > { %7442 = vst [vmem:[#allocation101_spill] sm:$0xff] %v5844_v12  ;;  %v5856_v20 = vpack.c.bf16 %v1256_v14, %v1255_v15  ;;  %v2223_v34 = vld [vmem:[#allocation2 + $0xc8] sm:$0xff]  ;;  %v2224_v22 = vld [vmem:[#allocation2 + $0xd0] sm:$0xff]  ;;  %v5884_v15 = vmul.f32 %v5723_v33, %v1937_v5 }
 0x158   : > { %v2255_v40 = vpack.c.bf16 %v2223_v34, %v2223_v34  ;;  %v2256_v58 = vpack.c.bf16 %v2224_v22, %v2224_v22  ;;  %v5861_v37 = vunpack.c.l.bf16 %v2795_v55  ;;  %v5863_v30 = vunpack.c.l.bf16 %v1618_v59  ;;  %4490 = vmatmul.msk.bf16.vlgmr.msrb.gmra.mxu1 %vm631_vm1, %v2550_v7  ;;  %v2769_v14 = vld [vmem:[#allocation2 + $0xfa] sm:$0xff]  ;;  %701 = vst.msk [vmem:[#allocation2 + $0x109] sm:$0xff] %vm631_vm1, %v630_v44  ;;  %v5871_v46 = vpop.f32.mrf.mxu0  ;;  %v2760_v55 = vld [vmem:[#allocation2 + $0xb2] sm:$0xff]  ;;  %v3079_v35 = vld [vmem:[#allocation2 + $0xc8] sm:$0xff] }
 0x159   : > { %4435 = vmatmul.msk.bf16.vlgmr.msrb.gmra.mxu3 %vm631_vm1, %v5856_v20  ;;  %7445 = vst [vmem:[#allocation104_spill] sm:$0xff] %v5871_v46  ;;  %v5881_v59 = vmul.f32 %v5854_v45, %v5833_v31  ;;  %v2801_v63 = vpack.c.bf16 %v2769_v14, %v2769_v14  ;;  %v2761_v44 = vld [vmem:[#allocation2 + $0xba] sm:$0xff]  ;;  %v5902_v34 = vmul.f32 %v5676_v27, %v1936_v43  ;;  %v5904_v22 = vunpack.c.l.bf16 %v1877_v0  ;;  %v3080_v53 = vld [vmem:[#allocation2 + $0xd0] sm:$0xff] }
 0x15a   : > { %7443 = vst [vmem:[#allocation102_spill] sm:$0xff] %v5861_v37  ;;  %v5875_v9 = vunpack.c.l.bf16 %v2255_v40  ;;  %v5877_v3 = vunpack.c.l.bf16 %v2256_v58  ;;  %v5888_v7 = vmul.f32 %v5861_v37, %v5848_v62  ;;  %v5892_v23 = vmul.f32 %v5750_v8, %v5863_v30  ;;  %v1499_v1 = vpop.f32.mrf.mxu2  ;;  %v1899_v8 = vpop.permute.xlu2 %1898 }
 0x15b   : > { %7444 = vst [vmem:[#allocation103_spill] sm:$0xff] %v5863_v30  ;;  %v2800_v40 = vpack.c.bf16 %v2768_v39, %v2768_v39  ;;  %v5895_v58 = vadd.f32 %v1499_v1, %v5802_v19  ;;  %v7450_v46 = vmov 0.0   ;;  %v5909_v39 = vmul.f32 %v5869_v4, %v5858_v18 }
 0x15c   : > { %7446 = vst [vmem:[#allocation105_spill] sm:$0xff] %v5884_v15  ;;  %v5899_v5 = vmul.f32 %v5877_v3, %v5858_v18  ;;  %v5913_v19 = vmul.f32 %v5875_v9, %v5833_v31  ;;  %v1787_v14 = vperm.slane %v5560_v47, %v4845_v49  ;;  %v2315_v43 = vmul.f32 %v5604_v41, %v5704_v16 }
 0x15d   : > { %7447 = vst [vmem:[#allocation106_spill] sm:$0xff] %v5892_v23  ;;  %v1364_v1 = vpop.f32.mrf.mxu1  ;;  %v2792_v30 = vpack.c.bf16 %v2760_v55, %v2760_v55  ;;  %v2793_v37 = vpack.c.bf16 %v2761_v44, %v2761_v44  ;;  %v7451_v47 = vpack.c.bf16 %v5072_v61, %v5068_v57  ;;  %v5929_v16 = vunpack.c.l.bf16 %v2801_v63 }
 0x15e   : > { %7448 = vst [vmem:[#allocation107_spill] sm:$0xff] %v5895_v58  ;;  %v2791_v58 = vpack.c.bf16 %v2759_v56, %v2759_v56  ;;  %v5931_v41 = vunpack.c.l.bf16 %v2800_v40  ;;  %v1904_v0 = vperm.slane %v1899_v8, %v4845_v49  ;;  %v5937_v55 = vmul.f32 %v5685_v32, %v5873_v17 }
 0x15f   : > { %7449 = vst [vmem:[#allocation108_spill] sm:$0xff] %v5902_v34  ;;  %4507 = vmatmul.msk.bf16.vlgmr.msrb.gmra.mxu2 %vm631_vm1, %v7451_v47  ;;  %v5941_v44 = vmul.f32 %v5725_v52, %v5904_v22  ;;  %v2314_v57 = vmul.f32 %v5599_v13, %v5697_v6  ;;  %v5955_v27 = vunpack.c.l.bf16 %v2792_v30  ;;  %v5957_v34 = vunpack.c.l.bf16 %v2793_v37  ;;  %v1258_v13 = vld [vmem:[#allocation2 + $0xd9] sm:$0xff]  ;;  %v3618_v37 = vld [vmem:[#allocation2 + $0xc2] sm:$0xff]  ;;  %v3619_v30 = vld [vmem:[#allocation2 + $0xca] sm:$0xff] }
 0x160   : > { %669 = vst.msk [vmem:[#allocation2 + $0x120] sm:$0x3] %vm668_vm3, %v7450_v46  ;;  %v1908_v46 = vpop.permute.xlu0 %1907  ;;  %v5945_v61 = vpop.f32.mrf.mxu0  ;;  %v5949_v40 = vunpack.c.l.bf16 %v1904_v0  ;;  %v5959_v15 = vunpack.c.l.bf16 %v1787_v14  ;;  %v2521_v0 = vld [vmem:[#allocation2 + $0x29] sm:$0xff]  ;;  %v3651_v12 = vpack.c.bf16 %v3619_v30, %v3619_v30 }
 0x161   : > { %v1913_v56 = vperm.slane %v1908_v46, %v4845_v49  ;;  %7452 = vst [vmem:[#allocation109_spill] sm:$0xff] %v5937_v55  ;;  %v5951_v46 = vunpack.c.l.bf16 %v2791_v58  ;;  %v2337_v33 = vpack.c.bf16 %v2315_v43, %v2314_v57  ;;  %v2520_v43 = vld [vmem:[#allocation2 + $0x21] sm:$0xff]  ;;  %v5991_v23 = vmul.f32 %v5957_v34, %v5648_v11 }
 0x162   : > { %7453 = vst [vmem:[#allocation110_spill] sm:$0xff] %v5941_v44  ;;  %v1502_v47 = vpop.f32.mrf.mxu2  ;;  %v5970_v8 = vmul.f32 %v5931_v41, %v5949_v40  ;;  %v3650_v57 = vpack.c.bf16 %v3618_v37, %v3618_v37  ;;  %v3683_v55 = vunpack.c.l.bf16 %v3651_v12  ;;  %v3112_v12 = vpack.c.bf16 %v3080_v53, %v3080_v53 }
 0x163   : > { %7454 = vst [vmem:[#allocation111_spill] sm:$0xff] %v5945_v61  ;;  %v5947_v63 = vunpack.c.l.bf16 %v1913_v56  ;;  %v5962_v6 = vadd.f32 %v1502_v47, %v5850_v42  ;;  %v1257_v56 = vld [vmem:[#allocation2 + $0xd1] sm:$0xff]  ;;  %4482 = vmatmul.msk.bf16.gmra.mxu0 %vm631_vm1, %v2337_v33  ;;  %v5979_v47 = vmul.f32 %v5951_v46, %v5959_v15  ;;  %v5987_v33 = vmul.f32 %v5955_v27, %v5635_v50 }
 0x164   : > { %v5981_v61 = vpack.c.bf16 %v1258_v13, %v1257_v56  ;;  %7458 = vst [vmem:[#allocation115_spill] sm:$0xff] %v5991_v23  ;;  %v3078_v13 = vld [vmem:[#allocation2 + $0xc0] sm:$0xff]  ;;  %v6011_v28 = vmul.f32 %v3683_v55, %v5760_v29  ;;  %v3623_v23 = vld [vmem:[#allocation2 + $0xea] sm:$0xff] }
 0x165   : > { %7455 = vst [vmem:[#allocation112_spill] sm:$0xff] %v5962_v6  ;;  %v5966_v58 = vmul.f32 %v5929_v16, %v5947_v63  ;;  %v1367_v14 = vpop.f32.mrf.mxu1  ;;  %v5983_v6 = vpack.c.bf16 %v2521_v0, %v2520_v43  ;;  %v3682_v43 = vunpack.c.l.bf16 %v3650_v57  ;;  %v3110_v37 = vpack.c.bf16 %v3078_v13, %v3078_v13 }
 0x166   : > { %7456 = vst [vmem:[#allocation113_spill] sm:$0xff] %v5979_v47  ;;  %v3081_v47 = vld [vmem:[#allocation2 + $0xd8] sm:$0xff]  ;;  %v7463_v13 = vpack.c.bf16 %v5149_v54, %v5140_v2 }
 0x167   : > { %7457 = vst [vmem:[#allocation114_spill] sm:$0xff] %v5987_v33  ;;  %v6008_v60 = vmul.f32 %v3682_v43, %v5775_v36  ;;  %v3142_v57 = vunpack.c.l.bf16 %v3110_v37  ;;  %v3144_v43 = vunpack.c.l.bf16 %v3112_v12  ;;  %v2316_v33 = vmul.f32 %v5690_v48, %v5769_v10  ;;  %v1260_v12 = vld [vmem:[#allocation2 + $0xe9] sm:$0xff] }
 0x168   : > { %4491 = vmatmul.msk.bf16.gmra.mxu1 %vm631_vm1, %v5983_v6  ;;  %v6003_v0 = vpop.f32.mrf.mxu0  ;;  %7462 = vst [vmem:[#allocation119_spill] sm:$0xff] %v6011_v28 }
 0x169   : > { %4436 = vmatmul.msk.bf16.gmra.mxu3 %vm631_vm1, %v5981_v61  ;;  %7459 = vst [vmem:[#allocation116_spill] sm:$0xff] %v6003_v0  ;;  %v3111_v0 = vpack.c.bf16 %v3079_v35, %v3079_v35  ;;  %v3655_v35 = vpack.c.bf16 %v3623_v23, %v3623_v23  ;;  %v6026_v53 = vmul.f32 %v3142_v57, %v5690_v48  ;;  %v1259_v23 = vld [vmem:[#allocation2 + $0xe1] sm:$0xff]  ;;  %v2523_v48 = vld [vmem:[#allocation2 + $0x39] sm:$0xff] }
 0x16a   : > { %v1504_v42 = vpop.f32.mrf.mxu2  ;;  %7461 = vst [vmem:[#allocation118_spill] sm:$0xff] %v6008_v60  ;;  %v6032_v2 = vmul.f32 %v3144_v43, %v5754_v38 }
 0x16b   : > { %v6005_v30 = vadd.f32 %v1504_v42, %v1364_v1  ;;  %v2317_v1 = vmul.f32 %v5692_v21, %v5780_v51  ;;  %v3113_v42 = vpack.c.bf16 %v3081_v47, %v3081_v47  ;;  %v3143_v55 = vunpack.c.l.bf16 %v3111_v0  ;;  %7465 = vst [vmem:[#allocation121_spill] sm:$0xff] %v6026_v53 }
 0x16c   : > { %7467 = vst [vmem:[#allocation123_spill] sm:$0xff] %v6032_v2  ;;  %v3687_v57 = vunpack.c.l.bf16 %v3655_v35 }
 0x16d   : > { %7460 = vst [vmem:[#allocation117_spill] sm:$0xff] %v6005_v30  ;;  %v1369_v44 = vpop.f32.mrf.mxu1  ;;  %v3145_v30 = vunpack.c.l.bf16 %v3113_v42  ;;  %v6029_v51 = vmul.f32 %v3143_v55, %v5692_v21  ;;  %v2338_v47 = vpack.c.bf16 %v2317_v1, %v2316_v33  ;;  %v3082_v1 = vld [vmem:[#allocation2 + $0xe0] sm:$0xff]  ;;  %v3083_v42 = vld [vmem:[#allocation2 + $0xe8] sm:$0xff]  ;;  %v2522_v55 = vld [vmem:[#allocation2 + $0x31] sm:$0xff]  ;;  %v2319_v33 = vmul.f32 %v5875_v9, %v5756_v24 }
 0x16e   : > { %v3115_v43 = vpack.c.bf16 %v3083_v42, %v3083_v42  ;;  %v6051_v35 = vpack.c.bf16 %v2523_v48, %v2522_v55  ;;  %v7473_v21 = vld [vmem:[#allocation24_spill] sm:$0xff] }
 0x16f   : > { %4508 = vmatmul.msk.bf16.gmra.mxu2 %vm631_vm1, %v7463_v13  ;;  %7466 = vst [vmem:[#allocation122_spill] sm:$0xff] %v6029_v51  ;;  %v6037_v10 = vmul.f32 %v3145_v30, %v5756_v24  ;;  %v6047_v30 = vmul.f32 %v3687_v57, %v5848_v62  ;;  %v4455_v57 = vld [vmem:[%s7220_s3 + $0x4] sm:$0x3] }
 0x170   : > { %v6023_v56 = vpop.f32.mrf.mxu0  ;;  %v3147_v0 = vunpack.c.l.bf16 %v3115_v43 }
 0x171   : > { %7464 = vst [vmem:[#allocation120_spill] sm:$0xff] %v6023_v56 }
 0x172   : > { %v1507_v54 = vpop.f32.mrf.mxu2  ;;  %7468 = vst [vmem:[#allocation124_spill] sm:$0xff] %v6037_v10  ;;  %v6069_v48 = vmul.f32 %v3147_v0, %v5833_v31  ;;  %v2318_v31 = vmul.f32 %v5869_v4, %v5754_v38  ;;  %v3629_v0 = vld [vmem:[#allocation2 + $0x11a] sm:$0xff] }
 0x173   : > { %v6039_v37 = vadd.f32 %v1507_v54, %v1367_v14  ;;  %4483 = vmatmul.msk.bf16.gmra.mxu0 %vm631_vm1, %v2338_v47  ;;  %7469 = vst [vmem:[#allocation125_spill] sm:$0xff] %v6047_v30  ;;  %v3114_v14 = vpack.c.bf16 %v3082_v1, %v3082_v1  ;;  %v6049_v54 = vpack.c.bf16 %v1260_v12, %v1259_v23  ;;  %v2077_v23 = vsel %vm1329_vm2, %v4455_v57, 0  ;;  %v2531_v30 = vld [vmem:[#allocation2 + $0x79] sm:$0xff] }
 0x174   : > { %7472 = vst [vmem:[#allocation128_spill] sm:$0xff] %v6069_v48  ;;  %2086 = vmatpush.bf16.msrb.mxu3 %v2077_v23  ;;  %v7474_v57 = vpack.c.bf16 %v5226_v26, %v7473_v21  ;;  %v2339_v23 = vpack.c.bf16 %v2319_v33, %v2318_v31  ;;  %v2525_v48 = vld [vmem:[#allocation2 + $0x49] sm:$0xff]  ;;  %v3661_v24 = vpack.c.bf16 %v3629_v0, %v3629_v0  ;;  %v2524_v21 = vld [vmem:[#allocation2 + $0x41] sm:$0xff] }
 0x175   : > { %v1372_v13 = vpop.f32.mrf.mxu1  ;;  %v3146_v47 = vunpack.c.l.bf16 %v3114_v14  ;;  %v1261_v14 = vld [vmem:[#allocation2 + $0xf1] sm:$0xff]  ;;  %v6090_v38 = vpack.c.bf16 %v2525_v48, %v2524_v21 }
 0x176   : > { %v3693_v4 = vunpack.c.l.bf16 %v3661_v24  ;;  %v3627_v0 = vld [vmem:[#allocation2 + $0x10a] sm:$0xff] }
 0x177   : > { %v6066_v12 = vmul.f32 %v3146_v47, %v5858_v18  ;;  %v7479_v24 = vld [vmem:[#allocation32_spill] sm:$0xff] }
 0x178   : > { %4492 = vmatmul.msk.bf16.gmra.mxu1 %vm631_vm1, %v6051_v35  ;;  %v6062_v1 = vpop.f32.mrf.mxu0  ;;  %v6101_v48 = vmul.f32 %v3693_v4, %v5947_v63 }
 0x179   : > { %4437 = vmatmul.msk.bf16.gmra.mxu3 %vm631_vm1, %v6049_v54  ;;  %7470 = vst [vmem:[#allocation126_spill] sm:$0xff] %v6062_v1 }
 0x17a   : > { %7471 = vst [vmem:[#allocation127_spill] sm:$0xff] %v6066_v12  ;;  %v1509_v42 = vpop.f32.mrf.mxu2  ;;  %v1262_v12 = vld [vmem:[#allocation2 + $0xf9] sm:$0xff] }
 0x17b   : > { %v6071_v55 = vadd.f32 %v1509_v42, %v1369_v44  ;;  %v3628_v44 = vld [vmem:[#allocation2 + $0x112] sm:$0xff]  ;;  %7477 = vst [vmem:[#allocation130_spill] sm:$0xff] %v6101_v48 }
 0x17c   : > { %v3660_v26 = vpack.c.bf16 %v3628_v44, %v3628_v44  ;;  %v2229_v48 = vld [vmem:[#allocation2 + $0xf8] sm:$0xff] }
 0x17d   : > { %v1374_v43 = vpop.f32.mrf.mxu1 }
 0x17e   : > { %v3692_v33 = vunpack.c.l.bf16 %v3660_v26  ;;  %v7480_v26 = vld [vmem:[#allocation31_spill] sm:$0xff] }
 0x17f   : > { %4509 = vmatmul.msk.bf16.gmra.mxu2 %vm631_vm1, %v7474_v57  ;;  %v6088_v57 = vpack.c.bf16 %v1262_v12, %v1261_v14  ;;  %v3659_v12 = vpack.c.bf16 %v3627_v0, %v3627_v0 }
 0x180   : > { %v6083_v18 = vpop.f32.mrf.mxu0  ;;  %v6104_v14 = vmul.f32 %v3692_v33, %v5949_v40  ;;  %v7488_v33 = vld [vmem:[#allocation5_spill] sm:$0xff] }
 0x181   : > { %7475 = vst [vmem:[#allocation24_spill] sm:$0xff] %v6083_v18  ;;  %v3691_v10 = vunpack.c.l.bf16 %v3659_v12  ;;  %v7481_v18 = vpack.c.bf16 %v7479_v24, %v7480_v26  ;;  %v2527_v12 = vld [vmem:[#allocation2 + $0x59] sm:$0xff]  ;;  %v2526_v26 = vld [vmem:[#allocation2 + $0x51] sm:$0xff]  ;;  %v1072_v56 = vperm.slane %v7488_v33, %v4845_v49 }
 0x182   : > { %v1512_v47 = vpop.f32.mrf.mxu2  ;;  %7478 = vst [vmem:[#allocation131_spill] sm:$0xff] %v6104_v14  ;;  %v2226_v24 = vld [vmem:[#allocation2 + $0xe0] sm:$0xff]  ;;  %v6128_v53 = vpack.c.bf16 %v2527_v12, %v2526_v26 }
 0x183   : > { %v6085_v42 = vadd.f32 %v1512_v47, %v1372_v13  ;;  %4484 = vmatmul.msk.bf16.gmra.mxu0 %vm631_vm1, %v2339_v23  ;;  %v3626_v47 = vld [vmem:[#allocation2 + $0x102] sm:$0xff]  ;;  %v2258_v4 = vpack.c.bf16 %v2226_v24, %v2226_v24  ;;  %v6142_v24 = vunpack.c.l.bf16 %v1072_v56 }
 0x184   : > { %v3658_v23 = vpack.c.bf16 %v3626_v47, %v3626_v47 }
 0x185   : > { %v1377_v9 = vpop.f32.mrf.mxu1  ;;  %v1208_v56 = vmul.f32 %v5877_v3, %v6142_v24  ;;  %v7498_v3 = vld [vmem:[#allocation7_spill] sm:$0xff] }
 0x186   : > { %v3690_v2 = vunpack.c.l.bf16 %v3658_v23 }
 0x188   : > { %4493 = vmatmul.msk.bf16.gmra.mxu1 %vm631_vm1, %v6090_v38  ;;  %v6096_v13 = vpop.f32.mrf.mxu0 }
 0x189   : > { %4438 = vmatmul.msk.bf16.gmra.mxu3 %vm631_vm1, %v6088_v57  ;;  %7476 = vst [vmem:[#allocation129_spill] sm:$0xff] %v6096_v13  ;;  %v7482_v13 = vld [vmem:[#allocation98_spill] sm:$0xff] }
 0x18a   : > { %v1514_v31 = vpop.f32.mrf.mxu2  ;;  %v6111_v1 = vmul.f32 %v3690_v2, %v7482_v13  ;;  %v7487_v2 = vpack.c.bf16 %v5881_v59, %v5899_v5  ;;  %v2290_v5 = vunpack.c.l.bf16 %v2258_v4 }
 0x18b   : > { %v6098_v44 = vadd.f32 %v1514_v31, %v1374_v43  ;;  %v7484_v43 = vld [vmem:[#allocation97_spill] sm:$0xff] }
 0x18c   : > { %7483 = vst [vmem:[#allocation32_spill] sm:$0xff] %v6111_v1  ;;  %v6114_v31 = vmul.f32 %v3691_v10, %v7484_v43 }
 0x18d   : > { %v1379_v21 = vpop.f32.mrf.mxu1  ;;  %7491 = vst [vmem:[#allocation97_spill] sm:$0xff] %v6142_v24 }
 0x18e   : > { %7485 = vst [vmem:[#allocation31_spill] sm:$0xff] %v6114_v31  ;;  %v2528_v31 = vld [vmem:[#allocation2 + $0x61] sm:$0xff] }
 0x18f   : > { %4510 = vmatmul.msk.bf16.gmra.mxu2 %vm631_vm1, %v7481_v18  ;;  %v2227_v18 = vld [vmem:[#allocation2 + $0xe8] sm:$0xff] }
 0x190   : > { %v6120_v0 = vpop.f32.mrf.mxu0  ;;  %v2259_v51 = vpack.c.bf16 %v2227_v18, %v2227_v18 }
 0x191   : > { %7486 = vst [vmem:[#allocation98_spill] sm:$0xff] %v6120_v0  ;;  %v7490_v0 = vpack.c.bf16 %v5913_v19, %v5909_v39  ;;  %v7494_v19 = vld [vmem:[#allocation40_spill] sm:$0xff] }
 0x192   : > { %v1517_v47 = vpop.f32.mrf.mxu2  ;;  %v2291_v12 = vunpack.c.l.bf16 %v2259_v51 }
 0x193   : > { %v6122_v23 = vadd.f32 %v1517_v47, %v1377_v9  ;;  %4485 = vmatmul.msk.bf16.gmra.mxu0 %vm631_vm1, %v7487_v2  ;;  %v7489_v9 = vld [vmem:[#allocation6_spill] sm:$0xff] }
 0x194   : > { %v1081_v47 = vperm.slane %v7489_v9, %v4845_v49  ;;  %v2322_v9 = vmul.f32 %v2290_v5, %v6142_v24  ;;  %v1099_v24 = vperm.slane %v7498_v3, %v4845_v49  ;;  %v7503_v3 = vld [vmem:[#allocation47_spill] sm:$0xff] }
 0x195   : > { %v1382_v10 = vpop.f32.mrf.mxu1 }
 0x196   : > { %v6144_v18 = vunpack.c.l.bf16 %v1081_v47 }
 0x198   : > { %4494 = vmatmul.msk.bf16.gmra.mxu1 %vm631_vm1, %v6128_v53  ;;  %7492 = vst [vmem:[#allocation5_spill] sm:$0xff] %v6144_v18  ;;  %v6146_v33 = vpop.f32.mrf.mxu0  ;;  %v2323_v39 = vmul.f32 %v2291_v12, %v6144_v18 }
 0x199   : > { %4451 = vmatmul.msk.bf16.vlgmr.msra.gmra.mxu3 %vm631_vm1, %v7490_v0  ;;  %7493 = vst [vmem:[#allocation6_spill] sm:$0xff] %v6146_v33  ;;  %v7495_v0 = vld [vmem:[#allocation39_spill] sm:$0xff]  ;;  %v2228_v33 = vld [vmem:[#allocation2 + $0xf0] sm:$0xff] }
 0x19a   : > { %v1519_v59 = vpop.f32.mrf.mxu2  ;;  %v7496_v14 = vpack.c.bf16 %v7494_v19, %v7495_v0  ;;  %v2341_v51 = vpack.c.bf16 %v2323_v39, %v2322_v9  ;;  %v2260_v9 = vpack.c.bf16 %v2228_v33, %v2228_v33  ;;  %v2261_v39 = vpack.c.bf16 %v2229_v48, %v2229_v48 }
 0x19b   : > { %v6140_v2 = vadd.f32 %v1519_v59, %v1379_v21  ;;  %v1209_v21 = vmul.f32 %v5854_v45, %v6144_v18  ;;  %v2529_v59 = vld [vmem:[#allocation2 + $0x69] sm:$0xff] }
 0x19c   : > { %v6163_v0 = vpack.c.bf16 %v2529_v59, %v2528_v31  ;;  %v7499_v45 = vld [vmem:[#allocation8_spill] sm:$0xff]  ;;  %v2293_v18 = vunpack.c.l.bf16 %v2261_v39  ;;  %v6174_v31 = vunpack.c.l.bf16 %v1099_v24 }
 0x19d   : > { %v1384_v26 = vpop.f32.mrf.mxu1  ;;  %v7502_v59 = vld [vmem:[#allocation48_spill] sm:$0xff] }
 0x19e   : > { %7500 = vst [vmem:[#allocation39_spill] sm:$0xff] %v6174_v31 }
 0x19f   : > { %4511 = vmatmul.msk.bf16.gmra.mxu2 %vm631_vm1, %v7496_v14  ;;  %v1227_v14 = vpack.c.bf16 %v1209_v21, %v1208_v56  ;;  %v2325_v21 = vmul.f32 %v2293_v18, %v6174_v31 }
 0x1a0   : > { %v6161_v19 = vpop.f32.mrf.mxu0 }
 0x1a1   : > { %7497 = vst [vmem:[#allocation40_spill] sm:$0xff] %v6161_v19 }
 0x1a2   : > { %v1522_v4 = vpop.f32.mrf.mxu2 }
 0x1a3   : > { %v6158_v47 = vadd.f32 %v1522_v4, %v1382_v10  ;;  %4486 = vmatmul.msk.bf16.gmra.mxu0 %vm631_vm1, %v2341_v51  ;;  %v1090_v10 = vperm.slane %v7499_v45, %v4845_v49  ;;  %v2292_v51 = vunpack.c.l.bf16 %v2260_v9 }
 0x1a5   : > { %v1387_v1 = vpop.f32.mrf.mxu1  ;;  %v6176_v33 = vunpack.c.l.bf16 %v1090_v10  ;;  %v1211_v10 = vmul.f32 %v2291_v12, %v6174_v31  ;;  %v7512_v31 = vld [vmem:[#allocation56_spill] sm:$0xff] }
 0x1a7   : > { %7501 = vst [vmem:[#allocation7_spill] sm:$0xff] %v6176_v33  ;;  %v2324_v56 = vmul.f32 %v2292_v51, %v6176_v33  ;;  %v1210_v39 = vmul.f32 %v2290_v5, %v6176_v33  ;;  %v7506_v5 = vld [vmem:[#allocation10_spill] sm:$0xff] }
 0x1a8   : > { %4495 = vmatmul.msk.bf16.gmra.mxu1 %vm631_vm1, %v6163_v0  ;;  %v6184_v45 = vpop.f32.mrf.mxu0  ;;  %v1108_v12 = vperm.slane %v7506_v5, %v4845_v49 }
 0x1a9   : > { %4452 = vmatmul.msk.bf16.gmra.mxu3 %vm631_vm1, %v1227_v14  ;;  %v7504_v14 = vpack.c.bf16 %v7502_v59, %v7503_v3  ;;  %7505 = vst [vmem:[#allocation8_spill] sm:$0xff] %v6184_v45  ;;  %v2342_v9 = vpack.c.bf16 %v2325_v21, %v2324_v56  ;;  %v2230_v59 = vld [vmem:[#allocation2 + $0x100] sm:$0xff]  ;;  %v2231_v3 = vld [vmem:[#allocation2 + $0x108] sm:$0xff]  ;;  %v2530_v45 = vld [vmem:[#allocation2 + $0x71] sm:$0xff]  ;;  %v1228_v60 = vpack.c.bf16 %v1211_v10, %v1210_v39 }
 0x1aa   : > { %v1524_v4 = vpop.f32.mrf.mxu2  ;;  %v6195_v28 = vpack.c.bf16 %v2531_v30, %v2530_v45  ;;  %v2262_v56 = vpack.c.bf16 %v2230_v59, %v2230_v59  ;;  %v2263_v21 = vpack.c.bf16 %v2231_v3, %v2231_v3 }
 0x1ab   : > { %v6172_v19 = vadd.f32 %v1524_v4, %v1384_v26  ;;  %v4540_v26 = vld [vmem:[%s7220_s3 + $0xe] sm:$0x3] }
 0x1ac   : > { %v3475_v4 = vsel %vm1329_vm2, %v4540_v26, 0  ;;  %v7507_v26 = vld [vmem:[#allocation9_spill] sm:$0xff]  ;;  %v2294_v39 = vunpack.c.l.bf16 %v2262_v56  ;;  %v2295_v10 = vunpack.c.l.bf16 %v2263_v21 }
 0x1ad   : > { %v1389_v48 = vpop.f32.mrf.mxu1  ;;  %3484 = vmatpush.bf16.msra.mxu0 %v3475_v4 }
 0x1af   : > { %4512 = vmatmul.msk.bf16.gmra.mxu2 %vm631_vm1, %v7504_v14 }
 0x1b0   : > { %v6208_v45 = vpop.f32.mrf.mxu0 }
 0x1b1   : > { %7508 = vst [vmem:[#allocation48_spill] sm:$0xff] %v6208_v45 }
 0x1b2   : > { %v1527_v24 = vpop.f32.mrf.mxu2 }
 0x1b3   : > { %v6192_v25 = vadd.f32 %v1527_v24, %v1387_v1  ;;  %4487 = vmatmul.msk.bf16.gmra.mxu0 %vm631_vm1, %v2342_v9  ;;  %v1117_v1 = vperm.slane %v7507_v26, %v4845_v49  ;;  %v4523_v24 = vld [vmem:[%s7220_s3 + $0xc] sm:$0x3]  ;;  %v6212_v49 = vunpack.c.l.bf16 %v1108_v12  ;;  %v7511_v26 = vld [vmem:[#allocation57_spill] sm:$0xff]  ;;  %v4557_v12 = vld [vmem:[%s7220_s3 + $0x10] sm:$0x3] }
 0x1b4   : > { %v3253_v30 = vsel %vm1329_vm2, %v4523_v24, 0  ;;  %v7513_v24 = vpack.c.bf16 %v7511_v26, %v7512_v31  ;;  %v7516_v26 = vld [vmem:[#allocation66_spill] sm:$0xff] }
 0x1b5   : > { %v1392_v14 = vpop.f32.mrf.mxu1  ;;  %3262 = vmatpush.bf16.msra.mxu3 %v3253_v30  ;;  %7509 = vst [vmem:[#allocation47_spill] sm:$0xff] %v6212_v49  ;;  %v2326_v3 = vmul.f32 %v2294_v39, %v6212_v49  ;;  %v1212_v21 = vmul.f32 %v2292_v51, %v6212_v49  ;;  %v2533_v30 = vld [vmem:[#allocation2 + $0x89] sm:$0xff] }
 0x1b8   : > { %4496 = vmatmul.msk.bf16.gmra.mxu1 %vm631_vm1, %v6195_v28  ;;  %v6230_v39 = vpop.f32.mrf.mxu0 }
 0x1b9   : > { %4453 = vmatmul.msk.bf16.gmra.mxu3 %vm631_vm1, %v1228_v60  ;;  %v6214_v60 = vunpack.c.l.bf16 %v1117_v1  ;;  %7514 = vst [vmem:[#allocation9_spill] sm:$0xff] %v6230_v39  ;;  %v7528_v39 = vld [vmem:[#allocation14_spill] sm:$0xff] }
 0x1ba   : > { %v1529_v9 = vpop.f32.mrf.mxu2 }
 0x1bb   : > { %v6210_v4 = vadd.f32 %v1529_v9, %v1389_v48  ;;  %7510 = vst [vmem:[#allocation10_spill] sm:$0xff] %v6214_v60  ;;  %v2327_v5 = vmul.f32 %v2295_v10, %v6214_v60  ;;  %v1213_v48 = vmul.f32 %v2293_v18, %v6214_v60  ;;  %v3793_v9 = vsel %vm1329_vm2, %v4557_v12, 0  ;;  %v2532_v10 = vld [vmem:[#allocation2 + $0x81] sm:$0xff]  ;;  %v7527_v60 = vld [vmem:[#allocation13_spill] sm:$0xff] }
 0x1bc   : > { %3802 = vmatpush.bf16.msra.mxu1 %v3793_v9  ;;  %v6233_v51 = vpack.c.bf16 %v2533_v30, %v2532_v10  ;;  %v2534_v9 = vld [vmem:[#allocation2 + $0x91] sm:$0xff] }
 0x1bd   : > { %v1394_v59 = vpop.f32.mrf.mxu1  ;;  %v2343_v56 = vpack.c.bf16 %v2327_v5, %v2326_v3  ;;  %v1229_v3 = vpack.c.bf16 %v1213_v48, %v1212_v21  ;;  %v2535_v48 = vld [vmem:[#allocation2 + $0x99] sm:$0xff] }
 0x1bf   : > { %4513 = vmatmul.msk.bf16.gmra.mxu2 %vm631_vm1, %v7513_v24  ;;  %v7517_v24 = vld [vmem:[#allocation65_spill] sm:$0xff] }
 0x1c0   : > { %v6240_v5 = vpop.f32.mrf.mxu0 }
 0x1c1   : > { %7515 = vst [vmem:[#allocation57_spill] sm:$0xff] %v6240_v5 }
 0x1c2   : > { %v1532_v33 = vpop.f32.mrf.mxu2 }
 0x1c3   : > { %v6227_v1 = vadd.f32 %v1532_v33, %v1392_v14  ;;  %4488 = vmatmul.msk.bf16.gmra.mxu0 %vm631_vm1, %v2343_v56  ;;  %v7518_v56 = vpack.c.bf16 %v7516_v26, %v7517_v24 }
 0x1c5   : > { %v1397_v31 = vpop.f32.mrf.mxu1 }
 0x1c8   : > { %4497 = vmatmul.msk.bf16.gmra.mxu1 %vm631_vm1, %v6233_v51  ;;  %v6254_v10 = vpop.f32.mrf.mxu0 }
 0x1c9   : > { %4454 = vmatmul.msk.bf16.gmra.mxu3 %vm631_vm1, %v1229_v3  ;;  %7519 = vst [vmem:[#allocation56_spill] sm:$0xff] %v6254_v10  ;;  %v7520_v3 = vld [vmem:[#allocation12_spill] sm:$0xff] }
 0x1ca   : > { %v1534_v18 = vpop.f32.mrf.mxu2 }
 0x1cb   : > { %v6238_v33 = vadd.f32 %v1534_v18, %v1394_v59  ;;  %v6252_v59 = vpack.c.bf16 %v2535_v48, %v2534_v9  ;;  %v7521_v18 = vld [vmem:[#allocation11_spill] sm:$0xff] }
 0x1cc   : > { %v7522_v49 = vpack.c.bf16 %v7520_v3, %v7521_v18  ;;  %v7525_v48 = vld [vmem:[#allocation71_spill] sm:$0xff] }
 0x1cd   : > { %v1399_v14 = vpop.f32.mrf.mxu1  ;;  %v2537_v18 = vld [vmem:[#allocation2 + $0xa9] sm:$0xff] }
 0x1cf   : > { %4514 = vmatmul.msk.bf16.gmra.mxu2 %vm631_vm1, %v7518_v56 }
 0x1d0   : > { %v6271_v3 = vpop.f32.mrf.mxu0 }
 0x1d1   : > { %7526 = vst [vmem:[#allocation66_spill] sm:$0xff] %v6271_v3 }
 0x1d2   : > { %v1537_v12 = vpop.f32.mrf.mxu2 }
 0x1d3   : > { %v6246_v21 = vadd.f32 %v1537_v12, %v1397_v31  ;;  %4541 = vmatmul.msk.bf16.vlgmr.msra.gmra.mxu0 %vm631_vm1, %v5983_v6  ;;  %v7523_v31 = vld [vmem:[#allocation76_spill] sm:$0xff]  ;;  %v7524_v12 = vld [vmem:[#allocation93_spill] sm:$0xff] }
 0x1d4   : > { %v2853_v26 = vmul.f32 %v7523_v31, %v5959_v15  ;;  %v2852_v9 = vmul.f32 %v7525_v48, %v7524_v12  ;;  %v7529_v48 = vpack.c.bf16 %v7527_v60, %v7528_v39  ;;  %v2539_v39 = vld [vmem:[#allocation2 + $0xb9] sm:$0xff] }
 0x1d5   : > { %v6250_v30 = vpop.f32.mrf.mxu1 }
 0x1d6   : > { %v2876_v10 = vpack.c.bf16 %v2853_v26, %v2852_v9  ;;  %v7530_v9 = vld [vmem:[#allocation90_spill] sm:$0xff] }
 0x1d8   : > { %4498 = vmatmul.msk.bf16.gmra.mxu1 %vm631_vm1, %v6252_v59  ;;  %v6289_v3 = vpop.f32.mrf.mxu0 }
 0x1d9   : > { %4456 = vmatmul.msk.bf16.vlgmr.msrb.gmra.mxu3 %vm631_vm1, %v7522_v49  ;;  %7531 = vst [vmem:[#allocation65_spill] sm:$0xff] %v6289_v3 }
 0x1da   : > { %v1539_v24 = vpop.f32.mrf.mxu2 }
 0x1db   : > { %v6264_v6 = vadd.f32 %v1539_v24, %v1399_v14  ;;  %v2536_v14 = vld [vmem:[#allocation2 + $0xa1] sm:$0xff] }
 0x1dc   : > { %v1402_v56 = vpop.f32.mrf.mxu3  ;;  %v6277_v24 = vpack.c.bf16 %v2537_v18, %v2536_v14 }
 0x1dd   : > { %v6268_v5 = vpop.f32.mrf.mxu1 }
 0x1df   : > { %4515 = vmatmul.msk.bf16.gmra.mxu2 %vm631_vm1, %v2876_v10  ;;  %v2855_v10 = vmul.f32 %v5951_v46, %v5648_v11  ;;  %v2538_v11 = vld [vmem:[#allocation2 + $0xb1] sm:$0xff] }
 0x1e0   : > { %v6300_v46 = vpop.f32.mrf.mxu0 }
 0x1e1   : > { %7532 = vst [vmem:[#allocation12_spill] sm:$0xff] %v6300_v46 }
 0x1e3   : > { %4542 = vmatmul.msk.bf16.gmra.mxu0 %vm631_vm1, %v6051_v35  ;;  %v2854_v35 = vmul.f32 %v7530_v9, %v5635_v50  ;;  %v7533_v50 = vld [vmem:[#allocation16_spill] sm:$0xff]  ;;  %v7534_v9 = vld [vmem:[#allocation15_spill] sm:$0xff] }
 0x1e4   : > { %v1404_v49 = vpop.f32.mrf.mxu3  ;;  %v7535_v3 = vpack.c.bf16 %v7533_v50, %v7534_v9 }
 0x1e5   : > { %v6275_v31 = vpop.f32.mrf.mxu1  ;;  %v2877_v18 = vpack.c.bf16 %v2855_v10, %v2854_v35  ;;  %v2857_v10 = vmul.f32 %v5957_v34, %v5760_v29  ;;  %v7539_v29 = vld [vmem:[#allocation23_spill] sm:$0xff]  ;;  %v7540_v34 = vld [vmem:[#allocation22_spill] sm:$0xff] }
 0x1e6   : > { %v7541_v9 = vpack.c.bf16 %v7539_v29, %v7540_v34 }
 0x1e8   : > { %4499 = vmatmul.msk.bf16.gmra.mxu1 %vm631_vm1, %v6277_v24 }
 0x1e9   : > { %4457 = vmatmul.msk.bf16.gmra.mxu3 %vm631_vm1, %v7529_v48  ;;  %v6302_v48 = vpack.c.bf16 %v2539_v39, %v2538_v11  ;;  %v6319_v11 = vpop.f32.mrf.mxu0 }
 0x1ea   : > { %7537 = vst [vmem:[#allocation76_spill] sm:$0xff] %v6319_v11  ;;  %v7545_v11 = vld [vmem:[#allocation79_spill] sm:$0xff] }
 0x1ec   : > { %v1407_v26 = vpop.f32.mrf.mxu3 }
 0x1ed   : > { %v6291_v45 = vpop.f32.mrf.mxu1 }
 0x1ef   : > { %4516 = vmatmul.msk.bf16.gmra.mxu2 %vm631_vm1, %v2877_v18 }
 0x1f3   : > { %4543 = vmatmul.msk.bf16.gmra.mxu0 %vm631_vm1, %v6090_v38  ;;  %v2856_v38 = vmul.f32 %v5955_v27, %v5775_v36  ;;  %v7542_v27 = vld [vmem:[#allocation83_spill] sm:$0xff]  ;;  %v7543_v36 = vld [vmem:[#allocation102_spill] sm:$0xff] }
 0x1f4   : > { %v6294_v60 = vpop.f32.mrf.mxu3 }
 0x1f5   : > { %v6298_v14 = vpop.f32.mrf.mxu1  ;;  %v2878_v39 = vpack.c.bf16 %v2857_v10, %v2856_v38  ;;  %v2859_v10 = vmul.f32 %v7543_v36, %v7542_v27  ;;  %v6335_v38 = vpop.f32.mrf.mxu2  ;;  %v7551_v36 = vld [vmem:[#allocation29_spill] sm:$0xff] }
 0x1f8   : > { %4500 = vmatmul.msk.bf16.gmra.mxu1 %vm631_vm1, %v6302_v48 }
 0x1f9   : > { %4458 = vmatmul.msk.bf16.gmra.mxu3 %vm631_vm1, %v7535_v3 }
 0x1fc   : > { %v6312_v35 = vpop.f32.mrf.mxu3 }
 0x1fd   : > { %v6316_v18 = vpop.f32.mrf.mxu1  ;;  %v6346_v34 = vpop.f32.mrf.mxu2 }
 0x1fe   : > { %7536 = vst [vmem:[#allocation11_spill] sm:$0xff] %v6316_v18  ;;  %v6339_v18 = vpop.f32.mrf.mxu0 }
 0x1ff   : > { %4517 = vmatmul.msk.bf16.gmra.mxu2 %vm631_vm1, %v2878_v39  ;;  %v7544_v39 = vld [vmem:[#allocation103_spill] sm:$0xff]  ;;  %7546 = vst [vmem:[#allocation71_spill] sm:$0xff] %v6339_v18 }
 0x200   : > { %v2858_v46 = vmul.f32 %v7545_v11, %v7544_v39  ;;  %v7550_v11 = vld [vmem:[#allocation30_spill] sm:$0xff] }
 0x201   : > { %v7552_v39 = vpack.c.bf16 %v7550_v11, %v7551_v36 }
 0x202   : > { %v2879_v29 = vpack.c.bf16 %v2859_v10, %v2858_v46  ;;  %v2861_v46 = vmul.f32 %v5725_v52, %v5848_v62  ;;  %v7553_v10 = vld [vmem:[#allocation86_spill] sm:$0xff] }
 0x203   : > { %4544 = vmatmul.msk.bf16.gmra.mxu0 %vm631_vm1, %v6128_v53 }
 0x204   : > { %v6321_v50 = vpop.f32.mrf.mxu3 }
 0x205   : > { %v6325_v3 = vpop.f32.mrf.mxu1 }
 0x206   : > { %7538 = vst [vmem:[#allocation93_spill] sm:$0xff] %v6325_v3 }
 0x208   : > { %4501 = vmatmul.msk.bf16.gmra.mxu1 %vm631_vm1, %v5856_v20 }
 0x209   : > { %4459 = vmatmul.msk.bf16.gmra.mxu3 %vm631_vm1, %v7541_v9  ;;  %v6350_v9 = vpop.f32.mrf.mxu0 }
 0x20a   : > { %7548 = vst [vmem:[#allocation14_spill] sm:$0xff] %v6350_v9 }
 0x20c   : > { %v6341_v53 = vpop.f32.mrf.mxu3 }
 0x20d   : > { %v6343_v3 = vpop.f32.mrf.mxu1 }
 0x20e   : > { %7547 = vst [vmem:[#allocation13_spill] sm:$0xff] %v6343_v3 }
 0x20f   : > { %4518 = vmatmul.msk.bf16.gmra.mxu2 %vm631_vm1, %v2879_v29  ;;  %v2860_v29 = vmul.f32 %v5685_v32, %v7553_v10 }
 0x211   : > { %v2880_v3 = vpack.c.bf16 %v2861_v46, %v2860_v29  ;;  %v6372_v11 = vpop.f32.mrf.mxu0  ;;  %v7562_v46 = vld [vmem:[#allocation95_spill] sm:$0xff] }
 0x212   : > { %7555 = vst [vmem:[#allocation15_spill] sm:$0xff] %v6372_v11 }
 0x213   : > { %4545 = vmatmul.msk.bf16.gmra.mxu0 %vm631_vm1, %v6163_v0  ;;  %v6368_v0 = vpop.f32.mrf.mxu2 }
 0x214   : > { %v6348_v20 = vpop.f32.mrf.mxu3 }
 0x215   : > { %v6354_v27 = vpop.f32.mrf.mxu1 }
 0x216   : > { %7549 = vst [vmem:[#allocation90_spill] sm:$0xff] %v6354_v27 }
 0x218   : > { %4502 = vmatmul.msk.bf16.gmra.mxu1 %vm631_vm1, %v5981_v61 }
 0x219   : > { %4460 = vmatmul.msk.bf16.gmra.mxu3 %vm631_vm1, %v7552_v39  ;;  %v6383_v62 = vpop.f32.mrf.mxu0 }
 0x21a   : > { %7557 = vst [vmem:[#allocation22_spill] sm:$0xff] %v6383_v62 }
 0x21b   : > { %v6381_v32 = vpop.f32.mrf.mxu2 }
 0x21c   : > { %v1542_v9 = vpop.f32.mrf.mxu3 }
 0x21d   : > { %v6366_v18 = vadd.f32 %v1542_v9, %v1402_v56  ;;  %v6370_v27 = vpop.f32.mrf.mxu1  ;;  %v7558_v56 = vld [vmem:[#allocation38_spill] sm:$0xff]  ;;  %v7559_v9 = vld [vmem:[#allocation37_spill] sm:$0xff] }
 0x21e   : > { %7554 = vst [vmem:[#allocation16_spill] sm:$0xff] %v6370_v27  ;;  %v7560_v39 = vpack.c.bf16 %v7558_v56, %v7559_v9 }
 0x21f   : > { %4519 = vmatmul.msk.bf16.gmra.mxu2 %vm631_vm1, %v2880_v3 }
 0x221   : > { %v6402_v9 = vpop.f32.mrf.mxu0 }
 0x222   : > { %7564 = vst [vmem:[#allocation102_spill] sm:$0xff] %v6402_v9  ;;  %v2548_v9 = vld [vmem:[#allocation2 + $0x101] sm:$0xff] }
 0x223   : > { %4546 = vmatmul.msk.bf16.gmra.mxu0 %vm631_vm1, %v6195_v28  ;;  %v2863_v28 = vmul.f32 %v7562_v46, %v5904_v22  ;;  %v6400_v56 = vpop.f32.mrf.mxu2  ;;  %v7566_v46 = vld [vmem:[#allocation45_spill] sm:$0xff] }
 0x224   : > { %v1544_v36 = vpop.f32.mrf.mxu3 }
 0x225   : > { %v6375_v61 = vadd.f32 %v1544_v36, %v1404_v49  ;;  %v6379_v52 = vpop.f32.mrf.mxu1  ;;  %v7561_v49 = vld [vmem:[#allocation87_spill] sm:$0xff] }
 0x226   : > { %7556 = vst [vmem:[#allocation23_spill] sm:$0xff] %v6379_v52  ;;  %v2862_v3 = vmul.f32 %v7561_v49, %v5873_v17  ;;  %v7565_v49 = vld [vmem:[#allocation46_spill] sm:$0xff] }
 0x228   : > { %4503 = vmatmul.msk.bf16.gmra.mxu1 %vm631_vm1, %v6049_v54  ;;  %v2881_v36 = vpack.c.bf16 %v2863_v28, %v2862_v3  ;;  %v2865_v3 = vmul.f32 %v5929_v16, %v7484_v43  ;;  %v2864_v28 = vmul.f32 %v5931_v41, %v7482_v13  ;;  %v2549_v41 = vld [vmem:[#allocation2 + $0x109] sm:$0xff] }
 0x229   : > { %4461 = vmatmul.msk.bf16.gmra.mxu3 %vm631_vm1, %v7560_v39 }
 0x22c   : > { %v1547_v10 = vpop.f32.mrf.mxu3 }
 0x22d   : > { %v6395_v29 = vadd.f32 %v1547_v10, %v1407_v26  ;;  %v6398_v62 = vpop.f32.mrf.mxu1  ;;  %v7567_v26 = vpack.c.bf16 %v7565_v49, %v7566_v46  ;;  %v2882_v49 = vpack.c.bf16 %v2865_v3, %v2864_v28  ;;  %v2771_v46 = vld [vmem:[#allocation2 + $0x10a] sm:$0xff] }
 0x22e   : > { %7563 = vst [vmem:[#allocation83_spill] sm:$0xff] %v6398_v62 }
 0x22f   : > { %4520 = vmatmul.msk.bf16.gmra.mxu2 %vm631_vm1, %v2881_v36 }
 0x233   : > { %4547 = vmatmul.msk.bf16.gmra.mxu0 %vm631_vm1, %v6233_v51  ;;  %v6423_v51 = vpop.f32.mrf.mxu0 }
 0x234   : > { %v1549_v39 = vpop.f32.mrf.mxu3  ;;  %7569 = vst [vmem:[#allocation79_spill] sm:$0xff] %v6423_v51  ;;  %v7574_v51 = vld [vmem:[#allocation54_spill] sm:$0xff] }
 0x235   : > { %v6405_v54 = vadd.f32 %v1549_v39, %v6294_v60  ;;  %v6419_v10 = vpop.f32.mrf.mxu1  ;;  %v6421_v60 = vpop.f32.mrf.mxu2 }
 0x236   : > { %7568 = vst [vmem:[#allocation103_spill] sm:$0xff] %v6419_v10 }
 0x238   : > { %4504 = vmatmul.msk.bf16.gmra.mxu1 %vm631_vm1, %v6088_v57  ;;  %v2803_v57 = vpack.c.bf16 %v2771_v46, %v2771_v46  ;;  %v1579_v46 = vld [vmem:[#allocation2 + $0x8a] sm:$0xff] }
 0x239   : > { %4462 = vmatmul.msk.bf16.gmra.mxu3 %vm631_vm1, %v7567_v26  ;;  %v2770_v26 = vld [vmem:[#allocation2 + $0x102] sm:$0xff] }
 0x23a   : > { %v2802_v16 = vpack.c.bf16 %v2770_v26, %v2770_v26  ;;  %v7573_v26 = vld [vmem:[#allocation55_spill] sm:$0xff] }
 0x23b   : > { %v6438_v28 = vpop.f32.mrf.mxu0  ;;  %v7575_v10 = vpack.c.bf16 %v7573_v26, %v7574_v51 }
 0x23c   : > { %v1552_v36 = vpop.f32.mrf.mxu3  ;;  %7572 = vst [vmem:[#allocation86_spill] sm:$0xff] %v6438_v28 }
 0x23d   : > { %v6426_v39 = vadd.f32 %v1552_v36, %v6312_v35  ;;  %v6429_v13 = vpop.f32.mrf.mxu1  ;;  %v2835_v35 = vunpack.c.l.bf16 %v2803_v57  ;;  %v2834_v36 = vunpack.c.l.bf16 %v2802_v16  ;;  %v6436_v3 = vpop.f32.mrf.mxu2  ;;  %v1611_v16 = vpack.c.bf16 %v1579_v46, %v1579_v46 }
 0x23e   : > { %7570 = vst [vmem:[#allocation30_spill] sm:$0xff] %v6429_v13 }
 0x23f   : > { %4521 = vmatmul.msk.bf16.gmra.mxu2 %vm631_vm1, %v2882_v49  ;;  %7571 = vst [vmem:[#allocation29_spill] sm:$0xff] %v6436_v3  ;;  %v6440_v49 = vpack.c.bf16 %v2549_v41, %v2548_v9  ;;  %v2866_v57 = vmul.f32 %v2834_v36, %v5949_v40  ;;  %v1931_v28 = vunpack.c.l.bf16 %v1611_v16 }
 0x243   : > { %4548 = vmatmul.msk.bf16.gmra.mxu0 %vm631_vm1, %v6252_v59  ;;  %v2867_v59 = vmul.f32 %v2835_v35, %v5947_v63  ;;  %v6462_v35 = vpop.f32.mrf.mxu0 }
 0x244   : > { %v1554_v43 = vpop.f32.mrf.mxu3  ;;  %7578 = vst [vmem:[#allocation87_spill] sm:$0xff] %v6462_v35 }
 0x245   : > { %v6432_v11 = vadd.f32 %v1554_v43, %v6321_v50  ;;  %v1578_v50 = vld [vmem:[#allocation2 + $0x82] sm:$0xff]  ;;  %v2883_v41 = vpack.c.bf16 %v2867_v59, %v2866_v57  ;;  %v6453_v62 = vpop.f32.mrf.mxu1  ;;  %v6458_v51 = vpop.f32.mrf.mxu2  ;;  %v7581_v57 = vld [vmem:[#allocation17_spill] sm:$0xff] }
 0x246   : > { %v1610_v13 = vpack.c.bf16 %v1578_v50, %v1578_v50  ;;  %7576 = vst [vmem:[#allocation38_spill] sm:$0xff] %v6453_v62 }
 0x247   : > { %7577 = vst [vmem:[#allocation37_spill] sm:$0xff] %v6458_v51 }
 0x248   : > { %4505 = vmatmul.msk.bf16.gmra.mxu1 %vm631_vm1, %v6440_v49  ;;  %v1930_v40 = vunpack.c.l.bf16 %v1610_v13  ;;  %v7580_v13 = vld [vmem:[#allocation18_spill] sm:$0xff] }
 0x249   : > { %4463 = vmatmul.msk.bf16.gmra.mxu3 %vm631_vm1, %v7575_v10  ;;  %v4000_v10 = vld [vmem:[%s7222_s5] sm:$0x3]  ;;  %v7582_v16 = vpack.c.bf16 %v7580_v13, %v7581_v57 }
 0x24a   : > { %v4054_v63 = vsel %vm1329_vm2, %v4000_v10, 0  ;;  %v1994_v46 = vmul.f32 %v7524_v12, %v1930_v40  ;;  %v7584_v12 = vld [vmem:[#allocation50_spill] sm:$0xff]  ;;  %v7587_v10 = vld [vmem:[#allocation77_spill] sm:$0xff] }
 0x24b   : > { %4063 = vmatpush.bf16.msra.mxu2 %v4054_v63  ;;  %v7588_v63 = vld [vmem:[#allocation75_spill] sm:$0xff]  ;;  %v7594_v57 = vld [vmem:[#allocation78_spill] sm:$0xff] }
 0x24c   : > { %v1557_v43 = vpop.f32.mrf.mxu3  ;;  %v7589_v40 = vpack.c.bf16 %v7587_v10, %v7588_v63  ;;  %v7596_v10 = vld [vmem:[#allocation82_spill] sm:$0xff] }
 0x24d   : > { %v6451_v9 = vadd.f32 %v1557_v43, %v6341_v53  ;;  %v1995_v53 = vmul.f32 %v5959_v15, %v1931_v28  ;;  %v6471_v59 = vpop.f32.mrf.mxu1  ;;  %v6478_v15 = vpop.f32.mrf.mxu0 }
 0x24e   : > { %7579 = vst [vmem:[#allocation95_spill] sm:$0xff] %v6471_v59 }
 0x24f   : > { %4522 = vmatmul.msk.bf16.gmra.mxu2 %vm631_vm1, %v2883_v41  ;;  %v2018_v50 = vpack.c.bf16 %v1995_v53, %v1994_v46  ;;  %7583 = vst [vmem:[#allocation46_spill] sm:$0xff] %v6478_v15  ;;  %v7590_v53 = vld [vmem:[#allocation25_spill] sm:$0xff] }
 0x253   : > { %4549 = vmatmul.msk.bf16.gmra.mxu0 %vm631_vm1, %v6277_v24 }
 0x254   : > { %v1559_v36 = vpop.f32.mrf.mxu3 }
 0x255   : > { %v6467_v26 = vadd.f32 %v1559_v36, %v6348_v20  ;;  %v6483_v20 = vpop.f32.mrf.mxu1  ;;  %v6487_v24 = vpop.f32.mrf.mxu0  ;;  %v7591_v36 = vld [vmem:[#allocation19_spill] sm:$0xff] }
 0x256   : > { %7585 = vst [vmem:[#allocation45_spill] sm:$0xff] %v6483_v20  ;;  %v7592_v46 = vpack.c.bf16 %v7590_v53, %v7591_v36  ;;  %v7599_v36 = vld [vmem:[#allocation89_spill] sm:$0xff] }
 0x257   : > { %7586 = vst [vmem:[#allocation55_spill] sm:$0xff] %v6487_v24 }
 0x258   : > { %4558 = vmatmul.msk.bf16.vlgmr.msra.gmra.mxu1 %vm631_vm1, %v7582_v16 }
 0x259   : > { %4464 = vmatmul.msk.bf16.gmra.mxu3 %vm631_vm1, %v2018_v50 }
 0x25c   : > { %v2088_v28 = vpop.f32.mrf.mxu3 }
 0x25d   : > { %v6481_v43 = vadd.f32 %v2088_v28, %v7584_v12  ;;  %v6499_v13 = vpop.f32.mrf.mxu1  ;;  %v6504_v28 = vpop.f32.mrf.mxu0  ;;  %v3397_v12 = vld [vmem:[#allocation2 + $0xc9] sm:$0xff] }
 0x25e   : > { %7593 = vst [vmem:[#allocation54_spill] sm:$0xff] %v6499_v13 }
 0x25f   : > { %7595 = vst [vmem:[#allocation18_spill] sm:$0xff] %v6504_v28 }
 0x263   : > { %4550 = vmatmul.msk.bf16.gmra.mxu0 %vm631_vm1, %v6302_v48  ;;  %v3396_v48 = vld [vmem:[#allocation2 + $0xc1] sm:$0xff] }
 0x264   : > { %v6485_v41 = vpop.f32.mrf.mxu3  ;;  %v3418_v24 = vpack.c.bf16 %v3397_v12, %v3396_v48  ;;  %v7605_v48 = vld [vmem:[#allocation85_spill] sm:$0xff] }
 0x265   : > { %v6512_v53 = vpop.f32.mrf.mxu0 }
 0x266   : > { %7598 = vst [vmem:[#allocation50_spill] sm:$0xff] %v6512_v53 }
 0x268   : > { %4559 = vmatmul.msk.bf16.gmra.mxu1 %vm631_vm1, %v7592_v46  ;;  %v7600_v46 = vld [vmem:[#allocation91_spill] sm:$0xff] }
 0x269   : > { %4465 = vmatmul.msk.bf16.gmra.mxu3 %vm631_vm1, %v7589_v40  ;;  %v6510_v40 = vpop.f32.mrf.mxu1  ;;  %v7601_v35 = vpack.c.bf16 %v7599_v36, %v7600_v46  ;;  %v7607_v36 = vld [vmem:[#allocation92_spill] sm:$0xff] }
 0x26a   : > { %7597 = vst [vmem:[#allocation17_spill] sm:$0xff] %v6510_v40 }
 0x26c   : > { %v2093_v50 = vpop.f32.mrf.mxu3 }
 0x26d   : > { %v6502_v16 = vadd.f32 %v2093_v50, %v7594_v57  ;;  %v7602_v50 = vld [vmem:[#allocation33_spill] sm:$0xff]  ;;  %v7603_v57 = vld [vmem:[#allocation26_spill] sm:$0xff]  ;;  %v6527_v40 = vpop.f32.mrf.mxu0 }
 0x26e   : > { %v7604_v28 = vpack.c.bf16 %v7602_v50, %v7603_v57  ;;  %v7609_v50 = vld [vmem:[#allocation108_spill] sm:$0xff]  ;;  %v7611_v57 = vld [vmem:[#allocation41_spill] sm:$0xff] }
 0x271   : > { %v6525_v13 = vpop.f32.mrf.mxu1 }
 0x272   : > { %7606 = vst [vmem:[#allocation77_spill] sm:$0xff] %v6525_v13 }
 0x273   : > { %4551 = vmatmul.msk.bf16.gmra.mxu0 %vm631_vm1, %v3418_v24  ;;  %v3399_v24 = vld [vmem:[#allocation2 + $0xd9] sm:$0xff] }
 0x274   : > { %v2095_v15 = vpop.f32.mrf.mxu3 }
 0x275   : > { %v6507_v63 = vadd.f32 %v2095_v15, %v7596_v10  ;;  %v3398_v10 = vld [vmem:[#allocation2 + $0xd1] sm:$0xff] }
 0x276   : > { %v3419_v53 = vpack.c.bf16 %v3399_v24, %v3398_v10  ;;  %v6543_v10 = vpop.f32.mrf.mxu0  ;;  %v7615_v24 = vld [vmem:[#allocation99_spill] sm:$0xff] }
 0x278   : > { %4560 = vmatmul.msk.bf16.gmra.mxu1 %vm631_vm1, %v7604_v28 }
 0x279   : > { %4466 = vmatmul.msk.bf16.gmra.mxu3 %vm631_vm1, %v7601_v35  ;;  %v7608_v35 = vld [vmem:[#allocation105_spill] sm:$0xff]  ;;  %v6541_v13 = vpop.f32.mrf.mxu1 }
 0x27a   : > { %v7610_v28 = vpack.c.bf16 %v7608_v35, %v7609_v50  ;;  %7614 = vst [vmem:[#allocation75_spill] sm:$0xff] %v6541_v13  ;;  %v7617_v50 = vld [vmem:[#allocation107_spill] sm:$0xff] }
 0x27c   : > { %v2098_v12 = vpop.f32.mrf.mxu3 }
 0x27d   : > { %v6523_v15 = vadd.f32 %v2098_v12, %v7605_v48  ;;  %v7612_v12 = vld [vmem:[#allocation34_spill] sm:$0xff] }
 0x27e   : > { %v7613_v48 = vpack.c.bf16 %v7611_v57, %v7612_v12  ;;  %v6554_v57 = vpop.f32.mrf.mxu0  ;;  %v7618_v12 = vld [vmem:[#allocation106_spill] sm:$0xff] }
 0x281   : > { %v6548_v35 = vpop.f32.mrf.mxu1 }
 0x282   : > { %7616 = vst [vmem:[#allocation25_spill] sm:$0xff] %v6548_v35 }
 0x283   : > { %4552 = vmatmul.msk.bf16.gmra.mxu0 %vm631_vm1, %v3419_v53  ;;  %v3401_v53 = vld [vmem:[#allocation2 + $0xe9] sm:$0xff] }
 0x284   : > { %v2100_v20 = vpop.f32.mrf.mxu3 }
 0x285   : > { %v6530_v46 = vadd.f32 %v2100_v20, %v7607_v36  ;;  %v3400_v36 = vld [vmem:[#allocation2 + $0xe1] sm:$0xff] }
 0x286   : > { %v3420_v62 = vpack.c.bf16 %v3401_v53, %v3400_v36  ;;  %v7623_v53 = vld [vmem:[#allocation112_spill] sm:$0xff]  ;;  %v6569_v27 = vpop.f32.mrf.mxu0 }
 0x288   : > { %4561 = vmatmul.msk.bf16.gmra.mxu1 %vm631_vm1, %v7613_v48  ;;  %v7619_v48 = vpack.c.bf16 %v5888_v7, %v7618_v12  ;;  %v7626_v7 = vld [vmem:[#allocation117_spill] sm:$0xff] }
 0x289   : > { %4467 = vmatmul.msk.bf16.gmra.mxu3 %vm631_vm1, %v7610_v28 }
 0x28c   : > { %v2103_v59 = vpop.f32.mrf.mxu3 }
 0x28d   : > { %v6546_v20 = vadd.f32 %v2103_v59, %v7615_v24  ;;  %v7620_v59 = vld [vmem:[#allocation49_spill] sm:$0xff]  ;;  %v7621_v24 = vld [vmem:[#allocation42_spill] sm:$0xff] }
 0x28e   : > { %v7622_v13 = vpack.c.bf16 %v7620_v59, %v7621_v24  ;;  %v7629_v59 = vld [vmem:[#allocation109_spill] sm:$0xff] }
 0x293   : > { %4553 = vmatmul.msk.bf16.gmra.mxu0 %vm631_vm1, %v3420_v62  ;;  %v3403_v62 = vld [vmem:[#allocation2 + $0xf9] sm:$0xff] }
 0x294   : > { %v2105_v52 = vpop.f32.mrf.mxu3 }
 0x295   : > { %v6551_v28 = vadd.f32 %v2105_v52, %v7617_v50  ;;  %v6567_v52 = vpop.f32.mrf.mxu1  ;;  %v3402_v50 = vld [vmem:[#allocation2 + $0xf1] sm:$0xff] }
 0x296   : > { %7625 = vst [vmem:[#allocation78_spill] sm:$0xff] %v6567_v52  ;;  %v3421_v51 = vpack.c.bf16 %v3403_v62, %v3402_v50 }
 0x298   : > { %4562 = vmatmul.msk.bf16.gmra.mxu1 %vm631_vm1, %v7622_v13  ;;  %v7628_v13 = vld [vmem:[#allocation110_spill] sm:$0xff] }
 0x299   : > { %4468 = vmatmul.msk.bf16.gmra.mxu3 %vm631_vm1, %v7619_v48  ;;  %v7630_v24 = vpack.c.bf16 %v7628_v13, %v7629_v59  ;;  %v7636_v59 = vld [vmem:[#allocation100_spill] sm:$0xff] }
 0x29c   : > { %v2108_v36 = vpop.f32.mrf.mxu3 }
 0x29d   : > { %v6565_v35 = vadd.f32 %v2108_v36, %v7623_v53  ;;  %v6575_v48 = vpop.f32.mrf.mxu1  ;;  %v7631_v36 = vld [vmem:[#allocation58_spill] sm:$0xff]  ;;  %v7632_v53 = vld [vmem:[#allocation51_spill] sm:$0xff] }
 0x29e   : > { %7627 = vst [vmem:[#allocation82_spill] sm:$0xff] %v6575_v48  ;;  %v7633_v52 = vpack.c.bf16 %v7631_v36, %v7632_v53  ;;  %v7639_v36 = vld [vmem:[#allocation67_spill] sm:$0xff]  ;;  %v7640_v53 = vld [vmem:[#allocation62_spill] sm:$0xff] }
 0x29f   : > { %7624 = vst [vmem:[#allocation19_spill] sm:$0xff] %v6565_v35  ;;  %v6585_v35 = vpop.f32.mrf.mxu0 }
 0x2a3   : > { %4554 = vmatmul.msk.bf16.gmra.mxu0 %vm631_vm1, %v3421_v51 }
 0x2a4   : > { %v2110_v3 = vpop.f32.mrf.mxu3 }
 0x2a5   : > { %v6572_v12 = vadd.f32 %v2110_v3, %v7626_v7  ;;  %v6590_v62 = vpop.f32.mrf.mxu1 }
 0x2a6   : > { %7634 = vst [vmem:[#allocation89_spill] sm:$0xff] %v6590_v62 }
 0x2a7   : > { %v6592_v7 = vpop.f32.mrf.mxu0 }
 0x2a8   : > { %4563 = vmatmul.msk.bf16.gmra.mxu1 %vm631_vm1, %v7633_v52 }
 0x2a9   : > { %4469 = vmatmul.msk.bf16.gmra.mxu3 %vm631_vm1, %v7630_v24  ;;  %v7637_v24 = vld [vmem:[#allocation101_spill] sm:$0xff] }
 0x2aa   : > { %v7638_v52 = vpack.c.bf16 %v7636_v59, %v7637_v24  ;;  %v3059_v59 = vld [vmem:[#allocation2 + $0x28] sm:$0xff]  ;;  %v7646_v24 = vpack.c.bf16 %v5966_v58, %v5970_v8 }
 0x2ac   : > { %v2113_v50 = vpop.f32.mrf.mxu3 }
 0x2ad   : > { %v6588_v3 = vadd.f32 %v2113_v50, %v6039_v37  ;;  %v7641_v37 = vpack.c.bf16 %v7639_v36, %v7640_v53  ;;  %v6607_v62 = vpop.f32.mrf.mxu1  ;;  %v7648_v36 = vld [vmem:[#allocation72_spill] sm:$0xff] }
 0x2ae   : > { %7642 = vst [vmem:[#allocation33_spill] sm:$0xff] %v6607_v62 }
 0x2b3   : > { %4555 = vmatmul.msk.bf16.gmra.mxu0 %vm631_vm1, %v6440_v49 }
 0x2b4   : > { %v2115_v51 = vpop.f32.mrf.mxu3 }
 0x2b5   : > { %v6595_v13 = vadd.f32 %v2115_v51, %v6071_v55  ;;  %v6615_v49 = vpop.f32.mrf.mxu1 }
 0x2b6   : > { %7645 = vst [vmem:[#allocation92_spill] sm:$0xff] %v6615_v49 }
 0x2b7   : > { %7635 = vst [vmem:[#allocation91_spill] sm:$0xff] %v6595_v13  ;;  %v7654_v13 = vld [vmem:[#allocation94_spill] sm:$0xff] }
 0x2b8   : > { %4564 = vmatmul.msk.bf16.gmra.mxu1 %vm631_vm1, %v7641_v37  ;;  %v3058_v37 = vld [vmem:[#allocation2 + $0x20] sm:$0xff] }
 0x2b9   : > { %4470 = vmatmul.msk.bf16.gmra.mxu3 %vm631_vm1, %v7638_v52  ;;  %v7647_v52 = vld [vmem:[#allocation80_spill] sm:$0xff] }
 0x2ba   : > { %v7649_v53 = vpack.c.bf16 %v7647_v52, %v7648_v36  ;;  %v7652_v52 = vld [vmem:[#allocation3_spill] sm:$0xff] }
 0x2bc   : > { %v2118_v50 = vpop.f32.mrf.mxu3 }
 0x2bd   : > { %v6610_v48 = vadd.f32 %v2118_v50, %v6085_v42  ;;  %v3091_v42 = vpack.c.bf16 %v3059_v59, %v3059_v59  ;;  %v6628_v49 = vpop.f32.mrf.mxu1  ;;  %v7653_v59 = vld [vmem:[#allocation113_spill] sm:$0xff] }
 0x2be   : > { %7650 = vst [vmem:[#allocation105_spill] sm:$0xff] %v6628_v49 }
 0x2bf   : > { %7643 = vst [vmem:[#allocation26_spill] sm:$0xff] %v6610_v48  ;;  %v7651_v48 = vld [vmem:[#allocation4_spill] sm:$0xff] }
 0x2c4   : > { %v2120_v55 = vpop.f32.mrf.mxu3 }
 0x2c5   : > { %v6613_v51 = vadd.f32 %v2120_v55, %v6098_v44  ;;  %v3090_v44 = vpack.c.bf16 %v3058_v37, %v3058_v37  ;;  %v3123_v55 = vunpack.c.l.bf16 %v3091_v42  ;;  %v6640_v37 = vpop.f32.mrf.mxu1 }
 0x2c6   : > { %7656 = vst [vmem:[#allocation108_spill] sm:$0xff] %v6640_v37  ;;  %v7690_v37 = vld [vmem:[#allocation88_spill] sm:$0xff] }
 0x2c7   : > { %7644 = vst [vmem:[#allocation85_spill] sm:$0xff] %v6613_v51  ;;  %v3122_v51 = vunpack.c.l.bf16 %v3090_v44  ;;  %v3155_v8 = vmul.f32 %v3123_v55, %v7651_v48  ;;  %v7661_v55 = vld [vmem:[#allocation20_spill] sm:$0xff] }
 0x2c8   : > { %4565 = vmatmul.msk.bf16.gmra.mxu1 %vm631_vm1, %v7649_v53 }
 0x2c9   : > { %4471 = vmatmul.msk.bf16.gmra.mxu3 %vm631_vm1, %v7646_v24  ;;  %v3154_v36 = vmul.f32 %v3122_v51, %v7652_v52  ;;  %v7660_v51 = vld [vmem:[#allocation21_spill] sm:$0xff] }
 0x2cb   : > { %v3186_v53 = vpack.c.bf16 %v3155_v8, %v3154_v36  ;;  %v7662_v8 = vpack.c.bf16 %v7660_v51, %v7661_v55  ;;  %v7673_v55 = vld [vmem:[#allocation119_spill] sm:$0xff] }
 0x2cc   : > { %v2123_v50 = vpop.f32.mrf.mxu3 }
 0x2cd   : > { %v6626_v62 = vadd.f32 %v2123_v50, %v6122_v23  ;;  %v7655_v23 = vpack.c.bf16 %v7653_v59, %v7654_v13  ;;  %v6645_v44 = vpop.f32.mrf.mxu1  ;;  %v7663_v13 = vld [vmem:[#allocation115_spill] sm:$0xff] }
 0x2ce   : > { %7658 = vst [vmem:[#allocation34_spill] sm:$0xff] %v6645_v44  ;;  %v7686_v44 = vld [vmem:[#allocation44_spill] sm:$0xff] }
 0x2d4   : > { %v2125_v58 = vpop.f32.mrf.mxu3 }
 0x2d5   : > { %v6632_v24 = vadd.f32 %v2125_v58, %v6140_v2  ;;  %v7664_v58 = vld [vmem:[#allocation114_spill] sm:$0xff] }
 0x2d6   : > { %v7665_v52 = vpack.c.bf16 %v7663_v13, %v7664_v58 }
 0x2d8   : > { %4566 = vmatmul.msk.bf16.gmra.mxu1 %vm631_vm1, %v7655_v23 }
 0x2d9   : > { %4524 = vmatmul.msk.bf16.vlgmr.msra.gmra.mxu3 %vm631_vm1, %v3186_v53  ;;  %v6661_v53 = vpop.f32.mrf.mxu1 }
 0x2da   : > { %7667 = vst [vmem:[#allocation106_spill] sm:$0xff] %v6661_v53 }
 0x2dc   : > { %v2128_v42 = vpop.f32.mrf.mxu3 }
 0x2dd   : > { %v6643_v50 = vadd.f32 %v2128_v42, %v6158_v47  ;;  %v7670_v42 = vld [vmem:[#allocation28_spill] sm:$0xff] }
 0x2df   : > { %7657 = vst [vmem:[#allocation41_spill] sm:$0xff] %v6643_v50 }
 0x2e1   : > { %v6666_v23 = vpop.f32.mrf.mxu1 }
 0x2e2   : > { %7669 = vst [vmem:[#allocation42_spill] sm:$0xff] %v6666_v23 }
 0x2e4   : > { %v2130_v48 = vpop.f32.mrf.mxu3 }
 0x2e5   : > { %v6648_v2 = vadd.f32 %v2130_v48, %v6172_v19  ;;  %v7671_v48 = vld [vmem:[#allocation27_spill] sm:$0xff] }
 0x2e6   : > { %v7672_v51 = vpack.c.bf16 %v7670_v42, %v7671_v48  ;;  %v7678_v42 = vld [vmem:[#allocation36_spill] sm:$0xff]  ;;  %v7679_v48 = vld [vmem:[#allocation35_spill] sm:$0xff] }
 0x2e7   : > { %7659 = vst [vmem:[#allocation99_spill] sm:$0xff] %v6648_v2 }
 0x2e8   : > { %4567 = vmatmul.msk.bf16.gmra.mxu1 %vm631_vm1, %v7665_v52 }
 0x2e9   : > { %4525 = vmatmul.msk.bf16.gmra.mxu3 %vm631_vm1, %v7662_v8  ;;  %v7674_v8 = vld [vmem:[#allocation118_spill] sm:$0xff]  ;;  %v6679_v52 = vpop.f32.mrf.mxu1 }
 0x2ea   : > { %v7675_v13 = vpack.c.bf16 %v7673_v55, %v7674_v8  ;;  %v7681_v55 = vld [vmem:[#allocation84_spill] sm:$0xff]  ;;  %v7682_v8 = vld [vmem:[#allocation81_spill] sm:$0xff] }
 0x2ec   : > { %v2133_v36 = vpop.f32.mrf.mxu3 }
 0x2ed   : > { %v6659_v47 = vadd.f32 %v2133_v36, %v6192_v25 }
 0x2ef   : > { %7666 = vst [vmem:[#allocation107_spill] sm:$0xff] %v6659_v47 }
 0x2f4   : > { %v2135_v59 = vpop.f32.mrf.mxu3 }
 0x2f5   : > { %v6664_v19 = vadd.f32 %v2135_v59, %v6210_v4  ;;  %v6684_v59 = vpop.f32.mrf.mxu2 }
 0x2f7   : > { %7668 = vst [vmem:[#allocation49_spill] sm:$0xff] %v6664_v19 }
 0x2f8   : > { %4568 = vmatmul.msk.bf16.gmra.mxu1 %vm631_vm1, %v7675_v13  ;;  %v7683_v13 = vpack.c.bf16 %v7681_v55, %v7682_v8  ;;  %v7687_v55 = vld [vmem:[#allocation43_spill] sm:$0xff] }
 0x2f9   : > { %4526 = vmatmul.msk.bf16.gmra.mxu3 %vm631_vm1, %v7672_v51  ;;  %v7680_v51 = vpack.c.bf16 %v7678_v42, %v7679_v48  ;;  %v3624_v48 = vld [vmem:[#allocation2 + $0xf2] sm:$0xff]  ;;  %v7688_v8 = vpack.c.bf16 %v7686_v44, %v7687_v55 }
 0x2fc   : > { %v2138_v25 = vpop.f32.mrf.mxu3 }
 0x2fd   : > { %v6677_v58 = vadd.f32 %v2138_v25, %v6227_v1  ;;  %v6694_v25 = vpop.f32.mrf.mxu1 }
 0x2ff   : > { %7676 = vst [vmem:[#allocation112_spill] sm:$0xff] %v6677_v58 }
 0x304   : > { %v2140_v4 = vpop.f32.mrf.mxu3 }
 0x305   : > { %v6682_v36 = vadd.f32 %v2140_v4, %v6238_v33  ;;  %v6699_v33 = vpop.f32.mrf.mxu2  ;;  %v6704_v42 = vpop.f32.mrf.mxu1 }
 0x307   : > { %7677 = vst [vmem:[#allocation117_spill] sm:$0xff] %v6682_v36 }
 0x308   : > { %4569 = vmatmul.msk.bf16.gmra.mxu1 %vm631_vm1, %v7683_v13  ;;  %v7689_v13 = vld [vmem:[#allocation125_spill] sm:$0xff] }
 0x309   : > { %4527 = vmatmul.msk.bf16.gmra.mxu3 %vm631_vm1, %v7680_v51  ;;  %v3625_v51 = vld [vmem:[#allocation2 + $0xfa] sm:$0xff]  ;;  %v7691_v49 = vpack.c.bf16 %v7689_v13, %v7690_v37  ;;  %v7695_v13 = vld [vmem:[#allocation52_spill] sm:$0xff] }
 0x30c   : > { %v2143_v1 = vpop.f32.mrf.mxu3 }
 0x30d   : > { %v6697_v23 = vadd.f32 %v2143_v1, %v6246_v21  ;;  %v6714_v21 = vpop.f32.mrf.mxu2  ;;  %v3656_v1 = vpack.c.bf16 %v3624_v48, %v3624_v48  ;;  %v6719_v58 = vpop.f32.mrf.mxu1 }
 0x30f   : > { %7684 = vst [vmem:[#allocation110_spill] sm:$0xff] %v6697_v23  ;;  %v3657_v23 = vpack.c.bf16 %v3625_v51, %v3625_v51  ;;  %v7694_v51 = vld [vmem:[#allocation53_spill] sm:$0xff] }
 0x310   : > { %v7696_v19 = vpack.c.bf16 %v7694_v51, %v7695_v13 }
 0x311   : > { %v3689_v36 = vunpack.c.l.bf16 %v3657_v23 }
 0x313   : > { %v3721_v55 = vmul.f32 %v3689_v36, %v5904_v22 }
 0x314   : > { %v2145_v4 = vpop.f32.mrf.mxu3 }
 0x315   : > { %v6702_v53 = vadd.f32 %v2145_v4, %v6264_v6 }
 0x317   : > { %7685 = vst [vmem:[#allocation109_spill] sm:$0xff] %v6702_v53  ;;  %v3688_v53 = vunpack.c.l.bf16 %v3656_v1 }
 0x318   : > { %4570 = vmatmul.msk.bf16.gmra.mxu1 %vm631_vm1, %v7691_v49 }
 0x319   : > { %4528 = vmatmul.msk.bf16.gmra.mxu3 %vm631_vm1, %v7688_v8  ;;  %v3720_v44 = vmul.f32 %v3688_v53, %v5873_v17  ;;  %v6723_v8 = vpop.f32.mrf.mxu2 }
 0x31b   : > { %v3739_v48 = vpack.c.bf16 %v3721_v55, %v3720_v44  ;;  %v7702_v55 = vld [vmem:[#allocation31_spill] sm:$0xff] }
 0x31c   : > { %v2148_v6 = vpop.f32.mrf.mxu3 }
 0x31d   : > { %v6717_v4 = vadd.f32 %v2148_v6, %v6366_v18  ;;  %v6733_v18 = vpop.f32.mrf.mxu1  ;;  %v7699_v6 = vld [vmem:[#allocation64_spill] sm:$0xff] }
 0x31f   : > { %7692 = vst [vmem:[#allocation58_spill] sm:$0xff] %v6717_v4 }
 0x321   : > { %v6738_v22 = vpop.f32.mrf.mxu2 }
 0x324   : > { %v2150_v37 = vpop.f32.mrf.mxu3 }
 0x325   : > { %v6726_v49 = vadd.f32 %v2150_v37, %v6375_v61  ;;  %v6740_v36 = vpop.f32.mrf.mxu1  ;;  %v7703_v37 = vld [vmem:[#allocation32_spill] sm:$0xff] }
 0x327   : > { %7693 = vst [vmem:[#allocation51_spill] sm:$0xff] %v6726_v49 }
 0x328   : > { %4571 = vmatmul.msk.bf16.gmra.mxu1 %vm631_vm1, %v3739_v48  ;;  %v7704_v48 = vpack.c.bf16 %v7702_v55, %v7703_v37  ;;  %v7711_v37 = vld [vmem:[#allocation130_spill] sm:$0xff] }
 0x329   : > { %4529 = vmatmul.msk.bf16.gmra.mxu3 %vm631_vm1, %v7696_v19  ;;  %v6745_v1 = vpop.f32.mrf.mxu2  ;;  %v7700_v19 = vld [vmem:[#allocation63_spill] sm:$0xff] }
 0x32a   : > { %v7701_v44 = vpack.c.bf16 %v7699_v6, %v7700_v19  ;;  %v3075_v6 = vld [vmem:[#allocation2 + $0xa8] sm:$0xff] }
 0x32c   : > { %v2153_v23 = vpop.f32.mrf.mxu3 }
 0x32d   : > { %v6736_v17 = vadd.f32 %v2153_v23, %v6395_v29  ;;  %v6758_v13 = vpop.f32.mrf.mxu1 }
 0x32f   : > { %7697 = vst [vmem:[#allocation100_spill] sm:$0xff] %v6736_v17 }
 0x334   : > { %v2155_v53 = vpop.f32.mrf.mxu3 }
 0x335   : > { %v6743_v61 = vadd.f32 %v2155_v53, %v6405_v54  ;;  %v6760_v54 = vpop.f32.mrf.mxu2  ;;  %v6765_v19 = vpop.f32.mrf.mxu1 }
 0x336   : > { %7706 = vst [vmem:[#allocation62_spill] sm:$0xff] %v6760_v54 }
 0x337   : > { %7698 = vst [vmem:[#allocation101_spill] sm:$0xff] %v6743_v61  ;;  %v7709_v61 = vld [vmem:[#allocation73_spill] sm:$0xff] }
 0x338   : > { %4572 = vmatmul.msk.bf16.gmra.mxu1 %vm631_vm1, %v7704_v48  ;;  %v7712_v48 = vld [vmem:[#allocation131_spill] sm:$0xff] }
 0x339   : > { %4530 = vmatmul.msk.bf16.gmra.mxu3 %vm631_vm1, %v7701_v44  ;;  %v7708_v44 = vld [vmem:[#allocation74_spill] sm:$0xff] }
 0x33a   : > { %v7710_v55 = vpack.c.bf16 %v7708_v44, %v7709_v61  ;;  %v7715_v61 = vld [vmem:[#allocation96_spill] sm:$0xff] }
 0x33b   : > { %v2486_v44 = vadd.f32 %v7715_v61, %v6481_v43  ;;  %v3076_v43 = vld [vmem:[#allocation2 + $0xb0] sm:$0xff] }
 0x33c   : > { %v2158_v29 = vpop.f32.mrf.mxu3 }
 0x33d   : > { %v6756_v51 = vadd.f32 %v2158_v29, %v6426_v39  ;;  %v7713_v39 = vpack.c.bf16 %v7711_v37, %v7712_v48  ;;  %v3074_v29 = vld [vmem:[#allocation2 + $0xa0] sm:$0xff]  ;;  %v6775_v17 = vpop.f32.mrf.mxu2  ;;  %v7717_v37 = vld [vmem:[#allocation61_spill] sm:$0xff] }
 0x33e   : > { %7714 = vst [vmem:[#allocation72_spill] sm:$0xff] %v6775_v17  ;;  %v7718_v48 = vld [vmem:[#allocation70_spill] sm:$0xff]  ;;  %v7719_v17 = vld [vmem:[#allocation59_spill] sm:$0xff] }
 0x33f   : > { %7705 = vst [vmem:[#allocation67_spill] sm:$0xff] %v6756_v51  ;;  %v3107_v51 = vpack.c.bf16 %v3075_v6, %v3075_v6 }
 0x344   : > { %v2160_v23 = vpop.f32.mrf.mxu3 }
 0x345   : > { %v6763_v53 = vadd.f32 %v2160_v23, %v6432_v11  ;;  %v3106_v23 = vpack.c.bf16 %v3074_v29, %v3074_v29  ;;  %v6789_v54 = vpop.f32.mrf.mxu2  ;;  %v3077_v29 = vld [vmem:[#allocation2 + $0xb8] sm:$0xff] }
 0x347   : > { %7707 = vst [vmem:[#allocation80_spill] sm:$0xff] %v6763_v53  ;;  %v3139_v53 = vunpack.c.l.bf16 %v3107_v51  ;;  %v3138_v4 = vunpack.c.l.bf16 %v3106_v23  ;;  %v2708_v51 = vadd.f32 %v6250_v30, %v2486_v44  ;;  %v7721_v44 = vld [vmem:[#allocation111_spill] sm:$0xff] }
 0x348   : > { %4573 = vmatmul.msk.bf16.gmra.mxu1 %vm631_vm1, %v7713_v39  ;;  %v1485_v39 = vadd.f32 %v7718_v48, %v7717_v37  ;;  %v2488_v48 = vadd.f32 %v7721_v44, %v6502_v16 }
 0x349   : > { %4531 = vmatmul.msk.bf16.gmra.mxu3 %vm631_vm1, %v7710_v55  ;;  %v7716_v55 = vld [vmem:[#allocation60_spill] sm:$0xff]  ;;  %v3170_v50 = vmul.f32 %v3138_v4, %v7719_v17  ;;  %v3026_v61 = vadd.f32 %v6335_v38, %v2708_v51  ;;  %v3108_v17 = vpack.c.bf16 %v3076_v43, %v3076_v43  ;;  %v7722_v38 = vld [vmem:[#allocation69_spill] sm:$0xff] }
 0x34a   : > { %v3171_v47 = vmul.f32 %v3139_v53, %v7716_v55  ;;  %v7720_v53 = vld [vmem:[#allocation104_spill] sm:$0xff]  ;;  %v3109_v55 = vpack.c.bf16 %v3077_v29, %v3077_v29 }
 0x34b   : > { %v7723_v43 = vld [vmem:[#allocation68_spill] sm:$0xff] }
 0x34c   : > { %v2163_v49 = vpop.f32.mrf.mxu3 }
 0x34d   : > { %v6778_v11 = vadd.f32 %v2163_v49, %v6451_v9  ;;  %v2169_v9 = vadd.f32 %v6485_v41, %v1485_v39  ;;  %v3194_v49 = vpack.c.bf16 %v3171_v47, %v3170_v50  ;;  %v3141_v41 = vunpack.c.l.bf16 %v3109_v55  ;;  %v6799_v50 = vpop.f32.mrf.mxu2 }
 0x34e   : > { %v3140_v47 = vunpack.c.l.bf16 %v3108_v17 }
 0x34f   : > { %v2487_v23 = vadd.f32 %v7720_v53, %v2169_v9  ;;  %v3173_v9 = vmul.f32 %v3141_v41, %v7722_v38 }
 0x350   : > { %v3172_v53 = vmul.f32 %v3140_v47, %v7723_v43 }
 0x351   : > { %v2709_v37 = vadd.f32 %v6268_v5, %v2487_v23  ;;  %v6810_v5 = vld [vmem:[%s7221_s4] ss:$0 sm:$0xff] }
 0x352   : > { %v3195_v16 = vpack.c.bf16 %v3173_v9, %v3172_v53 }
 0x353   : > { %v3027_v39 = vadd.f32 %v6346_v34, %v2709_v37  ;;  %v2710_v34 = vadd.f32 %v6275_v31, %v2488_v48 }
 0x354   : > { %v2165_v2 = vpop.f32.mrf.mxu3 }
 0x355   : > { %v6786_v6 = vadd.f32 %v2165_v2, %v6467_v26  ;;  %v6796_v2 = vpop.f32.mrf.mxu0  ;;  %v3028_v37 = vadd.f32 %v6368_v0, %v2710_v34 }
 0x359   : > { %4532 = vmatmul.msk.bf16.gmra.mxu3 %vm631_vm1, %v3194_v49 }
 0x35c   : > { %v3264_v26 = vpop.f32.mrf.mxu3 }
 0x35d   : > { %v3344_v4 = vadd.f32 %v3264_v26, %v3026_v61  ;;  %v7724_v26 = vld [vmem:[#allocation116_spill] sm:$0xff] }
 0x35f   : > { %v3566_v30 = vadd.f32 %v6527_v40, %v3344_v4  ;;  %v6813_v40 = vpop.f32.mrf.mxu0  ;;  %v2489_v4 = vadd.f32 %v7724_v26, %v6507_v63  ;;  %v7725_v63 = vld [vmem:[#allocation120_spill] sm:$0xff] }
 0x360   : > { %v2490_v38 = vadd.f32 %v7725_v63, %v6523_v15 }
 0x361   : > { %v3884_v51 = vadd.f32 %v6679_v52, %v3566_v30  ;;  %v6820_v52 = vpop.f32.mrf.mxu2  ;;  %v2711_v44 = vadd.f32 %v6291_v45, %v2489_v4 }
 0x362   : > { %v2712_v43 = vadd.f32 %v6298_v14, %v2490_v38 }
 0x363   : > { %v3920_v61 = vadd.f32 %v6810_v5, %v3884_v51  ;;  %v3029_v0 = vadd.f32 %v6381_v32, %v2711_v44  ;;  %v7729_v32 = vld [vmem:[#allocation126_spill] sm:$0xff] }
 0x364   : > { %v3266_v49 = vpop.f32.mrf.mxu3  ;;  %v2491_v15 = vadd.f32 %v7729_v32, %v6530_v46  ;;  %v3030_v14 = vadd.f32 %v6400_v56, %v2712_v43  ;;  %v7731_v46 = vld [vmem:[#allocation24_spill] sm:$0xff] }
 0x365   : > { %v3345_v29 = vadd.f32 %v3266_v49, %v3027_v39 }
 0x367   : > { %v3567_v23 = vadd.f32 %v6543_v10, %v3345_v29  ;;  %v3952_v10 = vmax.f32 %v3920_v61, 0.0  ;;  %v6827_v48 = vpop.f32.mrf.mxu0 }
 0x369   : > { %v3885_v55 = vadd.f32 %v6694_v25, %v3567_v23  ;;  %4533 = vmatmul.msk.bf16.gmra.mxu3 %vm631_vm1, %v3195_v16  ;;  %v6829_v25 = vpop.f32.mrf.mxu1  ;;  %v6836_v9 = vpop.f32.mrf.mxu2  ;;  %v7726_v23 = vld [vmem:[#allocation122_spill] sm:$0xff]  ;;  %v7727_v16 = vld [vmem:[#allocation121_spill] sm:$0xff] }
 0x36a   : > { %v7728_v34 = vpack.c.bf16 %v7726_v23, %v7727_v16  ;;  %v7737_v23 = vld [vmem:[#allocation29_spill] sm:$0xff] }
 0x36b   : > { %v3921_v17 = vadd.f32 %v6810_v5, %v3885_v55 }
 0x36c   : > { %v3269_v41 = vpop.f32.mrf.mxu3 }
 0x36d   : > { %v3953_v30 = vmax.f32 %v3921_v17, 0.0  ;;  %v3346_v47 = vadd.f32 %v3269_v41, %v3028_v37  ;;  %v7730_v41 = vld [vmem:[#allocation11_spill] sm:$0xff] }
 0x36f   : > { %v3984_v31 = vpack.c.bf16 %v3953_v30, %v3952_v10  ;;  %v3568_v39 = vadd.f32 %v6554_v57, %v3346_v47  ;;  %v6849_v61 = vpop.f32.mrf.mxu0  ;;  %v2713_v10 = vadd.f32 %v7730_v41, %v2491_v15  ;;  %v2492_v47 = vadd.f32 %v7731_v46, %v6546_v20 }
 0x371   : > { %4574 = vmatmul.msk.bf16.vlgmr.msra.gmra.mxu2 %vm631_vm1, %v3984_v31  ;;  %v3886_v51 = vadd.f32 %v6704_v42, %v3568_v39  ;;  %v6851_v42 = vpop.f32.mrf.mxu1  ;;  %v6855_v17 = vpop.f32.mrf.mxu2  ;;  %v3031_v31 = vadd.f32 %v6421_v60, %v2713_v10  ;;  %v7734_v60 = vld [vmem:[#allocation123_spill] sm:$0xff]  ;;  %v7741_v10 = vld [vmem:[#allocation37_spill] sm:$0xff] }
 0x373   : > { %v3922_v53 = vadd.f32 %v6810_v5, %v3886_v51 }
 0x374   : > { %v3271_v49 = vpop.f32.mrf.mxu3 }
 0x375   : > { %v3347_v29 = vadd.f32 %v3271_v49, %v3029_v0  ;;  %v3954_v26 = vmax.f32 %v3922_v53, 0.0  ;;  %v7732_v49 = vld [vmem:[#allocation93_spill] sm:$0xff] }
 0x376   : > { %v2714_v51 = vadd.f32 %v7732_v49, %v2492_v47  ;;  %v7736_v53 = vld [vmem:[#allocation129_spill] sm:$0xff] }
 0x377   : > { %v3569_v45 = vadd.f32 %v6569_v27, %v3347_v29  ;;  %v6863_v56 = vpop.f32.mrf.mxu0  ;;  %v3085_v49 = vld [vmem:[#allocation2 + $0xf8] sm:$0xff] }
 0x379   : > { %v3887_v57 = vadd.f32 %v6719_v58, %v3569_v45  ;;  %4534 = vmatmul.msk.bf16.gmra.mxu3 %vm631_vm1, %v7728_v34  ;;  %v6865_v39 = vpop.f32.mrf.mxu1  ;;  %v7733_v45 = vld [vmem:[#allocation124_spill] sm:$0xff] }
 0x37a   : > { %v7735_v43 = vpack.c.bf16 %v7733_v45, %v7734_v60  ;;  %v7743_v45 = vld [vmem:[#allocation128_spill] sm:$0xff]  ;;  %v7744_v60 = vld [vmem:[#allocation127_spill] sm:$0xff] }
 0x37b   : > { %v3923_v27 = vadd.f32 %v6810_v5, %v3887_v57  ;;  %v2493_v57 = vadd.f32 %v7736_v53, %v6551_v28 }
 0x37c   : > { %v3274_v55 = vpop.f32.mrf.mxu3 }
 0x37d   : > { %v3955_v4 = vmax.f32 %v3923_v27, 0.0  ;;  %v3348_v58 = vadd.f32 %v3274_v55, %v3030_v14  ;;  %v7738_v55 = vld [vmem:[#allocation13_spill] sm:$0xff] }
 0x37f   : > { %v3985_v37 = vpack.c.bf16 %v3955_v4, %v3954_v26  ;;  %v3570_v30 = vadd.f32 %v6585_v35, %v3348_v58  ;;  %v6870_v35 = vpop.f32.mrf.mxu2  ;;  %v6882_v27 = vpop.f32.mrf.mxu0  ;;  %v2715_v26 = vadd.f32 %v7738_v55, %v2493_v57  ;;  %v7739_v58 = vld [vmem:[#allocation19_spill] sm:$0xff] }
 0x381   : > { %4575 = vmatmul.msk.bf16.gmra.mxu2 %vm631_vm1, %v3985_v37  ;;  %v3888_v63 = vadd.f32 %v6733_v18, %v3570_v30  ;;  %v6884_v14 = vpop.f32.mrf.mxu1  ;;  %v7740_v37 = vld [vmem:[#allocation98_spill] sm:$0xff]  ;;  %v3033_v30 = vadd.f32 %v7741_v10, %v2715_v26 }
 0x382   : > { %v2494_v41 = vadd.f32 %v7740_v37, %v7739_v58 }
 0x383   : > { %v3924_v29 = vadd.f32 %v6810_v5, %v3888_v63  ;;  %v7742_v63 = vld [vmem:[#allocation90_spill] sm:$0xff] }
 0x384   : > { %v3276_v44 = vpop.f32.mrf.mxu3 }
 0x385   : > { %v3349_v38 = vadd.f32 %v3276_v44, %v3031_v31  ;;  %v3956_v34 = vmax.f32 %v3924_v29, 0.0 }
 0x387   : > { %v3571_v0 = vadd.f32 %v6592_v7, %v3349_v38  ;;  %v3032_v7 = vadd.f32 %v7737_v23, %v2714_v51  ;;  %v6889_v28 = vpop.f32.mrf.mxu2  ;;  %v2716_v38 = vadd.f32 %v7742_v63, %v2494_v41  ;;  %v3117_v23 = vpack.c.bf16 %v3085_v49, %v3085_v49 }
 0x389   : > { %v3889_v20 = vadd.f32 %v6740_v36, %v3571_v0  ;;  %4535 = vmatmul.msk.bf16.gmra.mxu3 %vm631_vm1, %v7735_v43  ;;  %v3084_v0 = vld [vmem:[#allocation2 + $0xf0] sm:$0xff]  ;;  %v6899_v51 = vpop.f32.mrf.mxu1  ;;  %v7745_v43 = vpack.c.bf16 %v7743_v45, %v7744_v60  ;;  %v3087_v45 = vld [vmem:[#allocation2 + $0x108] sm:$0xff] }
 0x38b   : > { %v3925_v18 = vadd.f32 %v6810_v5, %v3889_v20 }
 0x38c   : > { %v3279_v16 = vpop.f32.mrf.mxu3 }
 0x38d   : > { %v3957_v32 = vmax.f32 %v3925_v18, 0.0  ;;  %v3350_v15 = vadd.f32 %v3279_v16, %v3032_v7  ;;  %v3034_v18 = vadd.f32 %v6684_v59, %v2716_v38 }
 0x38f   : > { %v3986_v36 = vpack.c.bf16 %v3957_v32, %v3956_v34  ;;  %v3572_v4 = vadd.f32 %v6796_v2, %v3350_v15  ;;  %v6897_v2 = vpop.f32.mrf.mxu0  ;;  %v6911_v7 = vpop.f32.mrf.mxu2 }
 0x391   : > { %4576 = vmatmul.msk.bf16.gmra.mxu2 %vm631_vm1, %v3986_v36  ;;  %v3890_v47 = vadd.f32 %v6758_v13, %v3572_v4  ;;  %v3116_v13 = vpack.c.bf16 %v3084_v0, %v3084_v0  ;;  %v7747_v36 = vld [vmem:[#allocation16_spill] sm:$0xff]  ;;  %v3149_v4 = vunpack.c.l.bf16 %v3117_v23  ;;  %v6920_v41 = vpop.f32.mrf.mxu1 }
 0x393   : > { %v3926_v29 = vadd.f32 %v6810_v5, %v3890_v47  ;;  %v3148_v26 = vunpack.c.l.bf16 %v3116_v13  ;;  %v7750_v47 = vld [vmem:[#allocation5_spill] sm:$0xff]  ;;  %v7752_v13 = vld [vmem:[#allocation91_spill] sm:$0xff] }
 0x394   : > { %v3281_v46 = vpop.f32.mrf.mxu3 }
 0x395   : > { %v3351_v31 = vadd.f32 %v3281_v46, %v3033_v30  ;;  %v3958_v34 = vmax.f32 %v3926_v29, 0.0  ;;  %v7749_v30 = vld [vmem:[#allocation97_spill] sm:$0xff] }
 0x396   : > { %v3180_v46 = vmul.f32 %v3148_v26, %v7749_v30  ;;  %v7754_v26 = vld [vmem:[#allocation83_spill] sm:$0xff]  ;;  %v7756_v30 = vld [vmem:[#allocation48_spill] sm:$0xff] }
 0x397   : > { %v3573_v44 = vadd.f32 %v6813_v40, %v3351_v31  ;;  %v7746_v40 = vld [vmem:[#allocation6_spill] sm:$0xff]  ;;  %v6918_v59 = vpop.f32.mrf.mxu0  ;;  %v3181_v31 = vmul.f32 %v3149_v4, %v7750_v47 }
 0x398   : > { %v2495_v53 = vadd.f32 %v7746_v40, %v6572_v12  ;;  %v7748_v12 = vld [vmem:[#allocation40_spill] sm:$0xff] }
 0x399   : > { %v3891_v20 = vadd.f32 %v6765_v19, %v3573_v44  ;;  %4536 = vmatmul.msk.bf16.gmra.mxu3 %vm631_vm1, %v7745_v43  ;;  %v2496_v37 = vadd.f32 %v7748_v12, %v6588_v3  ;;  %v3199_v49 = vpack.c.bf16 %v3181_v31, %v3180_v46  ;;  %v7751_v3 = vld [vmem:[#allocation23_spill] sm:$0xff]  ;;  %v7753_v40 = vld [vmem:[#allocation8_spill] sm:$0xff] }
 0x39a   : > { %v2717_v55 = vadd.f32 %v7747_v36, %v2495_v53  ;;  %v7757_v31 = vld [vmem:[#allocation7_spill] sm:$0xff] }
 0x39b   : > { %v3927_v57 = vadd.f32 %v6810_v5, %v3891_v20  ;;  %v2718_v29 = vadd.f32 %v7751_v3, %v2496_v37  ;;  %v3086_v20 = vld [vmem:[#allocation2 + $0x100] sm:$0xff] }
 0x39c   : > { %v3284_v16 = vpop.f32.mrf.mxu3  ;;  %v3035_v10 = vadd.f32 %v6699_v33, %v2717_v55  ;;  %v3118_v43 = vpack.c.bf16 %v3086_v20, %v3086_v20 }
 0x39d   : > { %v3959_v32 = vmax.f32 %v3927_v57, 0.0  ;;  %v3352_v19 = vadd.f32 %v3284_v16, %v3034_v18  ;;  %v3036_v57 = vadd.f32 %v6714_v21, %v2718_v29  ;;  %v6939_v16 = vpop.f32.mrf.mxu1  ;;  %v3089_v29 = vld [vmem:[#allocation2 + $0x118] sm:$0xff] }
 0x39f   : > { %v3987_v15 = vpack.c.bf16 %v3959_v32, %v3958_v34  ;;  %v3574_v58 = vadd.f32 %v6827_v48, %v3352_v19  ;;  %v6926_v48 = vpop.f32.mrf.mxu2  ;;  %v6937_v23 = vpop.f32.mrf.mxu0 }
 0x3a1   : > { %4577 = vmatmul.msk.bf16.gmra.mxu2 %vm631_vm1, %v3987_v15  ;;  %v3892_v63 = vadd.f32 %v6829_v25, %v3574_v58  ;;  %v2497_v25 = vadd.f32 %v7753_v40, %v7752_v13  ;;  %v3407_v15 = vld [vmem:[#allocation2 + $0x119] sm:$0xff]  ;;  %v3150_v58 = vunpack.c.l.bf16 %v3118_v43  ;;  %v3088_v13 = vld [vmem:[#allocation2 + $0x110] sm:$0xff] }
 0x3a3   : > { %v3928_v60 = vadd.f32 %v6810_v5, %v3892_v63  ;;  %v2719_v4 = vadd.f32 %v7754_v26, %v2497_v25  ;;  %v7758_v63 = vld [vmem:[#allocation39_spill] sm:$0xff]  ;;  %v3121_v25 = vpack.c.bf16 %v3089_v29, %v3089_v29  ;;  %v7766_v29 = vld [vmem:[#allocation38_spill] sm:$0xff] }
 0x3a4   : > { %v3286_v44 = vpop.f32.mrf.mxu3 }
 0x3a5   : > { %v3353_v38 = vadd.f32 %v3286_v44, %v3035_v10  ;;  %v3960_v34 = vmax.f32 %v3928_v60, 0.0  ;;  %v7755_v10 = vld [vmem:[#allocation26_spill] sm:$0xff]  ;;  %v3037_v47 = vadd.f32 %v6723_v8, %v2719_v4  ;;  %v3182_v44 = vmul.f32 %v3150_v58, %v7757_v31  ;;  %v7765_v31 = vld [vmem:[#allocation47_spill] sm:$0xff] }
 0x3a6   : > { %v2498_v46 = vadd.f32 %v7756_v30, %v7755_v10  ;;  %v7763_v10 = vld [vmem:[#allocation10_spill] sm:$0xff] }
 0x3a7   : > { %v3575_v0 = vadd.f32 %v6849_v61, %v3353_v38  ;;  %v3119_v61 = vpack.c.bf16 %v3087_v45, %v3087_v45  ;;  %v6942_v37 = vpop.f32.mrf.mxu2  ;;  %v3523_v20 = vpop.f32.mrf.mxu0 }
 0x3a8   : > { %v6953_v45 = vpop.f32.mrf.mxu1 }
 0x3a9   : > { %v3893_v33 = vadd.f32 %v6851_v42, %v3575_v0  ;;  %4537 = vmatmul.msk.bf16.gmra.mxu3 %vm631_vm1, %v3199_v49  ;;  %v3406_v42 = vld [vmem:[#allocation2 + $0x111] sm:$0xff]  ;;  %v3151_v12 = vunpack.c.l.bf16 %v3119_v61 }
 0x3aa   : > { %v3423_v36 = vpack.c.bf16 %v3407_v15, %v3406_v42 }
 0x3ab   : > { %v3929_v53 = vadd.f32 %v6810_v5, %v3893_v33  ;;  %v3183_v38 = vmul.f32 %v3151_v12, %v7758_v63  ;;  %v7759_v33 = vld [vmem:[#allocation103_spill] sm:$0xff] }
 0x3ac   : > { %v3289_v18 = vpop.f32.mrf.mxu3  ;;  %4556 = vmatmul.msk.bf16.gmra.mxu0 %vm631_vm1, %v3423_v36  ;;  %v2720_v43 = vadd.f32 %v7759_v33, %v2498_v46  ;;  %v3153_v36 = vunpack.c.l.bf16 %v3121_v25 }
 0x3ad   : > { %v3961_v32 = vmax.f32 %v3929_v53, 0.0  ;;  %v3354_v19 = vadd.f32 %v3289_v18, %v3036_v57  ;;  %v3200_v60 = vpack.c.bf16 %v3183_v38, %v3182_v44  ;;  %v7761_v57 = vld [vmem:[#allocation9_spill] sm:$0xff] }
 0x3ae   : > { %v3185_v30 = vmul.f32 %v3153_v36, %v7763_v10  ;;  %v7773_v10 = vld [vmem:[#allocation45_spill] sm:$0xff] }
 0x3af   : > { %v3988_v55 = vpack.c.bf16 %v3961_v32, %v3960_v34  ;;  %v3576_v21 = vadd.f32 %v6863_v56, %v3354_v19  ;;  %v6960_v53 = vpop.f32.mrf.mxu2  ;;  %v3120_v34 = vpack.c.bf16 %v3088_v13, %v3088_v13  ;;  %v3526_v58 = vpop.f32.mrf.mxu0 }
 0x3b0   : > { %v3844_v12 = vpop.f32.mrf.mxu1 }
 0x3b1   : > { %4578 = vmatmul.msk.bf16.gmra.mxu2 %vm631_vm1, %v3988_v55  ;;  %v3894_v49 = vadd.f32 %v6865_v39, %v3576_v21  ;;  %v7760_v39 = vld [vmem:[#allocation85_spill] sm:$0xff]  ;;  %v3152_v4 = vunpack.c.l.bf16 %v3120_v34 }
 0x3b2   : > { %v2499_v61 = vadd.f32 %v7761_v57, %v7760_v39 }
 0x3b3   : > { %v3930_v8 = vadd.f32 %v6810_v5, %v3894_v49  ;;  %v3184_v44 = vmul.f32 %v3152_v4, %v7765_v31  ;;  %v7775_v31 = vld [vmem:[#allocation65_spill] sm:$0xff] }
 0x3b4   : > { %v3291_v0 = vpop.f32.mrf.mxu3 }
 0x3b5   : > { %v3355_v3 = vadd.f32 %v3291_v0, %v3037_v47  ;;  %v3962_v19 = vmax.f32 %v3930_v8, 0.0 }
 0x3b7   : > { %v3577_v56 = vadd.f32 %v6882_v27, %v3355_v3  ;;  %v3038_v27 = vadd.f32 %v6738_v22, %v2720_v43  ;;  %v7764_v22 = vld [vmem:[#allocation57_spill] sm:$0xff]  ;;  %v6974_v63 = vpop.f32.mrf.mxu2  ;;  %v3528_v43 = vpop.f32.mrf.mxu0 }
 0x3b8   : > { %v2500_v46 = vadd.f32 %v7764_v22, %v6626_v62  ;;  %v7767_v62 = vld [vmem:[#allocation56_spill] sm:$0xff]  ;;  %v3846_v13 = vpop.f32.mrf.mxu1 }
 0x3b9   : > { %v3895_v40 = vadd.f32 %v6884_v14, %v3577_v56  ;;  %4538 = vmatmul.msk.bf16.gmra.mxu3 %vm631_vm1, %v3200_v60  ;;  %v7762_v14 = vld [vmem:[#allocation30_spill] sm:$0xff] }
 0x3ba   : > { %v2721_v26 = vadd.f32 %v7762_v14, %v2499_v61  ;;  %v2722_v56 = vadd.f32 %v7766_v29, %v2500_v46 }
 0x3bb   : > { %v3931_v18 = vadd.f32 %v6810_v5, %v3895_v40 }
 0x3bc   : > { %v3294_v32 = vpop.f32.mrf.mxu3  ;;  %v3039_v47 = vadd.f32 %v6745_v1, %v2721_v26  ;;  %v2501_v1 = vadd.f32 %v7767_v62, %v6632_v24  ;;  %v7770_v24 = vld [vmem:[#allocation41_spill] sm:$0xff] }
 0x3bd   : > { %v3963_v42 = vmax.f32 %v3931_v18, 0.0  ;;  %v3356_v15 = vadd.f32 %v3294_v32, %v3038_v27  ;;  %v7769_v27 = vld [vmem:[#allocation95_spill] sm:$0xff]  ;;  %v7771_v32 = vld [vmem:[#allocation66_spill] sm:$0xff] }
 0x3bf   : > { %v3989_v55 = vpack.c.bf16 %v3963_v42, %v3962_v19  ;;  %v3578_v21 = vadd.f32 %v6897_v2, %v3356_v15  ;;  %v3201_v2 = vpack.c.bf16 %v3185_v30, %v3184_v44  ;;  %v6986_v61 = vpop.f32.mrf.mxu2  ;;  %v2502_v19 = vadd.f32 %v7771_v32, %v7770_v24  ;;  %v7772_v42 = vld [vmem:[#allocation72_spill] sm:$0xff]  ;;  %v7780_v24 = vld [vmem:[#allocation49_spill] sm:$0xff] }
 0x3c0   : > { %v3849_v14 = vpop.f32.mrf.mxu1  ;;  %v7781_v32 = vld [vmem:[#allocation76_spill] sm:$0xff] }
 0x3c1   : > { %4579 = vmatmul.msk.bf16.gmra.mxu2 %vm631_vm1, %v3989_v55  ;;  %v3896_v0 = vadd.f32 %v6899_v51, %v3578_v21  ;;  %v7768_v51 = vld [vmem:[#allocation62_spill] sm:$0xff]  ;;  %v3531_v55 = vpop.f32.mrf.mxu0  ;;  %v2724_v30 = vadd.f32 %v7773_v10, %v2502_v19  ;;  %v2505_v19 = vadd.f32 %v7781_v32, %v7780_v24 }
 0x3c2   : > { %v3040_v40 = vadd.f32 %v7768_v51, %v2722_v56 }
 0x3c3   : > { %v3932_v60 = vadd.f32 %v6810_v5, %v3896_v0  ;;  %v3042_v0 = vadd.f32 %v6789_v54, %v2724_v30  ;;  %v337_v30 = vld [vmem:[%s4723_s27] sm:$0xff]  }
 0x3c4   : > { %v3296_v38 = vpop.f32.mrf.mxu3 }
 0x3c5   : > { %v3357_v49 = vadd.f32 %v3296_v38, %v3039_v47  ;;  %v7774_v47 = vld [vmem:[#allocation99_spill] sm:$0xff] }
 0x3c6   : > { %v2503_v44 = vadd.f32 %v7775_v31, %v7774_v47  ;;  %v7784_v47 = vld [vmem:[#allocation71_spill] sm:$0xff] }
 0x3c7   : > { %v3579_v3 = vadd.f32 %v6918_v59, %v3357_v49  ;;  %v3964_v59 = vmax.f32 %v3932_v60, 0.0  ;;  %v6996_v22 = vpop.f32.mrf.mxu2  ;;  %v7776_v60 = vld [vmem:[#allocation54_spill] sm:$0xff] }
 0x3c8   : > { %v3851_v29 = vpop.f32.mrf.mxu1 }
 0x3c9   : > { %v3897_v33 = vadd.f32 %v6920_v41, %v3579_v3  ;;  %4539 = vmatmul.msk.bf16.gmra.mxu3 %vm631_vm1, %v3201_v2  ;;  %v2723_v41 = vadd.f32 %v7769_v27, %v2501_v1  ;;  %v7777_v1 = vld [vmem:[#allocation107_spill] sm:$0xff] }
 0x3cb   : > { %v3933_v8 = vadd.f32 %v6810_v5, %v3897_v33  ;;  %v3041_v15 = vadd.f32 %v7772_v42, %v2723_v41  ;;  %v2725_v33 = vadd.f32 %v7776_v60, %v2503_v44 }
 0x3cc   : > { %v3299_v25 = vpop.f32.mrf.mxu3 }
 0x3cd   : > { %v3965_v39 = vmax.f32 %v3933_v8, 0.0  ;;  %v3358_v57 = vadd.f32 %v3299_v25, %v3040_v40  ;;  %v7778_v8 = vld [vmem:[#allocation12_spill] sm:$0xff]  ;;  %v3043_v40 = vadd.f32 %v6799_v50, %v2725_v33  ;;  %v7785_v33 = vld [vmem:[#allocation75_spill] sm:$0xff] }
 0x3ce   : > { %v2504_v51 = vadd.f32 %v7778_v8, %v7777_v1 }
 0x3cf   : > { %v3990_v18 = vpack.c.bf16 %v3965_v39, %v3964_v59  ;;  %v3580_v34 = vadd.f32 %v6937_v23, %v3358_v57  ;;  %v7779_v57 = vld [vmem:[#allocation17_spill] sm:$0xff] }
 0x3d0   : > { %v3854_v41 = vpop.f32.mrf.mxu1 }
 0x3d1   : > { %4580 = vmatmul.msk.bf16.gmra.mxu2 %vm631_vm1, %v3990_v18  ;;  %v3898_v26 = vadd.f32 %v6939_v16, %v3580_v34  ;;  %v2726_v18 = vadd.f32 %v7779_v57, %v2504_v51  ;;  %v7786_v51 = vld [vmem:[#allocation117_spill] sm:$0xff] }
 0x3d3   : > { %v3934_v23 = vadd.f32 %v6810_v5, %v3898_v26 }
 0x3d4   : > { %v3301_v36 = vpop.f32.mrf.mxu3 }
 0x3d5   : > { %v3359_v4 = vadd.f32 %v3301_v36, %v3041_v15  ;;  %v3966_v3 = vmax.f32 %v3934_v23, 0.0  ;;  %v3044_v15 = vadd.f32 %v6820_v52, %v2726_v18 }
 0x3d7   : > { %v3581_v21 = vadd.f32 %v3523_v20, %v3359_v4  ;;  %v3533_v20 = vpop.f32.mrf.mxu0 }
 0x3d8   : > { %v3856_v44 = vpop.f32.mrf.mxu1 }
 0x3d9   : > { %v3899_v46 = vadd.f32 %v6953_v45, %v3581_v21  ;;  %v7006_v45 = vpop.f32.mrf.mxu2  ;;  %v7782_v21 = vld [vmem:[#allocation77_spill] sm:$0xff] }
 0x3da   : > { %v2727_v10 = vadd.f32 %v7782_v21, %v2505_v19 }
 0x3db   : > { %v3935_v38 = vadd.f32 %v6810_v5, %v3899_v46  ;;  %v7783_v46 = vld [vmem:[#allocation112_spill] sm:$0xff] }
 0x3dc   : > { %v3304_v49 = vpop.f32.mrf.mxu3  ;;  %v2506_v31 = vadd.f32 %v7784_v47, %v7783_v46 }
 0x3dd   : > { %v3967_v16 = vmax.f32 %v3935_v38, 0.0  ;;  %v3360_v2 = vadd.f32 %v3304_v49, %v3042_v0  ;;  %v3045_v38 = vadd.f32 %v6836_v9, %v2727_v10  ;;  %v4145_v0 = vunpack.c.l.bf16 %v337_v30 }
 0x3df   : > { %v3991_v56 = vpack.c.bf16 %v3967_v16, %v3966_v3  ;;  %v3582_v62 = vadd.f32 %v3526_v58, %v3360_v2  ;;  %v3536_v27 = vpop.f32.mrf.mxu0 }
 0x3e0   : > { %v3859_v18 = vpop.f32.mrf.mxu1 }
 0x3e1   : > { %4581 = vmatmul.msk.bf16.gmra.mxu2 %vm631_vm1, %v3991_v56  ;;  %v3900_v25 = vadd.f32 %v3844_v12, %v3582_v62  ;;  %v7017_v50 = vpop.f32.mrf.mxu2  ;;  %v2728_v62 = vadd.f32 %v7785_v33, %v2506_v31 }
 0x3e3   : > { %v3936_v58 = vadd.f32 %v6810_v5, %v3900_v25  ;;  %v4146_v25 = vunpack.c.h.bf16 %v337_v30 }
 0x3e4   : > { %v3306_v54 = vpop.f32.mrf.mxu3 }
 0x3e5   : > { %v3361_v59 = vadd.f32 %v3306_v54, %v3043_v40  ;;  %v3968_v36 = vmax.f32 %v3936_v58, 0.0 }
 0x3e7   : > { %v3583_v39 = vadd.f32 %v3528_v43, %v3361_v59  ;;  %v3538_v52 = vpop.f32.mrf.mxu0 }
 0x3e9   : > { %v3901_v34 = vadd.f32 %v3846_v13, %v3583_v39  ;;  %v7025_v13 = vld [vmem:[%s7223_s6] ss:$0 sm:$0xff] }
 0x3eb   : > { %v3937_v42 = vadd.f32 %v6810_v5, %v3901_v34 }
 0x3ec   : > { %v3309_v12 = vpop.f32.mrf.mxu3 }
 0x3ed   : > { %v3969_v43 = vmax.f32 %v3937_v42, 0.0  ;;  %v3362_v26 = vadd.f32 %v3309_v12, %v3044_v15  ;;  %v7788_v42 = vld [vmem:[#allocation25_spill] sm:$0xff]  ;;  %v339_v12 = vld [vmem:[%s4723_s27 + $0x8] sm:$0xff]  }
 0x3ee   : > { %v4147_v10 = vunpack.c.l.bf16 %v339_v12 }
 0x3ef   : > { %v3992_v4 = vpack.c.bf16 %v3969_v43, %v3968_v36  ;;  %v3584_v23 = vadd.f32 %v3531_v55, %v3362_v26  ;;  %v3541_v57 = vpop.f32.mrf.mxu0  ;;  %v7790_v26 = vld [vmem:[#allocation15_spill] sm:$0xff] }
 0x3f1   : > { %4582 = vmatmul.msk.bf16.gmra.mxu2 %vm631_vm1, %v3992_v4  ;;  %v3902_v16 = vadd.f32 %v3849_v14, %v3584_v23  ;;  %v7787_v14 = vld [vmem:[#allocation14_spill] sm:$0xff] }
 0x3f2   : > { %v2507_v40 = vadd.f32 %v7787_v14, %v7786_v51 }
 0x3f3   : > { %v3938_v9 = vadd.f32 %v6810_v5, %v3902_v16 }
 0x3f4   : > { %v3311_v49 = vpop.f32.mrf.mxu3  ;;  %v4065_v3 = vpop.f32.mrf.mxu2  ;;  %v2729_v15 = vadd.f32 %v7788_v42, %v2507_v40 }
 0x3f5   : > { %v3363_v2 = vadd.f32 %v3311_v49, %v3045_v38  ;;  %v4066_v55 = vadd.f32 %v7025_v13, %v4065_v3  ;;  %v3970_v58 = vmax.f32 %v3938_v9, 0.0  ;;  %v7791_v3 = vld [vmem:[#allocation78_spill] sm:$0xff]  ;;  %v4148_v9 = vunpack.c.h.bf16 %v339_v12 }
 0x3f6   : > { %v3047_v21 = vadd.f32 %v6870_v35, %v2729_v15  ;;  %v7792_v35 = vld [vmem:[#allocation109_spill] sm:$0xff] }
 0x3f7   : > { %v3585_v56 = vadd.f32 %v3533_v20, %v3363_v2  ;;  %v4177_v60 = vadd.f32 %v4145_v0, %v4066_v55  ;;  %v3046_v20 = vadd.f32 %v6855_v17, %v2728_v62  ;;  %v7789_v17 = vld [vmem:[#allocation110_spill] sm:$0xff]  ;;  %v3543_v38 = vpop.f32.mrf.mxu0 }
 0x3f8   : > { %v2508_v4 = vadd.f32 %v7790_v26, %v7789_v17 }
 0x3f9   : > { %v3903_v1 = vadd.f32 %v3851_v29, %v3585_v56  ;;  %v4209_v8 = vmax.f32 %v4177_v60, 0.0  ;;  %v7793_v60 = vld [vmem:[#allocation22_spill] sm:$0xff] }
 0x3fa   : > { %v2730_v16 = vadd.f32 %v7791_v3, %v2508_v4  ;;  %v2509_v33 = vadd.f32 %v7793_v60, %v7792_v35  ;;  %v7797_v4 = vld [vmem:[#allocation89_spill] sm:$0xff] }
 0x3fb   : > { %v3939_v54 = vadd.f32 %v6810_v5, %v3903_v1  ;;  %4241 = vst.msk [vmem:[%s7036_s13] sm:$0xff] %vm461_vm0, %v4209_v8 }
 0x3fc   : > { %v3314_v59 = vpop.f32.mrf.mxu3  ;;  %v4067_v39 = vpop.f32.mrf.mxu2 }
 0x3fd   : > { %v3971_v34 = vmax.f32 %v3939_v54, 0.0  ;;  %v3364_v29 = vadd.f32 %v3314_v59, %v3046_v20  ;;  %v4068_v24 = vadd.f32 %v7025_v13, %v4067_v39  ;;  %v7794_v20 = vld [vmem:[#allocation82_spill] sm:$0xff]  ;;  %v341_v59 = vld [vmem:[%s4723_s27 + $0x10] sm:$0xff]  }
 0x3fe   : > { %v4149_v42 = vunpack.c.l.bf16 %v341_v59 }
 0x3ff   : > { %v4178_v32 = vadd.f32 %v4146_v25, %v4068_v24  ;;  %v3993_v19 = vpack.c.bf16 %v3971_v34, %v3970_v58  ;;  %v3586_v36 = vadd.f32 %v3536_v27, %v3364_v29  ;;  %v3861_v27 = vpop.f32.mrf.mxu1  ;;  %v2731_v25 = vadd.f32 %v7794_v20, %v2509_v33  ;;  %v3546_v39 = vpop.f32.mrf.mxu0  ;;  %v7796_v24 = vld [vmem:[#allocation102_spill] sm:$0xff]  ;;  %v7800_v33 = vld [vmem:[#allocation33_spill] sm:$0xff] }
 0x401   : > { %v4210_v43 = vmax.f32 %v4178_v32, 0.0  ;;  %4583 = vmatmul.msk.bf16.gmra.mxu2 %vm631_vm1, %v3993_v19  ;;  %v3904_v46 = vadd.f32 %v3854_v41, %v3586_v36  ;;  %v3048_v41 = vadd.f32 %v6889_v28, %v2730_v16  ;;  %v7795_v28 = vld [vmem:[#allocation58_spill] sm:$0xff]  ;;  %v3049_v19 = vadd.f32 %v6911_v7, %v2731_v25 }
 0x402   : > { %v2510_v32 = vadd.f32 %v7796_v24, %v7795_v28  ;;  %v7803_v28 = vld [vmem:[#allocation92_spill] sm:$0xff] }
 0x403   : > { %4242 = vst.msk [vmem:[%s7036_s13 + $0x8] sm:$0xff] %vm461_vm0, %v4210_v43  ;;  %v3940_v2 = vadd.f32 %v6810_v5, %v3904_v46 }
 0x404   : > { %v3316_v30 = vpop.f32.mrf.mxu3  ;;  %v4070_v23 = vpop.f32.mrf.mxu2 }
 0x405   : > { %v3365_v47 = vadd.f32 %v3316_v30, %v3047_v21  ;;  %v4071_v31 = vadd.f32 %v7025_v13, %v4070_v23  ;;  %v3972_v8 = vmax.f32 %v3940_v2, 0.0  ;;  %v2732_v21 = vadd.f32 %v7797_v4, %v2510_v32 }
 0x407   : > { %v3587_v0 = vadd.f32 %v3538_v52, %v3365_v47  ;;  %v4179_v49 = vadd.f32 %v4147_v10, %v4071_v31  ;;  %v3864_v58 = vpop.f32.mrf.mxu1  ;;  %v3548_v46 = vpop.f32.mrf.mxu0  ;;  %v7798_v47 = vld [vmem:[#allocation51_spill] sm:$0xff] }
 0x408   : > { %v7799_v31 = vld [vmem:[#allocation79_spill] sm:$0xff] }
 0x409   : > { %v3905_v55 = vadd.f32 %v3856_v44, %v3587_v0  ;;  %v4211_v56 = vmax.f32 %v4179_v49, 0.0  ;;  %v2511_v7 = vadd.f32 %v7799_v31, %v7798_v47  ;;  %v7806_v31 = vld [vmem:[#allocation105_spill] sm:$0xff] }
 0x40b   : > { %v3941_v62 = vadd.f32 %v6810_v5, %v3905_v55  ;;  %4243 = vst.msk [vmem:[%s7036_s13 + $0x10] sm:$0xff] %vm461_vm0, %v4211_v56 }
 0x40c   : > { %v3319_v1 = vpop.f32.mrf.mxu3  ;;  %v4072_v52 = vpop.f32.mrf.mxu2 }
 0x40d   : > { %v3973_v51 = vmax.f32 %v3941_v62, 0.0  ;;  %v3366_v14 = vadd.f32 %v3319_v1, %v3048_v41  ;;  %v4073_v44 = vadd.f32 %v7025_v13, %v4072_v52  ;;  %v2733_v62 = vadd.f32 %v7800_v33, %v2511_v7  ;;  %v343_v41 = vld [vmem:[%s4723_s27 + $0x18] sm:$0xff]   ;;  %v7801_v52 = vld [vmem:[#allocation100_spill] sm:$0xff] }
 0x40f   : > { %v4180_v40 = vadd.f32 %v4148_v9, %v4073_v44  ;;  %v3994_v54 = vpack.c.bf16 %v3973_v51, %v3972_v8  ;;  %v3588_v34 = vadd.f32 %v3541_v57, %v3366_v14  ;;  %v3866_v0 = vpop.f32.mrf.mxu1  ;;  %v3051_v51 = vadd.f32 %v6942_v37, %v2733_v62  ;;  %v7805_v37 = vld [vmem:[#allocation87_spill] sm:$0xff] }
 0x410   : > { %v4151_v14 = vunpack.c.l.bf16 %v343_v41 }
 0x411   : > { %v4212_v29 = vmax.f32 %v4180_v40, 0.0  ;;  %4584 = vmatmul.msk.bf16.gmra.mxu2 %vm631_vm1, %v3994_v54  ;;  %v3906_v36 = vadd.f32 %v3859_v18, %v3588_v34  ;;  %v3050_v18 = vadd.f32 %v6926_v48, %v2732_v21  ;;  %v7802_v48 = vld [vmem:[#allocation86_spill] sm:$0xff]  ;;  %v3551_v54 = vpop.f32.mrf.mxu0 }
 0x412   : > { %v2512_v8 = vadd.f32 %v7802_v48, %v7801_v52 }
 0x413   : > { %4244 = vst.msk [vmem:[%s7036_s13 + $0x18] sm:$0xff] %vm461_vm0, %v4212_v29  ;;  %v3942_v10 = vadd.f32 %v6810_v5, %v3906_v36 }
 0x414   : > { %v3321_v15 = vpop.f32.mrf.mxu3  ;;  %v4075_v12 = vpop.f32.mrf.mxu2  ;;  %v2734_v24 = vadd.f32 %v7803_v28, %v2512_v8 }
 0x415   : > { %v3367_v43 = vadd.f32 %v3321_v15, %v3049_v19  ;;  %v4076_v17 = vadd.f32 %v7025_v13, %v4075_v12  ;;  %v3974_v2 = vmax.f32 %v3942_v10, 0.0  ;;  %v7804_v15 = vld [vmem:[#allocation101_spill] sm:$0xff] }
 0x416   : > { %v2513_v12 = vadd.f32 %v7805_v37, %v7804_v15  ;;  %v347_v15 = vld [vmem:[%s4723_s27 + $0x28] sm:$0xff]  }
 0x417   : > { %v3589_v26 = vadd.f32 %v3543_v38, %v3367_v43  ;;  %v4181_v57 = vadd.f32 %v4149_v42, %v4076_v17  ;;  %v4150_v38 = vunpack.c.h.bf16 %v341_v59  ;;  %v3869_v20 = vpop.f32.mrf.mxu1  ;;  %v4152_v43 = vunpack.c.h.bf16 %v343_v41  ;;  %v7809_v41 = vld [vmem:[#allocation108_spill] sm:$0xff] }
 0x418   : > { %v2735_v7 = vadd.f32 %v7806_v31, %v2513_v12 }
 0x419   : > { %v3907_v30 = vadd.f32 %v3861_v27, %v3589_v26  ;;  %v4213_v23 = vmax.f32 %v4181_v57, 0.0 }
 0x41b   : > { %v3943_v49 = vadd.f32 %v6810_v5, %v3907_v30  ;;  %4245 = vst.msk [vmem:[%s7036_s13 + $0x20] sm:$0xff] %vm461_vm0, %v4213_v23  ;;  %v3553_v30 = vpop.f32.mrf.mxu0 }
 0x41c   : > { %v3324_v3 = vpop.f32.mrf.mxu3  ;;  %v4077_v16 = vpop.f32.mrf.mxu2 }
 0x41d   : > { %v3975_v55 = vmax.f32 %v3943_v49, 0.0  ;;  %v3368_v27 = vadd.f32 %v3324_v3, %v3050_v18  ;;  %v4078_v56 = vadd.f32 %v7025_v13, %v4077_v16  ;;  %v3053_v16 = vadd.f32 %v6974_v63, %v2735_v7  ;;  %v7810_v63 = vld [vmem:[#allocation80_spill] sm:$0xff] }
 0x41f   : > { %v4182_v35 = vadd.f32 %v4150_v38, %v4078_v56  ;;  %v3995_v60 = vpack.c.bf16 %v3975_v55, %v3974_v2  ;;  %v3590_v9 = vadd.f32 %v3546_v39, %v3368_v27  ;;  %v3871_v23 = vpop.f32.mrf.mxu1  ;;  %v7808_v38 = vld [vmem:[#allocation46_spill] sm:$0xff] }
 0x421   : > { %v4214_v1 = vmax.f32 %v4182_v35, 0.0  ;;  %4585 = vmatmul.msk.bf16.gmra.mxu2 %vm631_vm1, %v3995_v60  ;;  %v3908_v25 = vadd.f32 %v3864_v58, %v3590_v9  ;;  %v3052_v58 = vadd.f32 %v6960_v53, %v2734_v24  ;;  %v7807_v53 = vld [vmem:[#allocation67_spill] sm:$0xff] }
 0x422   : > { %v2514_v3 = vadd.f32 %v7808_v38, %v7807_v53 }
 0x423   : > { %4246 = vst.msk [vmem:[%s7036_s13 + $0x28] sm:$0xff] %vm461_vm0, %v4214_v1  ;;  %v3944_v32 = vadd.f32 %v6810_v5, %v3908_v25  ;;  %v3556_v1 = vpop.f32.mrf.mxu0 }
 0x424   : > { %v3326_v44 = vpop.f32.mrf.mxu3  ;;  %v4080_v40 = vpop.f32.mrf.mxu2  ;;  %v2736_v9 = vadd.f32 %v7809_v41, %v2514_v3  ;;  %v4156_v3 = vunpack.c.h.bf16 %v347_v15 }
 0x425   : > { %v3369_v59 = vadd.f32 %v3326_v44, %v3051_v51  ;;  %v4081_v39 = vadd.f32 %v7025_v13, %v4080_v40  ;;  %v3976_v57 = vmax.f32 %v3944_v32, 0.0 }
 0x427   : > { %v3591_v34 = vadd.f32 %v3548_v46, %v3369_v59  ;;  %v4183_v29 = vadd.f32 %v4151_v14, %v4081_v39  ;;  %v3874_v52 = vpop.f32.mrf.mxu1  ;;  %v7811_v14 = vld [vmem:[#allocation55_spill] sm:$0xff] }
 0x428   : > { %v2515_v44 = vadd.f32 %v7811_v14, %v7810_v63 }
 0x429   : > { %v3909_v19 = vadd.f32 %v3866_v0, %v3591_v34  ;;  %v4215_v42 = vmax.f32 %v4183_v29, 0.0  ;;  %v345_v0 = vld [vmem:[%s4723_s27 + $0x20] sm:$0xff]  }
 0x42a   : > { %v4153_v2 = vunpack.c.l.bf16 %v345_v0 }
 0x42b   : > { %v3945_v36 = vadd.f32 %v6810_v5, %v3909_v19  ;;  %4247 = vst.msk [vmem:[%s7036_s13 + $0x30] sm:$0xff] %vm461_vm0, %v4215_v42  ;;  %v7812_v19 = vld [vmem:[#allocation34_spill] sm:$0xff] }
 0x42c   : > { %v3329_v17 = vpop.f32.mrf.mxu3  ;;  %v4082_v26 = vpop.f32.mrf.mxu2  ;;  %v2737_v42 = vadd.f32 %v7812_v19, %v2515_v44 }
 0x42d   : > { %v3977_v4 = vmax.f32 %v3945_v36, 0.0  ;;  %v3370_v21 = vadd.f32 %v3329_v17, %v3052_v58  ;;  %v4083_v10 = vadd.f32 %v7025_v13, %v4082_v26  ;;  %v3558_v36 = vpop.f32.mrf.mxu0  ;;  %v4155_v26 = vunpack.c.l.bf16 %v347_v15 }
 0x42e   : > { %v3055_v17 = vadd.f32 %v6996_v22, %v2737_v42 }
 0x42f   : > { %v4184_v46 = vadd.f32 %v4152_v43, %v4083_v10  ;;  %v3996_v47 = vpack.c.bf16 %v3977_v4, %v3976_v57  ;;  %v3592_v49 = vadd.f32 %v3551_v54, %v3370_v21  ;;  %v3054_v54 = vadd.f32 %v6986_v61, %v2736_v9  ;;  %v7813_v61 = vld [vmem:[#allocation18_spill] sm:$0xff]  ;;  %v3876_v43 = vpop.f32.mrf.mxu1  ;;  %v349_v9 = vld [vmem:[%s4723_s27 + $0x30] sm:$0xff]  }
 0x430   : > { %v2516_v58 = vadd.f32 %v7813_v61, %v6778_v11 }
 0x431   : > { %v4216_v18 = vmax.f32 %v4184_v46, 0.0  ;;  %4586 = vmatmul.msk.bf16.gmra.mxu2 %vm631_vm1, %v3996_v47  ;;  %v3910_v56 = vadd.f32 %v3869_v20, %v3592_v49  ;;  %v4154_v20 = vunpack.c.h.bf16 %v345_v0  ;;  %v7814_v47 = vld [vmem:[#allocation106_spill] sm:$0xff] }
 0x432   : > { %v2738_v31 = vadd.f32 %v7814_v47, %v2516_v58  ;;  %v7815_v49 = vld [vmem:[#allocation50_spill] sm:$0xff] }
 0x433   : > { %4248 = vst.msk [vmem:[%s7036_s13 + $0x38] sm:$0xff] %vm461_vm0, %v4216_v18  ;;  %v3946_v48 = vadd.f32 %v6810_v5, %v3910_v56  ;;  %v2517_v18 = vadd.f32 %v7815_v49, %v6786_v6 }
 0x434   : > { %v3331_v55 = vpop.f32.mrf.mxu3  ;;  %v4085_v27 = vpop.f32.mrf.mxu2  ;;  %v3056_v38 = vadd.f32 %v7006_v45, %v2738_v31 }
 0x435   : > { %v3371_v35 = vadd.f32 %v3331_v55, %v3053_v16  ;;  %v4086_v60 = vadd.f32 %v7025_v13, %v4085_v27  ;;  %v3978_v39 = vmax.f32 %v3946_v48, 0.0  ;;  %v3561_v53 = vpop.f32.mrf.mxu0  ;;  %v4157_v48 = vunpack.c.l.bf16 %v349_v9 }
 0x437   : > { %v3593_v33 = vadd.f32 %v3553_v30, %v3371_v35  ;;  %v4185_v62 = vadd.f32 %v4153_v2, %v4086_v60  ;;  %v3879_v60 = vpop.f32.mrf.mxu1 }
 0x439   : > { %v3911_v8 = vadd.f32 %v3871_v23, %v3593_v33  ;;  %v4217_v51 = vmax.f32 %v4185_v62, 0.0  ;;  %v7816_v62 = vld [vmem:[#allocation42_spill] sm:$0xff] }
 0x43a   : > { %v2739_v41 = vadd.f32 %v7816_v62, %v2517_v18  ;;  %v355_v18 = vld [vmem:[%s4723_s27 + $0x48] sm:$0xff]  }
 0x43b   : > { %v3947_v40 = vadd.f32 %v6810_v5, %v3911_v8  ;;  %4249 = vst.msk [vmem:[%s7036_s13 + $0x40] sm:$0xff] %vm461_vm0, %v4217_v51 }
 0x43c   : > { %v3334_v25 = vpop.f32.mrf.mxu3  ;;  %v4087_v59 = vpop.f32.mrf.mxu2  ;;  %v3057_v45 = vadd.f32 %v7017_v50, %v2739_v41  ;;  %v4158_v50 = vunpack.c.h.bf16 %v349_v9 }
 0x43d   : > { %v3979_v34 = vmax.f32 %v3947_v40, 0.0  ;;  %v3372_v29 = vadd.f32 %v3334_v25, %v3054_v54  ;;  %v4088_v28 = vadd.f32 %v7025_v13, %v4087_v59  ;;  %v3563_v40 = vpop.f32.mrf.mxu0 }
 0x43f   : > { %v4186_v24 = vadd.f32 %v4154_v20, %v4088_v28  ;;  %v3997_v32 = vpack.c.bf16 %v3979_v34, %v3978_v39  ;;  %v3594_v37 = vadd.f32 %v3556_v1, %v3372_v29  ;;  %v3881_v25 = vpop.f32.mrf.mxu1 }
 0x441   : > { %v4218_v12 = vmax.f32 %v4186_v24, 0.0  ;;  %4587 = vmatmul.msk.bf16.gmra.mxu2 %vm631_vm1, %v3997_v32  ;;  %v3912_v21 = vadd.f32 %v3874_v52, %v3594_v37  ;;  %v351_v37 = vld [vmem:[%s4723_s27 + $0x38] sm:$0xff]  }
 0x443   : > { %4250 = vst.msk [vmem:[%s7036_s13 + $0x48] sm:$0xff] %vm461_vm0, %v4218_v12  ;;  %v3948_v7 = vadd.f32 %v6810_v5, %v3912_v21  ;;  %v353_v21 = vld [vmem:[%s4723_s27 + $0x40] sm:$0xff]  }
 0x444   : > { %v3336_v57 = vpop.f32.mrf.mxu3  ;;  %v4090_v4 = vpop.f32.mrf.mxu2 }
 0x445   : > { %v3373_v10 = vadd.f32 %v3336_v57, %v3055_v17  ;;  %v4091_v30 = vadd.f32 %v7025_v13, %v4090_v4  ;;  %v3980_v55 = vmax.f32 %v3948_v7, 0.0  ;;  %v4160_v17 = vunpack.c.h.bf16 %v351_v37 }
 0x446   : > { %v4162_v7 = vunpack.c.h.bf16 %v353_v21 }
 0x447   : > { %v3595_v23 = vadd.f32 %v3558_v36, %v3373_v10  ;;  %v4187_v46 = vadd.f32 %v4155_v26, %v4091_v30  ;;  %v4161_v30 = vunpack.c.l.bf16 %v353_v21 }
 0x449   : > { %v3913_v11 = vadd.f32 %v3876_v43, %v3595_v23  ;;  %v4219_v0 = vmax.f32 %v4187_v46, 0.0 }
 0x44b   : > { %v3949_v22 = vadd.f32 %v6810_v5, %v3913_v11  ;;  %4251 = vst.msk [vmem:[%s7036_s13 + $0x50] sm:$0xff] %vm461_vm0, %v4219_v0 }
 0x44c   : > { %v3339_v16 = vpop.f32.mrf.mxu3  ;;  %v4092_v2 = vpop.f32.mrf.mxu2 }
 0x44d   : > { %v3981_v27 = vmax.f32 %v3949_v22, 0.0  ;;  %v3374_v56 = vadd.f32 %v3339_v16, %v3056_v38  ;;  %v4093_v35 = vadd.f32 %v7025_v13, %v4092_v2 }
 0x44f   : > { %v4188_v33 = vadd.f32 %v4156_v3, %v4093_v35  ;;  %v3998_v6 = vpack.c.bf16 %v3981_v27, %v3980_v55  ;;  %v3596_v1 = vadd.f32 %v3561_v53, %v3374_v56  ;;  %v4163_v53 = vunpack.c.l.bf16 %v355_v18 }
 0x450   : > { %v4164_v55 = vunpack.c.h.bf16 %v355_v18 }
 0x451   : > { %v4220_v52 = vmax.f32 %v4188_v33, 0.0  ;;  %4588 = vmatmul.msk.bf16.gmra.mxu2 %vm631_vm1, %v3998_v6  ;;  %v3914_v63 = vadd.f32 %v3879_v60, %v3596_v1  ;;  %v357_v60 = vld [vmem:[%s4723_s27 + $0x50] sm:$0xff]  }
 0x452   : > { %v4165_v6 = vunpack.c.l.bf16 %v357_v60 }
 0x453   : > { %4252 = vst.msk [vmem:[%s7036_s13 + $0x58] sm:$0xff] %vm461_vm0, %v4220_v52  ;;  %v3950_v59 = vadd.f32 %v6810_v5, %v3914_v63  ;;  %v4166_v52 = vunpack.c.h.bf16 %v357_v60 }
 0x454   : > { %v3341_v8 = vpop.f32.mrf.mxu3  ;;  %v4095_v51 = vpop.f32.mrf.mxu2 }
 0x455   : > { %v3375_v14 = vadd.f32 %v3341_v8, %v3057_v45  ;;  %v4096_v44 = vadd.f32 %v7025_v13, %v4095_v51  ;;  %v3982_v24 = vmax.f32 %v3950_v59, 0.0  ;;  %v359_v51 = vld [vmem:[%s4723_s27 + $0x58] sm:$0xff]  }
 0x457   : > { %v3597_v54 = vadd.f32 %v3563_v40, %v3375_v14  ;;  %v4189_v20 = vadd.f32 %v4157_v48, %v4096_v44  ;;  %v4167_v14 = vunpack.c.l.bf16 %v359_v51 }
 0x459   : > { %v3915_v39 = vadd.f32 %v3881_v25, %v3597_v54  ;;  %v4221_v34 = vmax.f32 %v4189_v20, 0.0  ;;  %v4168_v25 = vunpack.c.h.bf16 %v359_v51 }
 0x45b   : > { %v3951_v29 = vadd.f32 %v6810_v5, %v3915_v39  ;;  %4253 = vst.msk [vmem:[%s7036_s13 + $0x60] sm:$0xff] %vm461_vm0, %v4221_v34  ;;  %v4159_v5 = vunpack.c.l.bf16 %v351_v37 }
 0x45c   : > { %v4097_v28 = vpop.f32.mrf.mxu2 }
 0x45d   : > { %v3983_v32 = vmax.f32 %v3951_v29, 0.0  ;;  %v4098_v19 = vadd.f32 %v7025_v13, %v4097_v28  ;;  %v361_v29 = vld [vmem:[%s4723_s27 + $0x60] sm:$0xff]  }
 0x45e   : > { %v4169_v28 = vunpack.c.l.bf16 %v361_v29 }
 0x45f   : > { %v4190_v42 = vadd.f32 %v4158_v50, %v4098_v19  ;;  %v3999_v15 = vpack.c.bf16 %v3983_v32, %v3982_v24 }
 0x461   : > { %v4222_v12 = vmax.f32 %v4190_v42, 0.0  ;;  %4589 = vmatmul.msk.bf16.gmra.mxu2 %vm631_vm1, %v3999_v15  ;;  %v4170_v15 = vunpack.c.h.bf16 %v361_v29 }
 0x463   : > { %4254 = vst.msk [vmem:[%s7036_s13 + $0x68] sm:$0xff] %vm461_vm0, %v4222_v12 }
 0x464   : > { %v4100_v36 = vpop.f32.mrf.mxu2 }
 0x465   : > { %v4101_v61 = vadd.f32 %v7025_v13, %v4100_v36  ;;  %v363_v36 = vld [vmem:[%s4723_s27 + $0x68] sm:$0xff]  }
 0x467   : > { %v4191_v58 = vadd.f32 %v4159_v5, %v4101_v61 }
 0x469   : > { %v4223_v43 = vmax.f32 %v4191_v58, 0.0  ;;  %v4171_v58 = vunpack.c.l.bf16 %v363_v36 }
 0x46b   : > { %4255 = vst.msk [vmem:[%s7036_s13 + $0x70] sm:$0xff] %vm461_vm0, %v4223_v43 }
 0x46c   : > { %v4102_v26 = vpop.f32.mrf.mxu2 }
 0x46d   : > { %v4103_v57 = vadd.f32 %v7025_v13, %v4102_v26 }
 0x46f   : > { %v4192_v4 = vadd.f32 %v4160_v17, %v4103_v57 }
 0x471   : > { %v4224_v10 = vmax.f32 %v4192_v4, 0.0  ;;  %v4172_v4 = vunpack.c.h.bf16 %v363_v36 }
 0x473   : > { %4256 = vst.msk [vmem:[%s7036_s13 + $0x78] sm:$0xff] %vm461_vm0, %v4224_v10 }
 0x474   : > { %v4105_v23 = vpop.f32.mrf.mxu2 }
 0x475   : > { %v4106_v46 = vadd.f32 %v7025_v13, %v4105_v23  ;;  %v365_v23 = vld [vmem:[%s4723_s27 + $0x70] sm:$0xff]  }
 0x477   : > { %v4193_v47 = vadd.f32 %v4161_v30, %v4106_v46 }
 0x479   : > { %v4225_v31 = vmax.f32 %v4193_v47, 0.0  ;;  %v4173_v47 = vunpack.c.l.bf16 %v365_v23 }
 0x47b   : > { %4257 = vst.msk [vmem:[%s7036_s13 + $0x80] sm:$0xff] %vm461_vm0, %v4225_v31 }
 0x47c   : > { %v4107_v11 = vpop.f32.mrf.mxu2 }
 0x47d   : > { %v4108_v0 = vadd.f32 %v7025_v13, %v4107_v11 }
 0x47f   : > { %v4194_v49 = vadd.f32 %v4162_v7, %v4108_v0 }
 0x481   : > { %v4226_v22 = vmax.f32 %v4194_v49, 0.0  ;;  %v4174_v49 = vunpack.c.h.bf16 %v365_v23 }
 0x483   : > { %4258 = vst.msk [vmem:[%s7036_s13 + $0x88] sm:$0xff] %vm461_vm0, %v4226_v22 }
 0x484   : > { %v4110_v38 = vpop.f32.mrf.mxu2 }
 0x485   : > { %v4111_v3 = vadd.f32 %v7025_v13, %v4110_v38  ;;  %v367_v38 = vld [vmem:[%s4723_s27 + $0x78] sm:$0xff]  }
 0x487   : > { %v4195_v16 = vadd.f32 %v4163_v53, %v4111_v3 }
 0x489   : > { %v4227_v2 = vmax.f32 %v4195_v16, 0.0  ;;  %v4175_v16 = vunpack.c.l.bf16 %v367_v38 }
 0x48b   : > { %4259 = vst.msk [vmem:[%s7036_s13 + $0x90] sm:$0xff] %vm461_vm0, %v4227_v2 }
 0x48c   : > { %v4112_v27 = vpop.f32.mrf.mxu2 }
 0x48d   : > { %v4113_v56 = vadd.f32 %v7025_v13, %v4112_v27 }
 0x48f   : > { %v4196_v35 = vadd.f32 %v4164_v55, %v4113_v56 }
 0x491   : > { %v4228_v33 = vmax.f32 %v4196_v35, 0.0  ;;  %v4176_v35 = vunpack.c.h.bf16 %v367_v38 }
 0x493   : > { %4260 = vst.msk [vmem:[%s7036_s13 + $0x98] sm:$0xff] %vm461_vm0, %v4228_v33 }
 0x494   : > { %v4115_v62 = vpop.f32.mrf.mxu2 }
 0x495   : > { %v4116_v41 = vadd.f32 %v7025_v13, %v4115_v62 }
 0x497   : > { %v4197_v9 = vadd.f32 %v4165_v6, %v4116_v41 }
 0x499   : > { %v4229_v1 = vmax.f32 %v4197_v9, 0.0 }
 0x49b   : > { %4261 = vst.msk [vmem:[%s7036_s13 + $0xa0] sm:$0xff] %vm461_vm0, %v4229_v1 }
 0x49c   : > { %v4117_v45 = vpop.f32.mrf.mxu2 }
 0x49d   : > { %v4118_v48 = vadd.f32 %v7025_v13, %v4117_v45 }
 0x49f   : > { %v4198_v8 = vadd.f32 %v4166_v52, %v4118_v48 }
 0x4a1   : > { %v4230_v63 = vmax.f32 %v4198_v8, 0.0 }
 0x4a3   : > { %4262 = vst.msk [vmem:[%s7036_s13 + $0xa8] sm:$0xff] %vm461_vm0, %v4230_v63 }
 0x4a4   : > { %v4120_v44 = vpop.f32.mrf.mxu2 }
 0x4a5   : > { %v4121_v40 = vadd.f32 %v7025_v13, %v4120_v44 }
 0x4a7   : > { %v4199_v54 = vadd.f32 %v4167_v14, %v4121_v40 }
 0x4a9   : > { %v4231_v20 = vmax.f32 %v4199_v54, 0.0 }
 0x4ab   : > { %4263 = vst.msk [vmem:[%s7036_s13 + $0xb0] sm:$0xff] %vm461_vm0, %v4231_v20 }
 0x4ac   : > { %v4122_v59 = vpop.f32.mrf.mxu2 }
 0x4ad   : > { %v4123_v39 = vadd.f32 %v7025_v13, %v4122_v59 }
 0x4af   : > { %v4200_v34 = vadd.f32 %v4168_v25, %v4123_v39 }
 0x4b1   : > { %v4232_v50 = vmax.f32 %v4200_v34, 0.0 }
 0x4b3   : > { %4264 = vst.msk [vmem:[%s7036_s13 + $0xb8] sm:$0xff] %vm461_vm0, %v4232_v50 }
 0x4b4   : > { %v4125_v24 = vpop.f32.mrf.mxu2 }
 0x4b5   : > { %v4126_v32 = vadd.f32 %v7025_v13, %v4125_v24 }
 0x4b7   : > { %v4201_v19 = vadd.f32 %v4169_v28, %v4126_v32 }
 0x4b9   : > { %v4233_v42 = vmax.f32 %v4201_v19, 0.0 }
 0x4bb   : > { %4265 = vst.msk [vmem:[%s7036_s13 + $0xc0] sm:$0xff] %vm461_vm0, %v4233_v42 }
 0x4bc   : > { %v4127_v37 = vpop.f32.mrf.mxu2 }
 0x4bd   : > { %v4128_v12 = vadd.f32 %v7025_v13, %v4127_v37 }
 0x4bf   : > { %v4202_v5 = vadd.f32 %v4170_v15, %v4128_v12 }
 0x4c1   : > { %v4234_v61 = vmax.f32 %v4202_v5, 0.0 }
 0x4c3   : > { %4266 = vst.msk [vmem:[%s7036_s13 + $0xc8] sm:$0xff] %vm461_vm0, %v4234_v61 }
 0x4c4   : > { %v4130_v43 = vpop.f32.mrf.mxu2 }
 0x4c5   : > { %v4131_v17 = vadd.f32 %v7025_v13, %v4130_v43 }
 0x4c7   : > { %v4203_v26 = vadd.f32 %v4171_v58, %v4131_v17 }
 0x4c9   : > { %v4235_v57 = vmax.f32 %v4203_v26, 0.0 }
 0x4cb   : > { %4267 = vst.msk [vmem:[%s7036_s13 + $0xd0] sm:$0xff] %vm461_vm0, %v4235_v57 }
 0x4cc   : > { %v4132_v21 = vpop.f32.mrf.mxu2 }
 0x4cd   : > { %v4133_v10 = vadd.f32 %v7025_v13, %v4132_v21 }
 0x4cf   : > { %v4204_v30 = vadd.f32 %v4172_v4, %v4133_v10 }
 0x4d1   : > { %v4236_v46 = vmax.f32 %v4204_v30, 0.0 }
 0x4d3   : > { %4268 = vst.msk [vmem:[%s7036_s13 + $0xd8] sm:$0xff] %vm461_vm0, %v4236_v46 }
 0x4d4   : > { %v4135_v31 = vpop.f32.mrf.mxu2 }
 0x4d5   : > { %v4136_v7 = vadd.f32 %v7025_v13, %v4135_v31 }
 0x4d7   : > { %v4205_v11 = vadd.f32 %v4173_v47, %v4136_v7 }
 0x4d9   : > { %v4237_v0 = vmax.f32 %v4205_v11, 0.0 }
 0x4db   : > { %4269 = vst.msk [vmem:[%s7036_s13 + $0xe0] sm:$0xff] %vm461_vm0, %v4237_v0 }
 0x4dc   : > { %v4137_v18 = vpop.f32.mrf.mxu2 }
 0x4dd   : > { %v4138_v22 = vadd.f32 %v7025_v13, %v4137_v18 }
 0x4df   : > { %v4206_v53 = vadd.f32 %v4174_v49, %v4138_v22 }
 0x4e1   : > { %v4238_v3 = vmax.f32 %v4206_v53, 0.0 }
 0x4e3   : > { %4270 = vst.msk [vmem:[%s7036_s13 + $0xe8] sm:$0xff] %vm461_vm0, %v4238_v3 }
 0x4e4   : > { %v4140_v2 = vpop.f32.mrf.mxu2 }
 0x4e5   : > { %v4141_v55 = vadd.f32 %v7025_v13, %v4140_v2 }
 0x4e7   : > { %v4207_v27 = vadd.f32 %v4175_v16, %v4141_v55 }
 0x4e9   : > { %v4239_v56 = vmax.f32 %v4207_v27, 0.0 }
 0x4eb   : > { %4271 = vst.msk [vmem:[%s7036_s13 + $0xf0] sm:$0xff] %vm461_vm0, %v4239_v56 }
 0x4ec   : > { %v4142_v60 = vpop.f32.mrf.mxu2 }
 0x4ed   : > { %v4143_v33 = vadd.f32 %v7025_v13, %v4142_v60 }
 0x4ef   : > { %v4208_v6 = vadd.f32 %v4176_v35, %v4143_v33 }
 0x4f1   : > { %v4240_v62 = vmax.f32 %v4208_v6, 0.0 }
 0x4f3   : > { %4272 = vst.msk [vmem:[%s7036_s13 + $0xf8] sm:$0xff] %vm461_vm0, %v4240_v62 }
 0x4f4 PF: > { %s19_s30 = sadd.s32 1, %s4636_s30  }
 0x4f5   : > { %p16_p4 = scmp.ge.s32.totalorder %s19_s30, 4  }
 0x4f7   :  { %18 = sbr.rel (!%p16_p4) target bundleno = 1 (0x1), region = 94 }

</bundles_post_ra>
